<compile_context>
chip_gen: v7x
topology: tpu7x:2x2x1
jax: 0.10.0
libtpu: 0.0.40
codegen_flags: <defaults>
</compile_context>

<pallas_src>
import functools

import jax
import jax.numpy as jnp
from jax import lax
from jax.experimental import pallas as pl
from jax.experimental.pallas import tpu as pltpu

EXPANSION = 4
BN_EPS = 1e-5
_COL0 = 8          # sublane-aligned column where the conv2 interior starts


# ----------------------------------------------------------------------------
# Pallas kernel
# ----------------------------------------------------------------------------
def _bottleneck_kernel(H, W, Ho, Wo, stride, has_shortcut, *refs):
    """One grid step = `block_n` images; bf16 MXU operands, f32 accumulation."""
    if has_shortcut:
        (x_ref, w1_ref, w2_ref, w3_ref, wsc_ref,
         s1_ref, b1_ref, s2_ref, b2_ref, s3_ref, b3_ref, ssc_ref, bsc_ref,
         out_ref, h1pad_ref) = refs
    else:
        (x_ref, w1_ref, w2_ref, w3_ref,
         s1_ref, b1_ref, s2_ref, b2_ref, s3_ref, b3_ref,
         out_ref, h1pad_ref) = refs
        wsc_ref = ssc_ref = bsc_ref = None

    nb, _, _, Cin = x_ref.shape
    P = w1_ref.shape[1]
    Cout = w3_ref.shape[1]
    cols = h1pad_ref.shape[2]
    bf16 = jnp.bfloat16
    m1 = nb * H * W
    m2 = nb * Ho * Wo

    # ---- zero only the halo of the padded scratch.  The interior is fully
    #      overwritten by stage 1.  Re-done every step so the kernel stays
    #      correct when the "parallel" batch axis is sharded across cores.
    h1pad_ref[:, pl.ds(0, 1), :, :] = jnp.zeros((nb, 1, cols, P), bf16)
    h1pad_ref[:, pl.ds(H + 1, 1), :, :] = jnp.zeros((nb, 1, cols, P), bf16)
    h1pad_ref[:, pl.ds(1, H), pl.ds(0, _COL0), :] = (
        jnp.zeros((nb, H, _COL0, P), bf16))
    h1pad_ref[:, pl.ds(1, H), pl.ds(_COL0 + W, cols - _COL0 - W), :] = (
        jnp.zeros((nb, H, cols - _COL0 - W, P), bf16))

    # ---- stage 1: conv1 (1x1) + bn1 + relu -- one block-wide matmul.
    x_flat = x_ref[...].reshape(m1, Cin)                        # bf16 (m1,Cin)
    h1 = jnp.dot(x_flat, w1_ref[...], preferred_element_type=jnp.float32)
    h1 = jnp.maximum(h1 * s1_ref[...] + b1_ref[...], 0.0)       # f32 (m1, P)
    h1pad_ref[:, pl.ds(1, H), pl.ds(_COL0, W), :] = (
        h1.astype(bf16).reshape(nb, H, W, P))

    # ---- stage 2: conv2 (3x3, pad=1, stride) as 9 block-wide matmuls over
    #      shifted windows of the zero-padded scratch.
    sh = stride * (Ho - 1) + 1
    sw = stride * (Wo - 1) + 1
    acc = jnp.zeros((m2, P), jnp.float32)
    for di in range(3):
        for dj in range(3):
            win = h1pad_ref[:, pl.ds(di, sh), pl.ds(_COL0 - 1 + dj, sw), :]
            if stride > 1:
                win = lax.slice(win, (0, 0, 0, 0), win.shape,
                                (1, stride, stride, 1))
            acc = acc + jnp.dot(win.reshape(m2, P), w2_ref[di, dj],
                                preferred_element_type=jnp.float32)
    h2 = jnp.maximum(acc * s2_ref[...] + b2_ref[...], 0.0)      # f32 (m2, P)

    # ---- stage 3: conv3 (1x1) + bn3.
    h3 = jnp.dot(h2.astype(bf16), w3_ref[...],
                 preferred_element_type=jnp.float32)
    h3 = h3 * s3_ref[...] + b3_ref[...]                         # f32 (m2,Cout)

    # ---- shortcut (projection conv + bn, or identity when Cin == Cout).
    if stride == 1:
        xs = x_flat                                             # (m2, Cin)
    else:
        xw = lax.slice(x_ref[...], (0, 0, 0, 0), (nb, sh, sw, Cin),
                       (1, stride, stride, 1))
        xs = xw.reshape(m2, Cin)
    if has_shortcut:
        sc = jnp.dot(xs, wsc_ref[...], preferred_element_type=jnp.float32)
        sc = sc * ssc_ref[...] + bsc_ref[...]
    else:
        sc = xs.astype(jnp.float32)        # identity path: Cin == Cout

    # ---- residual add + relu, single store of the whole block.
    out = jnp.maximum(h3 + sc, 0.0)
    out_ref[...] = out.reshape(nb, Ho * Wo, Cout)


# ----------------------------------------------------------------------------
# Parameter setup (deterministic, in-script)
# ----------------------------------------------------------------------------
def init_params(key, in_planes, planes, stride):
    out_planes = EXPANSION * planes
    ks = jax.random.split(key, 8)

    def conv_w(k, shape, fan_in):
        return jax.random.normal(k, shape, jnp.float32) / jnp.sqrt(float(fan_in))

    def bn_p(k, c):
        k1, k2, k3, k4 = jax.random.split(k, 4)
        gamma = 1.0 + 0.1 * jax.random.normal(k1, (c,), jnp.float32)
        beta = 0.1 * jax.random.normal(k2, (c,), jnp.float32)
        mean = 0.1 * jax.random.normal(k3, (c,), jnp.float32)
        var = 0.5 + jnp.abs(jax.random.normal(k4, (c,), jnp.float32))
        return (gamma, beta, mean, var)

    has_shortcut = (stride != 1) or (in_planes != out_planes)
    params = dict(
        w1=conv_w(ks[0], (in_planes, planes), in_planes),           # (Cin, P)
        w2=conv_w(ks[1], (3, 3, planes, planes), 9 * planes),       # HWIO
        w3=conv_w(ks[2], (planes, out_planes), planes),             # (P, 4P)
        bn1=bn_p(ks[3], planes),
        bn2=bn_p(ks[4], planes),
        bn3=bn_p(ks[5], out_planes),
        wsc=conv_w(ks[6], (in_planes, out_planes), in_planes) if has_shortcut else None,
        bnsc=bn_p(ks[7], out_planes) if has_shortcut else None,
    )
    return params, has_shortcut


def _fold_bn(bn):
    gamma, beta, mean, var = bn
    scale = gamma / jnp.sqrt(var + BN_EPS)
    shift = beta - mean * scale
    return scale.reshape(1, -1), shift.reshape(1, -1)


# ----------------------------------------------------------------------------
# Wrapper: NCHW in / NCHW out, Pallas kernel on NHWC / flattened output
# ----------------------------------------------------------------------------
def bottleneck_forward(x_nchw, params, has_shortcut, stride=1, block_n=1):
    N, Cin, H, W = x_nchw.shape
    P = params['w1'].shape[1]
    Cout = params['w3'].shape[1]
    Ho = (H - 1) // stride + 1
    Wo = (W - 1) // stride + 1
    assert N % block_n == 0, "block_n must divide the batch size"
    bf16 = jnp.bfloat16

    # NHWC, bf16 matmul operands (f32 accumulation inside the kernel).
    x = jnp.transpose(x_nchw, (0, 2, 3, 1)).astype(bf16)

    s1, b1 = _fold_bn(params['bn1'])
    s2, b2 = _fold_bn(params['bn2'])
    s3, b3 = _fold_bn(params['bn3'])

    def _full(shape):
        return pl.BlockSpec(shape, lambda n: (0,) * len(shape))

    operands = [x, params['w1'].astype(bf16), params['w2'].astype(bf16),
                params['w3'].astype(bf16)]
    in_specs = [pl.BlockSpec((block_n, H, W, Cin), lambda n: (n, 0, 0, 0)),
                _full((Cin, P)), _full((3, 3, P, P)), _full((P, Cout))]
    if has_shortcut:
        operands.append(params['wsc'].astype(bf16))
        in_specs.append(_full((Cin, Cout)))
    operands += [s1, b1, s2, b2, s3, b3]
    in_specs += [_full((1, P))] * 4 + [_full((1, Cout))] * 2
    if has_shortcut:
        ssc, bsc = _fold_bn(params['bnsc'])
        operands += [ssc, bsc]
        in_specs += [_full((1, Cout))] * 2

    kernel = functools.partial(_bottleneck_kernel,
                               H, W, Ho, Wo, stride, has_shortcut)

    out = pl.pallas_call(
        kernel,
        out_shape=jax.ShapeDtypeStruct((N, Ho * Wo, Cout), jnp.float32),
        grid=(N // block_n,),
        in_specs=in_specs,
        out_specs=pl.BlockSpec((block_n, Ho * Wo, Cout), lambda n: (n, 0, 0)),
        scratch_shapes=[pltpu.VMEM((block_n, H + 2, _COL0 + W + 8, P), bf16)],
        compiler_params=pltpu.CompilerParams(
            dimension_semantics=("parallel",)),
    )(*operands)

    out = out.reshape(N, Ho, Wo, Cout)
    return jnp.transpose(out, (0, 3, 1, 2))     # back to NCHW (f32)


# ----------------------------------------------------------------------------
# Pure-JAX reference (same bf16 operand rounding as the kernel, f32 accumulate)
# ----------------------------------------------------------------------------
def _reference(x_nchw, params, has_shortcut, stride=1):
    r = lambda a: a.astype(jnp.bfloat16).astype(jnp.float32)
    s1, b1 = _fold_bn(params['bn1'])
    s2, b2 = _fold_bn(params['bn2'])
    s3, b3 = _fold_bn(params['bn3'])

    x = r(jnp.transpose(x_nchw, (0, 2, 3, 1)).astype(jnp.float32))
    h1 = jax.nn.relu(jnp.einsum('nhwc,cp->nhwp', x, r(params['w1'])) * s1 + b1)
    h2 = lax.conv_general_dilated(
        r(h1), r(params['w2']), window_strides=(stride, stride),
        padding=((1, 1), (1, 1)),
        dimension_numbers=('NHWC', 'HWIO', 'NHWC'))
    h2 = jax.nn.relu(h2 * s2 + b2)
    h3 = jnp.einsum('nhwp,pq->nhwq', r(h2), r(params['w3'])) * s3 + b3
    xs = x[:, ::stride, ::stride, :]
    if has_shortcut:
        ssc, bsc = _fold_bn(params['bnsc'])
        sc = jnp.einsum('nhwc,cq->nhwq', xs, r(params['wsc'])) * ssc + bsc
    else:
        sc = xs
    out = jax.nn.relu(h3 + sc)
    return jnp.transpose(out, (0, 3, 1, 2))


# ----------------------------------------------------------------------------
if __name__ == "__main__":
    key = jax.random.PRNGKey(0)
    kx, kp = jax.random.split(key)

    N, in_planes, H, W = 2, 4, 16, 16
    planes, stride = 4, 1          # -> out channels = 16, projection shortcut

    x = jax.random.normal(kx, (N, in_planes, H, W), jnp.float32)
    params, has_shortcut = init_params(kp, in_planes, planes, stride)

    ref = _reference(x, params, has_shortcut, stride)

    # one image per grid step ("parallel" batch axis -> both v7x TensorCores)
    out = jax.block_until_ready(
        bottleneck_forward(x, params, has_shortcut, stride, block_n=1))
    assert out.shape == (N, EXPANSION * planes, H // stride, W // stride), out.shape
    err = float(jnp.max(jnp.abs(out - ref)))
    # kernel and reference use identical bf16 operand rounding, so the true
    # discrepancy is f32 accumulation order; margin covers rare bf16
    # rounding-boundary flips of intermediate activations.
    assert err < 2e-2, f"max abs err {err}"

    # several images per grid step (amortizes the per-grid-step overhead)
    out2 = jax.block_until_ready(
        bottleneck_forward(x, params, has_shortcut, stride, block_n=2))
    err2 = float(jnp.max(jnp.abs(out2 - ref)))
    assert err2 < 2e-2, f"max abs err {err2}"

    print("KERNEL_OK")
</pallas_src>

<mosaic_0001>
module attributes {stable_mosaic.version = 11 : i64} {
  func.func @_bottleneck_kernel(%arg0: i32, %arg1: memref<1x16x16x4xbf16, #tpu.memory_space<vmem>>, %arg2: memref<4x4xbf16, #tpu.memory_space<vmem>>, %arg3: memref<3x3x4x4xbf16, #tpu.memory_space<vmem>>, %arg4: memref<4x16xbf16, #tpu.memory_space<vmem>>, %arg5: memref<4x16xbf16, #tpu.memory_space<vmem>>, %arg6: memref<1x4xf32, #tpu.memory_space<vmem>>, %arg7: memref<1x4xf32, #tpu.memory_space<vmem>>, %arg8: memref<1x4xf32, #tpu.memory_space<vmem>>, %arg9: memref<1x4xf32, #tpu.memory_space<vmem>>, %arg10: memref<1x16xf32, #tpu.memory_space<vmem>>, %arg11: memref<1x16xf32, #tpu.memory_space<vmem>>, %arg12: memref<1x16xf32, #tpu.memory_space<vmem>>, %arg13: memref<1x16xf32, #tpu.memory_space<vmem>>, %arg14: memref<1x256x16xf32, #tpu.memory_space<vmem>>, %arg15: memref<1x18x32x4xbf16, #tpu.memory_space<vmem>>) attributes {dimension_semantics = [#tpu.dimension_semantics<parallel>], iteration_bounds = array<i64: 2>, scalar_prefetch = 0 : i64, scratch_operands = 1 : i64, tpu.core_type = #tpu.core_type<tc>, window_params = [{transform_indices = @transform_0, window_bounds = array<i64: 1, 16, 16, 4>}, {pipeline_mode = #tpu.pipeline_mode<synchronous>, transform_indices = @transform_1, window_bounds = array<i64: 4, 4>}, {pipeline_mode = #tpu.pipeline_mode<synchronous>, transform_indices = @transform_2, window_bounds = array<i64: 3, 3, 4, 4>}, {pipeline_mode = #tpu.pipeline_mode<synchronous>, transform_indices = @transform_3, window_bounds = array<i64: 4, 16>}, {pipeline_mode = #tpu.pipeline_mode<synchronous>, transform_indices = @transform_4, window_bounds = array<i64: 4, 16>}, {pipeline_mode = #tpu.pipeline_mode<synchronous>, transform_indices = @transform_5, window_bounds = array<i64: 1, 4>}, {pipeline_mode = #tpu.pipeline_mode<synchronous>, transform_indices = @transform_6, window_bounds = array<i64: 1, 4>}, {pipeline_mode = #tpu.pipeline_mode<synchronous>, transform_indices = @transform_7, window_bounds = array<i64: 1, 4>}, {pipeline_mode = #tpu.pipeline_mode<synchronous>, transform_indices = @transform_8, window_bounds = array<i64: 1, 4>}, {pipeline_mode = #tpu.pipeline_mode<synchronous>, transform_indices = @transform_9, window_bounds = array<i64: 1, 16>}, {pipeline_mode = #tpu.pipeline_mode<synchronous>, transform_indices = @transform_10, window_bounds = array<i64: 1, 16>}, {pipeline_mode = #tpu.pipeline_mode<synchronous>, transform_indices = @transform_11, window_bounds = array<i64: 1, 16>}, {pipeline_mode = #tpu.pipeline_mode<synchronous>, transform_indices = @transform_12, window_bounds = array<i64: 1, 16>}, {transform_indices = @transform_13, window_bounds = array<i64: 1, 256, 16>}]} {
    %cst = arith.constant 0.000000e+00 : bf16
    %0 = vector.broadcast %cst : bf16 to vector<1x1x32x4xbf16>
    %c0 = arith.constant 0 : index
    %c0_0 = arith.constant 0 : index
    %c0_1 = arith.constant 0 : index
    %c0_2 = arith.constant 0 : index
    %1 = vector.load %arg15[%c0, %c0_0, %c0_1, %c0_2] : memref<1x18x32x4xbf16, #tpu.memory_space<vmem>>, vector<1x1x32x4xbf16>
    tpu.vector_store %arg15[%c0, %c0_0, %c0_1, %c0_2], %0 {strides = array<i32>} : memref<1x18x32x4xbf16, #tpu.memory_space<vmem>>, vector<1x1x32x4xbf16>,
    %cst_3 = arith.constant 0.000000e+00 : bf16
    %2 = vector.broadcast %cst_3 : bf16 to vector<1x1x32x4xbf16>
    %c0_4 = arith.constant 0 : index
    %c17 = arith.constant 17 : index
    %c0_5 = arith.constant 0 : index
    %c0_6 = arith.constant 0 : index
    %3 = vector.load %arg15[%c0_4, %c17, %c0_5, %c0_6] : memref<1x18x32x4xbf16, #tpu.memory_space<vmem>>, vector<1x1x32x4xbf16>
    tpu.vector_store %arg15[%c0_4, %c17, %c0_5, %c0_6], %2 {strides = array<i32>} : memref<1x18x32x4xbf16, #tpu.memory_space<vmem>>, vector<1x1x32x4xbf16>,
    %cst_7 = arith.constant 0.000000e+00 : bf16
    %4 = vector.broadcast %cst_7 : bf16 to vector<1x16x8x4xbf16>
    %c0_8 = arith.constant 0 : index
    %c1 = arith.constant 1 : index
    %c0_9 = arith.constant 0 : index
    %c0_10 = arith.constant 0 : index
    %5 = vector.load %arg15[%c0_8, %c1, %c0_9, %c0_10] : memref<1x18x32x4xbf16, #tpu.memory_space<vmem>>, vector<1x16x8x4xbf16>
    tpu.vector_store %arg15[%c0_8, %c1, %c0_9, %c0_10], %4 {strides = array<i32>} : memref<1x18x32x4xbf16, #tpu.memory_space<vmem>>, vector<1x16x8x4xbf16>,
    %cst_11 = arith.constant 0.000000e+00 : bf16
    %6 = vector.broadcast %cst_11 : bf16 to vector<1x16x8x4xbf16>
    %c0_12 = arith.constant 0 : index
    %c1_13 = arith.constant 1 : index
    %c24 = arith.constant 24 : index
    %c0_14 = arith.constant 0 : index
    %7 = vector.load %arg15[%c0_12, %c1_13, %c24, %c0_14] : memref<1x18x32x4xbf16, #tpu.memory_space<vmem>>, vector<1x16x8x4xbf16>
    tpu.vector_store %arg15[%c0_12, %c1_13, %c24, %c0_14], %6 {strides = array<i32>} : memref<1x18x32x4xbf16, #tpu.memory_space<vmem>>, vector<1x16x8x4xbf16>,
    %c0_15 = arith.constant 0 : index
    %c0_16 = arith.constant 0 : index
    %c0_17 = arith.constant 0 : index
    %c0_18 = arith.constant 0 : index
    %8 = vector.load %arg1[%c0_15, %c0_16, %c0_17, %c0_18] : memref<1x16x16x4xbf16, #tpu.memory_space<vmem>>, vector<1x16x16x4xbf16>
    %9 = vector.shape_cast %8 : vector<1x16x16x4xbf16> to vector<256x4xbf16>
    %c0_19 = arith.constant 0 : index
    %c0_20 = arith.constant 0 : index
    %10 = vector.load %arg2[%c0_19, %c0_20] : memref<4x4xbf16, #tpu.memory_space<vmem>>, vector<4x4xbf16>
    %cst_21 = arith.constant dense<0.000000e+00> : vector<256x4xf32>
    %11 = tpu.matmul %9, %10, %cst_21 {dimension_numbers = #tpu.dot_dimension_numbers<[1], [0], [0], [1], [0, 0, 1, 1], [], []>} : vector<256x4xbf16>, vector<4x4xbf16>, vector<256x4xf32> -> vector<256x4xf32>
    %c0_22 = arith.constant 0 : index
    %c0_23 = arith.constant 0 : index
    %12 = vector.load %arg6[%c0_22, %c0_23] : memref<1x4xf32, #tpu.memory_space<vmem>>, vector<1x4xf32>
    %13 = vector.broadcast %12 : vector<1x4xf32> to vector<256x4xf32>
    %14 = arith.mulf %11, %13 : vector<256x4xf32>
    %c0_24 = arith.constant 0 : index
    %c0_25 = arith.constant 0 : index
    %15 = vector.load %arg7[%c0_24, %c0_25] : memref<1x4xf32, #tpu.memory_space<vmem>>, vector<1x4xf32>
    %16 = vector.broadcast %15 : vector<1x4xf32> to vector<256x4xf32>
    %17 = arith.addf %14, %16 : vector<256x4xf32>
    %cst_26 = arith.constant 0.000000e+00 : f32
    %18 = vector.broadcast %cst_26 : f32 to vector<256x4xf32>
    %19 = arith.maximumf %17, %18 : vector<256x4xf32>
    %20 = arith.truncf %19 : vector<256x4xf32> to vector<256x4xbf16>
    %21 = vector.shape_cast %20 : vector<256x4xbf16> to vector<1x16x16x4xbf16>
    %c0_27 = arith.constant 0 : index
    %c1_28 = arith.constant 1 : index
    %c8 = arith.constant 8 : index
    %c0_29 = arith.constant 0 : index
    %22 = vector.load %arg15[%c0_27, %c1_28, %c8, %c0_29] : memref<1x18x32x4xbf16, #tpu.memory_space<vmem>>, vector<1x16x16x4xbf16>
    tpu.vector_store %arg15[%c0_27, %c1_28, %c8, %c0_29], %21 {strides = array<i32>} : memref<1x18x32x4xbf16, #tpu.memory_space<vmem>>, vector<1x16x16x4xbf16>,
    %cst_30 = arith.constant 0.000000e+00 : f32
    %23 = vector.broadcast %cst_30 : f32 to vector<256x4xf32>
    %c0_31 = arith.constant 0 : index
    %c0_32 = arith.constant 0 : index
    %c7 = arith.constant 7 : index
    %c0_33 = arith.constant 0 : index
    %24 = vector.load %arg15[%c0_31, %c0_32, %c7, %c0_33] : memref<1x18x32x4xbf16, #tpu.memory_space<vmem>>, vector<1x16x16x4xbf16>
    %25 = vector.shape_cast %24 : vector<1x16x16x4xbf16> to vector<256x4xbf16>
    %c0_34 = arith.constant 0 : index
    %c0_35 = arith.constant 0 : index
    %c0_36 = arith.constant 0 : index
    %c0_37 = arith.constant 0 : index
    %26 = vector.load %arg3[%c0_34, %c0_35, %c0_36, %c0_37] : memref<3x3x4x4xbf16, #tpu.memory_space<vmem>>, vector<1x1x4x4xbf16>
    %27 = vector.shape_cast %26 : vector<1x1x4x4xbf16> to vector<4x4xbf16>
    %cst_38 = arith.constant dense<0.000000e+00> : vector<256x4xf32>
    %28 = tpu.matmul %25, %27, %cst_38 {dimension_numbers = #tpu.dot_dimension_numbers<[1], [0], [0], [1], [0, 0, 1, 1], [], []>} : vector<256x4xbf16>, vector<4x4xbf16>, vector<256x4xf32> -> vector<256x4xf32>
    %29 = arith.addf %23, %28 : vector<256x4xf32>
    %c0_39 = arith.constant 0 : index
    %c0_40 = arith.constant 0 : index
    %c8_41 = arith.constant 8 : index
    %c0_42 = arith.constant 0 : index
    %30 = vector.load %arg15[%c0_39, %c0_40, %c8_41, %c0_42] : memref<1x18x32x4xbf16, #tpu.memory_space<vmem>>, vector<1x16x16x4xbf16>
    %31 = vector.shape_cast %30 : vector<1x16x16x4xbf16> to vector<256x4xbf16>
    %c0_43 = arith.constant 0 : index
    %c1_44 = arith.constant 1 : index
    %c0_45 = arith.constant 0 : index
    %c0_46 = arith.constant 0 : index
    %32 = vector.load %arg3[%c0_43, %c1_44, %c0_45, %c0_46] : memref<3x3x4x4xbf16, #tpu.memory_space<vmem>>, vector<1x1x4x4xbf16>
    %33 = vector.shape_cast %32 : vector<1x1x4x4xbf16> to vector<4x4xbf16>
    %cst_47 = arith.constant dense<0.000000e+00> : vector<256x4xf32>
    %34 = tpu.matmul %31, %33, %cst_47 {dimension_numbers = #tpu.dot_dimension_numbers<[1], [0], [0], [1], [0, 0, 1, 1], [], []>} : vector<256x4xbf16>, vector<4x4xbf16>, vector<256x4xf32> -> vector<256x4xf32>
    %35 = arith.addf %29, %34 : vector<256x4xf32>
    %c0_48 = arith.constant 0 : index
    %c0_49 = arith.constant 0 : index
    %c9 = arith.constant 9 : index
    %c0_50 = arith.constant 0 : index
    %36 = vector.load %arg15[%c0_48, %c0_49, %c9, %c0_50] : memref<1x18x32x4xbf16, #tpu.memory_space<vmem>>, vector<1x16x16x4xbf16>
    %37 = vector.shape_cast %36 : vector<1x16x16x4xbf16> to vector<256x4xbf16>
    %c0_51 = arith.constant 0 : index
    %c2 = arith.constant 2 : index
    %c0_52 = arith.constant 0 : index
    %c0_53 = arith.constant 0 : index
    %38 = vector.load %arg3[%c0_51, %c2, %c0_52, %c0_53] : memref<3x3x4x4xbf16, #tpu.memory_space<vmem>>, vector<1x1x4x4xbf16>
    %39 = vector.shape_cast %38 : vector<1x1x4x4xbf16> to vector<4x4xbf16>
    %cst_54 = arith.constant dense<0.000000e+00> : vector<256x4xf32>
    %40 = tpu.matmul %37, %39, %cst_54 {dimension_numbers = #tpu.dot_dimension_numbers<[1], [0], [0], [1], [0, 0, 1, 1], [], []>} : vector<256x4xbf16>, vector<4x4xbf16>, vector<256x4xf32> -> vector<256x4xf32>
    %41 = arith.addf %35, %40 : vector<256x4xf32>
    %c0_55 = arith.constant 0 : index
    %c1_56 = arith.constant 1 : index
    %c7_57 = arith.constant 7 : index
    %c0_58 = arith.constant 0 : index
    %42 = vector.load %arg15[%c0_55, %c1_56, %c7_57, %c0_58] : memref<1x18x32x4xbf16, #tpu.memory_space<vmem>>, vector<1x16x16x4xbf16>
    %43 = vector.shape_cast %42 : vector<1x16x16x4xbf16> to vector<256x4xbf16>
    %c1_59 = arith.constant 1 : index
    %c0_60 = arith.constant 0 : index
    %c0_61 = arith.constant 0 : index
    %c0_62 = arith.constant 0 : index
    %44 = vector.load %arg3[%c1_59, %c0_60, %c0_61, %c0_62] : memref<3x3x4x4xbf16, #tpu.memory_space<vmem>>, vector<1x1x4x4xbf16>
    %45 = vector.shape_cast %44 : vector<1x1x4x4xbf16> to vector<4x4xbf16>
    %cst_63 = arith.constant dense<0.000000e+00> : vector<256x4xf32>
    %46 = tpu.matmul %43, %45, %cst_63 {dimension_numbers = #tpu.dot_dimension_numbers<[1], [0], [0], [1], [0, 0, 1, 1], [], []>} : vector<256x4xbf16>, vector<4x4xbf16>, vector<256x4xf32> -> vector<256x4xf32>
    %47 = arith.addf %41, %46 : vector<256x4xf32>
    %c0_64 = arith.constant 0 : index
    %c1_65 = arith.constant 1 : index
    %c8_66 = arith.constant 8 : index
    %c0_67 = arith.constant 0 : index
    %48 = vector.load %arg15[%c0_64, %c1_65, %c8_66, %c0_67] : memref<1x18x32x4xbf16, #tpu.memory_space<vmem>>, vector<1x16x16x4xbf16>
    %49 = vector.shape_cast %48 : vector<1x16x16x4xbf16> to vector<256x4xbf16>
    %c1_68 = arith.constant 1 : index
    %c1_69 = arith.constant 1 : index
    %c0_70 = arith.constant 0 : index
    %c0_71 = arith.constant 0 : index
    %50 = vector.load %arg3[%c1_68, %c1_69, %c0_70, %c0_71] : memref<3x3x4x4xbf16, #tpu.memory_space<vmem>>, vector<1x1x4x4xbf16>
    %51 = vector.shape_cast %50 : vector<1x1x4x4xbf16> to vector<4x4xbf16>
    %cst_72 = arith.constant dense<0.000000e+00> : vector<256x4xf32>
    %52 = tpu.matmul %49, %51, %cst_72 {dimension_numbers = #tpu.dot_dimension_numbers<[1], [0], [0], [1], [0, 0, 1, 1], [], []>} : vector<256x4xbf16>, vector<4x4xbf16>, vector<256x4xf32> -> vector<256x4xf32>
    %53 = arith.addf %47, %52 : vector<256x4xf32>
    %c0_73 = arith.constant 0 : index
    %c1_74 = arith.constant 1 : index
    %c9_75 = arith.constant 9 : index
    %c0_76 = arith.constant 0 : index
    %54 = vector.load %arg15[%c0_73, %c1_74, %c9_75, %c0_76] : memref<1x18x32x4xbf16, #tpu.memory_space<vmem>>, vector<1x16x16x4xbf16>
    %55 = vector.shape_cast %54 : vector<1x16x16x4xbf16> to vector<256x4xbf16>
    %c1_77 = arith.constant 1 : index
    %c2_78 = arith.constant 2 : index
    %c0_79 = arith.constant 0 : index
    %c0_80 = arith.constant 0 : index
    %56 = vector.load %arg3[%c1_77, %c2_78, %c0_79, %c0_80] : memref<3x3x4x4xbf16, #tpu.memory_space<vmem>>, vector<1x1x4x4xbf16>
    %57 = vector.shape_cast %56 : vector<1x1x4x4xbf16> to vector<4x4xbf16>
    %cst_81 = arith.constant dense<0.000000e+00> : vector<256x4xf32>
    %58 = tpu.matmul %55, %57, %cst_81 {dimension_numbers = #tpu.dot_dimension_numbers<[1], [0], [0], [1], [0, 0, 1, 1], [], []>} : vector<256x4xbf16>, vector<4x4xbf16>, vector<256x4xf32> -> vector<256x4xf32>
    %59 = arith.addf %53, %58 : vector<256x4xf32>
    %c0_82 = arith.constant 0 : index
    %c2_83 = arith.constant 2 : index
    %c7_84 = arith.constant 7 : index
    %c0_85 = arith.constant 0 : index
    %60 = vector.load %arg15[%c0_82, %c2_83, %c7_84, %c0_85] : memref<1x18x32x4xbf16, #tpu.memory_space<vmem>>, vector<1x16x16x4xbf16>
    %61 = vector.shape_cast %60 : vector<1x16x16x4xbf16> to vector<256x4xbf16>
    %c2_86 = arith.constant 2 : index
    %c0_87 = arith.constant 0 : index
    %c0_88 = arith.constant 0 : index
    %c0_89 = arith.constant 0 : index
    %62 = vector.load %arg3[%c2_86, %c0_87, %c0_88, %c0_89] : memref<3x3x4x4xbf16, #tpu.memory_space<vmem>>, vector<1x1x4x4xbf16>
    %63 = vector.shape_cast %62 : vector<1x1x4x4xbf16> to vector<4x4xbf16>
    %cst_90 = arith.constant dense<0.000000e+00> : vector<256x4xf32>
    %64 = tpu.matmul %61, %63, %cst_90 {dimension_numbers = #tpu.dot_dimension_numbers<[1], [0], [0], [1], [0, 0, 1, 1], [], []>} : vector<256x4xbf16>, vector<4x4xbf16>, vector<256x4xf32> -> vector<256x4xf32>
    %65 = arith.addf %59, %64 : vector<256x4xf32>
    %c0_91 = arith.constant 0 : index
    %c2_92 = arith.constant 2 : index
    %c8_93 = arith.constant 8 : index
    %c0_94 = arith.constant 0 : index
    %66 = vector.load %arg15[%c0_91, %c2_92, %c8_93, %c0_94] : memref<1x18x32x4xbf16, #tpu.memory_space<vmem>>, vector<1x16x16x4xbf16>
    %67 = vector.shape_cast %66 : vector<1x16x16x4xbf16> to vector<256x4xbf16>
    %c2_95 = arith.constant 2 : index
    %c1_96 = arith.constant 1 : index
    %c0_97 = arith.constant 0 : index
    %c0_98 = arith.constant 0 : index
    %68 = vector.load %arg3[%c2_95, %c1_96, %c0_97, %c0_98] : memref<3x3x4x4xbf16, #tpu.memory_space<vmem>>, vector<1x1x4x4xbf16>
    %69 = vector.shape_cast %68 : vector<1x1x4x4xbf16> to vector<4x4xbf16>
    %cst_99 = arith.constant dense<0.000000e+00> : vector<256x4xf32>
    %70 = tpu.matmul %67, %69, %cst_99 {dimension_numbers = #tpu.dot_dimension_numbers<[1], [0], [0], [1], [0, 0, 1, 1], [], []>} : vector<256x4xbf16>, vector<4x4xbf16>, vector<256x4xf32> -> vector<256x4xf32>
    %71 = arith.addf %65, %70 : vector<256x4xf32>
    %c0_100 = arith.constant 0 : index
    %c2_101 = arith.constant 2 : index
    %c9_102 = arith.constant 9 : index
    %c0_103 = arith.constant 0 : index
    %72 = vector.load %arg15[%c0_100, %c2_101, %c9_102, %c0_103] : memref<1x18x32x4xbf16, #tpu.memory_space<vmem>>, vector<1x16x16x4xbf16>
    %73 = vector.shape_cast %72 : vector<1x16x16x4xbf16> to vector<256x4xbf16>
    %c2_104 = arith.constant 2 : index
    %c2_105 = arith.constant 2 : index
    %c0_106 = arith.constant 0 : index
    %c0_107 = arith.constant 0 : index
    %74 = vector.load %arg3[%c2_104, %c2_105, %c0_106, %c0_107] : memref<3x3x4x4xbf16, #tpu.memory_space<vmem>>, vector<1x1x4x4xbf16>
    %75 = vector.shape_cast %74 : vector<1x1x4x4xbf16> to vector<4x4xbf16>
    %cst_108 = arith.constant dense<0.000000e+00> : vector<256x4xf32>
    %76 = tpu.matmul %73, %75, %cst_108 {dimension_numbers = #tpu.dot_dimension_numbers<[1], [0], [0], [1], [0, 0, 1, 1], [], []>} : vector<256x4xbf16>, vector<4x4xbf16>, vector<256x4xf32> -> vector<256x4xf32>
    %77 = arith.addf %71, %76 : vector<256x4xf32>
    %c0_109 = arith.constant 0 : index
    %c0_110 = arith.constant 0 : index
    %78 = vector.load %arg8[%c0_109, %c0_110] : memref<1x4xf32, #tpu.memory_space<vmem>>, vector<1x4xf32>
    %79 = vector.broadcast %78 : vector<1x4xf32> to vector<256x4xf32>
    %80 = arith.mulf %77, %79 : vector<256x4xf32>
    %c0_111 = arith.constant 0 : index
    %c0_112 = arith.constant 0 : index
    %81 = vector.load %arg9[%c0_111, %c0_112] : memref<1x4xf32, #tpu.memory_space<vmem>>, vector<1x4xf32>
    %82 = vector.broadcast %81 : vector<1x4xf32> to vector<256x4xf32>
    %83 = arith.addf %80, %82 : vector<256x4xf32>
    %cst_113 = arith.constant 0.000000e+00 : f32
    %84 = vector.broadcast %cst_113 : f32 to vector<256x4xf32>
    %85 = arith.maximumf %83, %84 : vector<256x4xf32>
    %86 = arith.truncf %85 : vector<256x4xf32> to vector<256x4xbf16>
    %c0_114 = arith.constant 0 : index
    %c0_115 = arith.constant 0 : index
    %87 = vector.load %arg4[%c0_114, %c0_115] : memref<4x16xbf16, #tpu.memory_space<vmem>>, vector<4x16xbf16>
    %cst_116 = arith.constant dense<0.000000e+00> : vector<256x16xf32>
    %88 = tpu.matmul %86, %87, %cst_116 {dimension_numbers = #tpu.dot_dimension_numbers<[1], [0], [0], [1], [0, 0, 1, 1], [], []>} : vector<256x4xbf16>, vector<4x16xbf16>, vector<256x16xf32> -> vector<256x16xf32>
    %c0_117 = arith.constant 0 : index
    %c0_118 = arith.constant 0 : index
    %89 = vector.load %arg10[%c0_117, %c0_118] : memref<1x16xf32, #tpu.memory_space<vmem>>, vector<1x16xf32>
    %90 = vector.broadcast %89 : vector<1x16xf32> to vector<256x16xf32>
    %91 = arith.mulf %88, %90 : vector<256x16xf32>
    %c0_119 = arith.constant 0 : index
    %c0_120 = arith.constant 0 : index
    %92 = vector.load %arg11[%c0_119, %c0_120] : memref<1x16xf32, #tpu.memory_space<vmem>>, vector<1x16xf32>
    %93 = vector.broadcast %92 : vector<1x16xf32> to vector<256x16xf32>
    %94 = arith.addf %91, %93 : vector<256x16xf32>
    %c0_121 = arith.constant 0 : index
    %c0_122 = arith.constant 0 : index
    %95 = vector.load %arg5[%c0_121, %c0_122] : memref<4x16xbf16, #tpu.memory_space<vmem>>, vector<4x16xbf16>
    %cst_123 = arith.constant dense<0.000000e+00> : vector<256x16xf32>
    %96 = tpu.matmul %9, %95, %cst_123 {dimension_numbers = #tpu.dot_dimension_numbers<[1], [0], [0], [1], [0, 0, 1, 1], [], []>} : vector<256x4xbf16>, vector<4x16xbf16>, vector<256x16xf32> -> vector<256x16xf32>
    %c0_124 = arith.constant 0 : index
    %c0_125 = arith.constant 0 : index
    %97 = vector.load %arg12[%c0_124, %c0_125] : memref<1x16xf32, #tpu.memory_space<vmem>>, vector<1x16xf32>
    %98 = vector.broadcast %97 : vector<1x16xf32> to vector<256x16xf32>
    %99 = arith.mulf %96, %98 : vector<256x16xf32>
    %c0_126 = arith.constant 0 : index
    %c0_127 = arith.constant 0 : index
    %100 = vector.load %arg13[%c0_126, %c0_127] : memref<1x16xf32, #tpu.memory_space<vmem>>, vector<1x16xf32>
    %101 = vector.broadcast %100 : vector<1x16xf32> to vector<256x16xf32>
    %102 = arith.addf %99, %101 : vector<256x16xf32>
    %103 = arith.addf %94, %102 : vector<256x16xf32>
    %cst_128 = arith.constant 0.000000e+00 : f32
    %104 = vector.broadcast %cst_128 : f32 to vector<256x16xf32>
    %105 = arith.maximumf %103, %104 : vector<256x16xf32>
    %106 = vector.shape_cast %105 : vector<256x16xf32> to vector<1x256x16xf32>
    %c0_129 = arith.constant 0 : index
    %c0_130 = arith.constant 0 : index
    %c0_131 = arith.constant 0 : index
    %107 = vector.load %arg14[%c0_129, %c0_130, %c0_131] : memref<1x256x16xf32, #tpu.memory_space<vmem>>, vector<1x256x16xf32>
    tpu.vector_store %arg14[%c0_129, %c0_130, %c0_131], %106 {strides = array<i32>} : memref<1x256x16xf32, #tpu.memory_space<vmem>>, vector<1x256x16xf32>,
    return
  }
  func.func @transform_0(%arg0: i32) -> (i32, i32, i32, i32) {
    %c0_i32 = arith.constant 0 : i32
    %c0_i32_0 = arith.constant 0 : i32
    %c0_i32_1 = arith.constant 0 : i32
    %c0_i32_2 = arith.constant 0 : i32
    return %arg0, %c0_i32, %c0_i32_0, %c0_i32_1 : i32, i32, i32, i32
  }
  func.func @transform_1(%arg0: i32) -> (i32, i32) {
    %c0_i32 = arith.constant 0 : i32
    %c0_i32_0 = arith.constant 0 : i32
    %c0_i32_1 = arith.constant 0 : i32
    return %c0_i32, %c0_i32_0 : i32, i32
  }
  func.func @transform_2(%arg0: i32) -> (i32, i32, i32, i32) {
    %c0_i32 = arith.constant 0 : i32
    %c0_i32_0 = arith.constant 0 : i32
    %c0_i32_1 = arith.constant 0 : i32
    %c0_i32_2 = arith.constant 0 : i32
    %c0_i32_3 = arith.constant 0 : i32
    return %c0_i32, %c0_i32_0, %c0_i32_1, %c0_i32_2 : i32, i32, i32, i32
  }
  func.func @transform_3(%arg0: i32) -> (i32, i32) {
    %c0_i32 = arith.constant 0 : i32
    %c0_i32_0 = arith.constant 0 : i32
    %c0_i32_1 = arith.constant 0 : i32
    return %c0_i32, %c0_i32_0 : i32, i32
  }
  func.func @transform_4(%arg0: i32) -> (i32, i32) {
    %c0_i32 = arith.constant 0 : i32
    %c0_i32_0 = arith.constant 0 : i32
    %c0_i32_1 = arith.constant 0 : i32
    return %c0_i32, %c0_i32_0 : i32, i32
  }
  func.func @transform_5(%arg0: i32) -> (i32, i32) {
    %c0_i32 = arith.constant 0 : i32
    %c0_i32_0 = arith.constant 0 : i32
    %c0_i32_1 = arith.constant 0 : i32
    return %c0_i32, %c0_i32_0 : i32, i32
  }
  func.func @transform_6(%arg0: i32) -> (i32, i32) {
    %c0_i32 = arith.constant 0 : i32
    %c0_i32_0 = arith.constant 0 : i32
    %c0_i32_1 = arith.constant 0 : i32
    return %c0_i32, %c0_i32_0 : i32, i32
  }
  func.func @transform_7(%arg0: i32) -> (i32, i32) {
    %c0_i32 = arith.constant 0 : i32
    %c0_i32_0 = arith.constant 0 : i32
    %c0_i32_1 = arith.constant 0 : i32
    return %c0_i32, %c0_i32_0 : i32, i32
  }
  func.func @transform_8(%arg0: i32) -> (i32, i32) {
    %c0_i32 = arith.constant 0 : i32
    %c0_i32_0 = arith.constant 0 : i32
    %c0_i32_1 = arith.constant 0 : i32
    return %c0_i32, %c0_i32_0 : i32, i32
  }
  func.func @transform_9(%arg0: i32) -> (i32, i32) {
    %c0_i32 = arith.constant 0 : i32
    %c0_i32_0 = arith.constant 0 : i32
    %c0_i32_1 = arith.constant 0 : i32
    return %c0_i32, %c0_i32_0 : i32, i32
  }
  func.func @transform_10(%arg0: i32) -> (i32, i32) {
    %c0_i32 = arith.constant 0 : i32
    %c0_i32_0 = arith.constant 0 : i32
    %c0_i32_1 = arith.constant 0 : i32
    return %c0_i32, %c0_i32_0 : i32, i32
  }
  func.func @transform_11(%arg0: i32) -> (i32, i32) {
    %c0_i32 = arith.constant 0 : i32
    %c0_i32_0 = arith.constant 0 : i32
    %c0_i32_1 = arith.constant 0 : i32
    return %c0_i32, %c0_i32_0 : i32, i32
  }
  func.func @transform_12(%arg0: i32) -> (i32, i32) {
    %c0_i32 = arith.constant 0 : i32
    %c0_i32_0 = arith.constant 0 : i32
    %c0_i32_1 = arith.constant 0 : i32
    return %c0_i32, %c0_i32_0 : i32, i32
  }
  func.func @transform_13(%arg0: i32) -> (i32, i32, i32) {
    %c0_i32 = arith.constant 0 : i32
    %c0_i32_0 = arith.constant 0 : i32
    %c0_i32_1 = arith.constant 0 : i32
    return %arg0, %c0_i32, %c0_i32_0 : i32, i32, i32
  }
}

</mosaic_0001>

<bundles_post_ra>
// kernel: tpu_custom_call.1
= control target key start
LH: loop header
LB: loop body
LE: loop exit
PB: predicated region body
PF: predicated region fallthrough
CT: control target
= control target key end

     0   :  { %s7297_s25 = smov 0   ;;  %s8814_s0 = inlined_call_operand.vmem [shape: bf16[2,16,16,4], index: 0, kind: input, shape index: {}]   ;;  %s8815_s1 = inlined_call_operand.vmem [shape: bf16[4,4], index: 1, kind: input, shape index: {}]   ;;  %s8816_s2 = inlined_call_operand.vmem [shape: bf16[3,3,4,4], index: 2, kind: input, shape index: {}]   ;;  %s8817_s3 = inlined_call_operand.vmem [shape: bf16[4,16], index: 3, kind: input, shape index: {}]   ;;  %s8818_s4 = inlined_call_operand.vmem [shape: bf16[4,16], index: 4, kind: input, shape index: {}]   ;;  %s8819_s5 = inlined_call_operand.vmem [shape: f32[1,4], index: 5, kind: input, shape index: {}]   ;;  %s8820_s6 = inlined_call_operand.vmem [shape: f32[1,4], index: 6, kind: input, shape index: {}]   ;;  %s8821_s7 = inlined_call_operand.vmem [shape: f32[1,4], index: 7, kind: input, shape index: {}]   ;;  %s8822_s8 = inlined_call_operand.vmem [shape: f32[1,4], index: 8, kind: input, shape index: {}]   ;;  %s8823_s9 = inlined_call_operand.vmem [shape: f32[1,16], index: 9, kind: input, shape index: {}]   ;;  %s8824_s10 = inlined_call_operand.vmem [shape: f32[1,16], index: 10, kind: input, shape index: {}]   ;;  %s8825_s11 = inlined_call_operand.vmem [shape: f32[1,16], index: 11, kind: input, shape index: {}]   ;;  %s8826_s12 = inlined_call_operand.vmem [shape: f32[1,16], index: 12, kind: input, shape index: {}]   ;;  %s8827_s13 = inlined_call_operand.vmem [shape: f32[2,256,16], index: 13, kind: output, shape index: {}]  }
   0x1 LB: > { %s6044_s26 = sadd.s32 4294967295, %s7224_s25   ;;  %p6048_p0 = scmp.ge.s32.totalorder %s7224_s25, 1  ;;  %s7224_s25 = sphi %s7297_s25, %s23_s25  }
   0x2   : > { %p387_p1 = scmp.lt.s32.totalorder %s7224_s25, 3 }
   0x4   : > { %p388_p2 = pnand %p6048_p0, %p387_p1 }
   0x5   : > { %v515_v0 = vld [vmem:[%s8815_s1] sm:$0x3] (!%p388_p2)  ;;  %vm644_vm0 = vcmask (!%p388_p2), 1041408   ;;  %p431_p3 = scmp.lt.s32.totalorder (!%p388_p2), %s6044_s26, 1  ;;  %vm442_vm1 = vcmask (!%p388_p2), 31744   ;;  %vm449_vm2 = vcmask (!%p388_p2), 27648  }
   0x6   : > { %391 = sbr.rel (%p388_p2) target bundleno = 1181 (0x49d), region = 72  ;;  %7149 = vmatprep.subr.msk.bf16.mxu0 (!%p388_p2), %vm644_vm0, %v515_v0  ;;  %v646_v1 = vsel (!%p388_p2), %vm644_vm0, %v515_v0, 0  ;;  %vm466_vm3 = vcmask (!%p388_p2), 31748   ;;  %v7226_v18 = vmov (!%p388_p2), 0   ;;  %v6087_v19 = vld [vmem:[%s8816_s2 + $0x2] sm:$0x3] (!%p388_p2) }
   0x7   : > { %6486 = vmatpush3.bf16.msra.mxu0 (!%p388_p2), %v646_v1  ;;  %443 = vst.msk [vmem:[#allocation2] sm:$0xff] (!%p388_p2), %vm442_vm1, %v7226_v18  ;;  %444 = vst.msk [vmem:[#allocation2 + $0x8] sm:$0xff] (!%p388_p2), %vm442_vm1, %v7226_v18  ;;  %v1469_v22 = vsel (!%p388_p2), %vm644_vm0, %v6087_v19, 0  ;;  %vm1369_vm4 = vcmask (!%p388_p2), 1043456   ;;  %v6137_v26 = vld [vmem:[%s8816_s2 + $0x6] sm:$0x3] (!%p388_p2) }
   0x8   : > { %446 = vst.msk [vmem:[#allocation2 + $0x110] sm:$0xff] (!%p388_p2), %vm442_vm1, %v7226_v18  ;;  %447 = vst.msk [vmem:[#allocation2 + $0x118] sm:$0xff] (!%p388_p2), %vm442_vm1, %v7226_v18  ;;  %7150 = vmatprep.subr.msk.bf16.mxu0 (!%p388_p2), %vm644_vm0, %v6087_v19  ;;  %7153 = vmatprep.subr.msk.bf16.mxu1 (!%p388_p2), %vm644_vm0, %v6137_v26  ;;  %v2734_v27 = vsel (!%p388_p2), %vm644_vm0, %v6137_v26, 0  ;;  %v7401_v28 = vld [vmem:[%s8816_s2 + $0x8] sm:$0x3] (!%p388_p2)  ;;  %vm5956_vm7 = vcmask (!%p388_p2), 130048  }
   0x9   : > { %450 = vst.msk [vmem:[#allocation2 + $0x10] sm:$0xf] (!%p388_p2), %vm449_vm2, %v7226_v18  ;;  %451 = vst.msk [vmem:[#allocation2 + $0x20] sm:$0xf] (!%p388_p2), %vm449_vm2, %v7226_v18  ;;  %6622 = vmatpush3.bf16.msra.mxu1 (!%p388_p2), %v2734_v27  ;;  %v7408_v29 = vld [vmem:[%s8816_s2] sm:$0x3] (!%p388_p2) }
   0xa   : > { %452 = vst.msk [vmem:[#allocation2 + $0x30] sm:$0xf] (!%p388_p2), %vm449_vm2, %v7226_v18  ;;  %453 = vst.msk [vmem:[#allocation2 + $0x40] sm:$0xf] (!%p388_p2), %vm449_vm2, %v7226_v18  ;;  %7154 = vmatprep.subr.msk.bf16.mxu1 (!%p388_p2), %vm644_vm0, %v7401_v28  ;;  %v7415_v30 = vld [vmem:[%s8819_s5] ss:$0 sm:$0xff] (!%p388_p2) }
   0xb   : > { %454 = vst.msk [vmem:[#allocation2 + $0x50] sm:$0xf] (!%p388_p2), %vm449_vm2, %v7226_v18  ;;  %455 = vst.msk [vmem:[#allocation2 + $0x60] sm:$0xf] (!%p388_p2), %vm449_vm2, %v7226_v18  ;;  %v7420_v32 = vld [vmem:[%s8820_s6] ss:$0 sm:$0xff] (!%p388_p2) }
   0xc   : > { %456 = vst.msk [vmem:[#allocation2 + $0x70] sm:$0xf] (!%p388_p2), %vm449_vm2, %v7226_v18  ;;  %457 = vst.msk [vmem:[#allocation2 + $0x80] sm:$0xf] (!%p388_p2), %vm449_vm2, %v7226_v18  ;;  %v7446_v19 = vld [vmem:[%s8816_s2 + $0xa] sm:$0x3] (!%p388_p2) }
   0xd   : > { %s8829_s26 = smov (!%p431_p3, %s6044_s26), 1  ;;  %458 = vst.msk [vmem:[#allocation2 + $0x90] sm:$0xf] %vm449_vm2, %v7226_v18  ;;  %459 = vst.msk [vmem:[#allocation2 + $0xa0] sm:$0xf] %vm449_vm2, %v7226_v18 }
   0xe   : > { %s6279_s29 = sshll.u32 %s8829_s26, 7  ;;  %460 = vst.msk [vmem:[#allocation2 + $0xb0] sm:$0xf] %vm449_vm2, %v7226_v18  ;;  %461 = vst.msk [vmem:[#allocation2 + $0xc0] sm:$0xf] %vm449_vm2, %v7226_v18  ;;  %s6280_s27 = sshll.u32 %s8829_s26, 8 }
   0xf   : > { %s7316_s15 = scalar_lea.vmem %s8814_s0, %s6279_s29  ;;  %462 = vst.msk [vmem:[#allocation2 + $0xd0] sm:$0xf] %vm449_vm2, %v7226_v18  ;;  %463 = vst.msk [vmem:[#allocation2 + $0xe0] sm:$0xf] %vm449_vm2, %v7226_v18  ;;  %v1016_v20 = vld [vmem:[#allocation2 + $0x8] sm:$0xf]  ;;  %s8606_s29 = scalar_lea.vmem %s8827_s13, %s6280_s27 }
  0x10   : > { %v7170_v2 = vld [vmem:[%s7316_s15] sm:$0xff]   ;;  %v7171_v3 = vld [vmem:[%s7316_s15 + $0x8] sm:$0xff]   ;;  %v7172_v4 = vld [vmem:[%s7316_s15 + $0x10] sm:$0xff]   ;;  %464 = vst.msk [vmem:[#allocation2 + $0xf0] sm:$0xf] %vm449_vm2, %v7226_v18  ;;  %v1371_v24 = vrot.slane %v1016_v20, 4 }
  0x11   : > { %6487 = vmatprep.mubr.msk.bf16.mxu0 %vm442_vm1, %v7170_v2  ;;  %v7173_v5 = vld [vmem:[%s7316_s15 + $0x18] sm:$0xff]   ;;  %v7174_v6 = vld [vmem:[%s7316_s15 + $0x20] sm:$0xff]   ;;  %v7175_v7 = vld [vmem:[%s7316_s15 + $0x28] sm:$0xff]   ;;  %465 = vst.msk [vmem:[#allocation2 + $0x100] sm:$0xf] %vm449_vm2, %v7226_v18  ;;  %v1057_v50 = vshrl.u32 %v1016_v20, 16 }
  0x12   : > { %6488 = vmatmul.mubr.msk.bf16.vlgmr.msra.gmra.mrb[0].mxu0 %vm442_vm1, %v7171_v3  ;;  %v7176_v8 = vld [vmem:[%s7316_s15 + $0x30] sm:$0xff]   ;;  %v7177_v9 = vld [vmem:[%s7316_s15 + $0x38] sm:$0xff]   ;;  %v7178_v10 = vld [vmem:[%s7316_s15 + $0x40] sm:$0xff]   ;;  %467 = vst.msk [vmem:[#allocation2 + $0x18] sm:$0xf0] %vm466_vm3, %v7226_v18  ;;  %v1060_v51 = vshll.u32 %v1016_v20, 16 }
  0x13   : > { %6491 = vmatprep.mubr.msk.bf16.mxu0 %vm442_vm1, %v7172_v4  ;;  %v7179_v11 = vld [vmem:[%s7316_s15 + $0x48] sm:$0xff]   ;;  %v7180_v12 = vld [vmem:[%s7316_s15 + $0x50] sm:$0xff]   ;;  %v7181_v13 = vld [vmem:[%s7316_s15 + $0x58] sm:$0xff]   ;;  %468 = vst.msk [vmem:[#allocation2 + $0x28] sm:$0xf0] %vm466_vm3, %v7226_v18  ;;  %6520 = vmatpush3.bf16.msra.mxu0 %v1469_v22  ;;  %v1059_v3 = vrot.slane %v1057_v50, 3 }
  0x14   : > { %v7182_v14 = vld [vmem:[%s7316_s15 + $0x60] sm:$0xff]   ;;  %v7183_v15 = vld [vmem:[%s7316_s15 + $0x68] sm:$0xff]   ;;  %v7184_v16 = vld [vmem:[%s7316_s15 + $0x70] sm:$0xff]   ;;  %469 = vst.msk [vmem:[#allocation2 + $0x38] sm:$0xf0] %vm466_vm3, %v7226_v18  ;;  %7151 = vmatprep.subr.msk.bf16.mxu0 %vm644_vm0, %v7408_v29 }
  0x15   : > { %v7185_v17 = vld [vmem:[%s7316_s15 + $0x78] sm:$0xff]   ;;  %470 = vst.msk [vmem:[#allocation2 + $0x48] sm:$0xf0] %vm466_vm3, %v7226_v18  ;;  %471 = vst.msk [vmem:[#allocation2 + $0x58] sm:$0xf0] %vm466_vm3, %v7226_v18 }
  0x16   : > { %472 = vst.msk [vmem:[#allocation2 + $0x68] sm:$0xf0] %vm466_vm3, %v7226_v18  ;;  %473 = vst.msk [vmem:[#allocation2 + $0x78] sm:$0xf0] %vm466_vm3, %v7226_v18  ;;  %v1321_v21 = vld [vmem:[#allocation2] sm:$0xf0] }
  0x17   : > { %474 = vst.msk [vmem:[#allocation2 + $0x88] sm:$0xf0] %vm466_vm3, %v7226_v18  ;;  %475 = vst.msk [vmem:[#allocation2 + $0x98] sm:$0xf0] %vm466_vm3, %v7226_v18  ;;  %v1370_v23 = vrot.slane %v1321_v21, 4 }
  0x18   : > { %476 = vst.msk [vmem:[#allocation2 + $0xa8] sm:$0xf0] %vm466_vm3, %v7226_v18  ;;  %477 = vst.msk [vmem:[#allocation2 + $0xb8] sm:$0xf0] %vm466_vm3, %v7226_v18  ;;  %v1015_v44 = vld [vmem:[#allocation2] sm:$0xf8] }
  0x19   : > { %478 = vst.msk [vmem:[#allocation2 + $0xc8] sm:$0xf0] %vm466_vm3, %v7226_v18  ;;  %479 = vst.msk [vmem:[#allocation2 + $0xd8] sm:$0xf0] %vm466_vm3, %v7226_v18  ;;  %v1372_v25 = vsel %vm1369_vm4, %v1370_v23, %v1371_v24  ;;  %v1049_v55 = vshrl.u32 %v1015_v44, 16  ;;  %v1052_v56 = vshll.u32 %v1015_v44, 16 }
  0x1a   : > { %6492 = vmatmul.mubr.msk.bf16.gmra.mrb[4].mxu0 %vm442_vm1, %v7173_v5  ;;  %480 = vst.msk [vmem:[#allocation2 + $0xe8] sm:$0xf0] %vm466_vm3, %v7226_v18  ;;  %481 = vst.msk [vmem:[#allocation2 + $0xf8] sm:$0xf0] %vm466_vm3, %v7226_v18  ;;  %vm1047_vm5 = vsmask.f32 4352 }
  0x1b   : > { %6495 = vmatprep.mubr.msk.bf16.mxu0 %vm442_vm1, %v7174_v6  ;;  %482 = vst.msk [vmem:[#allocation2 + $0x108] sm:$0xf0] %vm466_vm3, %v7226_v18  ;;  %v1051_v5 = vrot.slane %v1049_v55, 3  ;;  %v1054_v6 = vrot.slane %v1052_v56, 4  ;;  %v7451_v23 = vsel %vm644_vm0, %v7401_v28, 0  ;;  %v7463_v28 = vsel %vm644_vm0, %v7446_v19, 0 }
  0x1c   : > { %vm1860_vm6 = vsmask.f32 3328 }
  0x22   : > { %6496 = vmatmul.mubr.msk.bf16.gmra.mrb[8].mxu0 %vm442_vm1, %v7175_v7  ;;  %v1062_v7 = vrot.slane %v1060_v51, 4 }
  0x23   : > { %6499 = vmatprep.mubr.msk.bf16.mxu0 %vm442_vm1, %v7176_v8 }
  0x24   : > { %v1063_v18 = vor.u32 %v1062_v7, %v1059_v3 }
  0x2a   : > { %6500 = vmatmul.mubr.msk.bf16.gmra.mrb[12].mxu0 %vm442_vm1, %v7177_v9 }
  0x2b   : > { %6503 = vmatprep.mubr.msk.bf16.mxu0 %vm442_vm1, %v7178_v10 }
  0x32   : > { %6504 = vmatmul.mubr.msk.bf16.gmra.mrb[16].mxu0 %vm442_vm1, %v7179_v11 }
  0x33   : > { %6507 = vmatprep.mubr.msk.bf16.mxu0 %vm442_vm1, %v7180_v12 }
  0x3a   : > { %6508 = vmatmul.mubr.msk.bf16.gmra.mrb[20].mxu0 %vm442_vm1, %v7181_v13 }
  0x3b   : > { %6511 = vmatprep.mubr.msk.bf16.mxu0 %vm442_vm1, %v7182_v14 }
  0x42   : > { %6512 = vmatmul.mubr.msk.bf16.gmra.mrb[24].mxu0 %vm442_vm1, %v7183_v15 }
  0x43   : > { %6515 = vmatprep.mubr.msk.bf16.mxu0 %vm442_vm1, %v7184_v16 }
  0x4a   : > { %6516 = vmatmul.mubr.msk.bf16.gmra.mrb[28].mxu0 %vm442_vm1, %v7185_v17  ;;  %v1055_v17 = vor.u32 %v1054_v6, %v1051_v5 }
  0x4b   : > { %6521 = vmatprep.mubr.msk.bf16.mxu0 %vm442_vm1, %v1372_v25 }
  0xe5   : > { %v6489_v31 = vpop.f32.mrb[0].mxu0 }
  0xe6   : > { %v818_v33 = vmul.f32 %v6489_v31, %v7415_v30  ;;  %v682_v34 = vpop.f32.mrb[1].mxu0  ;;  %v1681_v31 = vsel %vm644_vm0, %v7408_v29, 0 }
  0xe7   : > { %v816_v35 = vmul.f32 %v7415_v30, %v682_v34  ;;  %v6490_v36 = vpop.f32.mrb[2].mxu0 }
  0xe8   : > { %v857_v37 = vadd.f32 %v7420_v32, %v818_v33  ;;  %v819_v38 = vmul.f32 %v6490_v36, %v7415_v30  ;;  %v685_v39 = vpop.f32.mrb[3].mxu0 }
  0xe9   : > { %v855_v40 = vadd.f32 %v7420_v32, %v816_v35  ;;  %v817_v41 = vmul.f32 %v7415_v30, %v685_v39 }
  0xea   : > { %v858_v42 = vadd.f32 %v7420_v32, %v819_v38  ;;  %v889_v45 = vmax.f32 %v857_v37, 0.0 }
  0xeb   : > { %v856_v43 = vadd.f32 %v7420_v32, %v817_v41  ;;  %v887_v47 = vmax.f32 %v855_v40, 0.0 }
  0xec   : > { %v890_v46 = vmax.f32 %v858_v42, 0.0  ;;  %v7471_v42 = vsel %vm1047_vm5, %v1055_v17, %v1063_v18 }
  0xed   : > { %v888_v48 = vmax.f32 %v856_v43, 0.0  ;;  %v6493_v49 = vpop.f32.mrb[4].mxu0 }
  0xee   : > { %v920_v52 = vpack.c.bf16 %v890_v46, %v889_v45  ;;  %v822_v53 = vmul.f32 %v6493_v49, %v7415_v30  ;;  %v698_v54 = vpop.f32.mrb[5].mxu0 }
  0xef   : > { %v919_v57 = vpack.c.bf16 %v888_v48, %v887_v47  ;;  %v820_v58 = vmul.f32 %v7415_v30, %v698_v54  ;;  %v6494_v59 = vpop.f32.mrb[6].mxu0 }
  0xf0   : > { %v952_v60 = vrot.slane %v920_v52, 4  ;;  %v861_v61 = vadd.f32 %v7420_v32, %v822_v53  ;;  %v823_v62 = vmul.f32 %v6494_v59, %v7415_v30  ;;  %v701_v63 = vpop.f32.mrb[7].mxu0 }
  0xf1   : > { %v951_v0 = vrot.slane %v919_v57, 4  ;;  %v859_v1 = vadd.f32 %v7420_v32, %v820_v58  ;;  %v821_v2 = vmul.f32 %v7415_v30, %v701_v63 }
  0xf2   : > { %985 = vst.msk [vmem:[#allocation2 + $0x20] sm:$0xf0] %vm466_vm3, %v952_v60  ;;  %v862_v4 = vadd.f32 %v7420_v32, %v823_v62  ;;  %v893_v9 = vmax.f32 %v861_v61, 0.0 }
  0xf3   : > { %986 = vst.msk [vmem:[#allocation2 + $0x28] sm:$0xf] %vm449_vm2, %v952_v60  ;;  %984 = vst.msk [vmem:[#allocation2 + $0x18] sm:$0xf] %vm449_vm2, %v951_v0  ;;  %v860_v8 = vadd.f32 %v7420_v32, %v821_v2  ;;  %v891_v11 = vmax.f32 %v859_v1, 0.0 }
  0xf4   : > { %983 = vst.msk [vmem:[#allocation2 + $0x10] sm:$0xf0] %vm466_vm3, %v951_v0  ;;  %v894_v10 = vmax.f32 %v862_v4, 0.0 }
  0xf5   : > { %v892_v12 = vmax.f32 %v860_v8, 0.0  ;;  %v6497_v13 = vpop.f32.mrb[8].mxu0 }
  0xf6   : > { %v922_v14 = vpack.c.bf16 %v894_v10, %v893_v9  ;;  %v826_v15 = vmul.f32 %v6497_v13, %v7415_v30  ;;  %v714_v16 = vpop.f32.mrb[9].mxu0 }
  0xf7   : > { %v921_v20 = vpack.c.bf16 %v892_v12, %v891_v11  ;;  %v824_v21 = vmul.f32 %v7415_v30, %v714_v16  ;;  %v6498_v22 = vpop.f32.mrb[10].mxu0 }
  0xf8   : > { %v954_v24 = vrot.slane %v922_v14, 4  ;;  %v865_v25 = vadd.f32 %v7420_v32, %v826_v15  ;;  %v827_v26 = vmul.f32 %v6498_v22, %v7415_v30  ;;  %v717_v27 = vpop.f32.mrb[11].mxu0 }
  0xf9   : > { %v953_v33 = vrot.slane %v921_v20, 4  ;;  %v863_v34 = vadd.f32 %v7420_v32, %v824_v21  ;;  %v825_v35 = vmul.f32 %v7415_v30, %v717_v27  ;;  %v1323_v37 = vld [vmem:[#allocation2 + $0x20] sm:$0xf0] }
  0xfa   : > { %v7459_v36 = vld [vmem:[#allocation2 + $0x28] sm:$0xf]  ;;  %989 = vst.msk [vmem:[#allocation2 + $0x40] sm:$0xf0] %vm466_vm3, %v954_v24  ;;  %v897_v38 = vmax.f32 %v865_v25, 0.0  ;;  %v866_v39 = vadd.f32 %v7420_v32, %v827_v26  ;;  %v1376_v41 = vrot.slane %v1323_v37, 4 }
  0xfb   : > { %990 = vst.msk [vmem:[#allocation2 + $0x48] sm:$0xf] %vm449_vm2, %v954_v24  ;;  %v7468_v29 = vld [vmem:[#allocation2 + $0x18] sm:$0xf]  ;;  %v1322_v40 = vld [vmem:[#allocation2 + $0x10] sm:$0xf0]  ;;  %v864_v44 = vadd.f32 %v7420_v32, %v825_v35 }
  0xfc   : > { %987 = vst.msk [vmem:[#allocation2 + $0x30] sm:$0xf0] %vm466_vm3, %v953_v33  ;;  %v895_v43 = vmax.f32 %v863_v34, 0.0  ;;  %v1373_v45 = vrot.slane %v1322_v40, 4  ;;  %v1374_v46 = vrot.slane %v7468_v29, 4  ;;  %v898_v48 = vmax.f32 %v866_v39, 0.0 }
  0xfd   : > { %988 = vst.msk [vmem:[#allocation2 + $0x38] sm:$0xf] %vm449_vm2, %v953_v33  ;;  %v2379_v47 = vld [vmem:[#allocation2 + $0x10] sm:$0xf8]  ;;  %v1377_v49 = vrot.slane %v7459_v36, 4  ;;  %v896_v53 = vmax.f32 %v864_v44, 0.0 }
  0xfe   : > { %v7478_v50 = vld [vmem:[#allocation2 + $0x18] sm:$0xf]  ;;  %v2412_v51 = vshrl.u32 %v2379_v47, 16  ;;  %v2415_v52 = vshll.u32 %v2379_v47, 16  ;;  %v6501_v54 = vpop.f32.mrb[12].mxu0  ;;  %v1375_v55 = vsel %vm1369_vm4, %v1373_v45, %v1374_v46  ;;  %v924_v58 = vpack.c.bf16 %v898_v48, %v897_v38 }
  0xff   : > { %v2420_v56 = vshrl.u32 %v7478_v50, 16  ;;  %v2423_v57 = vshll.u32 %v7478_v50, 16  ;;  %v830_v59 = vmul.f32 %v6501_v54, %v7415_v30  ;;  %v730_v60 = vpop.f32.mrb[13].mxu0  ;;  %6522 = vmatmul.mubr.msk.bf16.vlgmr.msra.gmra.mrb[32].mxu0 %vm442_vm1, %v1375_v55  ;;  %v1378_v61 = vsel %vm1369_vm4, %v1376_v41, %v1377_v49  ;;  %v2381_v4 = vld [vmem:[#allocation2 + $0x20] sm:$0xf8] }
 0x100   : > { %v2414_v62 = vrot.slane %v2412_v51, 3  ;;  %v923_v63 = vpack.c.bf16 %v896_v53, %v895_v43  ;;  %v828_v0 = vmul.f32 %v7415_v30, %v730_v60  ;;  %v6502_v1 = vpop.f32.mrb[14].mxu0  ;;  %6525 = vmatprep.mubr.msk.bf16.mxu0 %vm442_vm1, %v1378_v61  ;;  %v2417_v2 = vrot.slane %v2415_v52, 4  ;;  %6554 = vmatpush3.bf16.msra.mxu0 %v1681_v31  ;;  %v7490_v10 = vld [vmem:[#allocation2 + $0x28] sm:$0xf] }
 0x101   : > { %v2422_v3 = vrot.slane %v2420_v56, 3  ;;  %v956_v5 = vrot.slane %v924_v58, 4  ;;  %v869_v6 = vadd.f32 %v7420_v32, %v830_v59  ;;  %v831_v7 = vmul.f32 %v6502_v1, %v7415_v30  ;;  %v733_v8 = vpop.f32.mrb[15].mxu0  ;;  %v1325_v35 = vld [vmem:[#allocation2 + $0x40] sm:$0xf0] }
 0x102   : > { %v2425_v9 = vrot.slane %v2423_v57, 4  ;;  %v955_v11 = vrot.slane %v923_v63, 4  ;;  %v867_v12 = vadd.f32 %v7420_v32, %v828_v0  ;;  %v829_v13 = vmul.f32 %v7415_v30, %v733_v8  ;;  %v7508_v48 = vld [vmem:[#allocation2 + $0x48] sm:$0xf] }
 0x103   : > { %v2418_v14 = vor.u32 %v2417_v2, %v2414_v62  ;;  %993 = vst.msk [vmem:[#allocation2 + $0x60] sm:$0xf0] %vm466_vm3, %v956_v5  ;;  %v901_v15 = vmax.f32 %v869_v6, 0.0  ;;  %v870_v16 = vadd.f32 %v7420_v32, %v831_v7  ;;  %v2429_v18 = vshrl.u32 %v2381_v4, 16  ;;  %v1324_v20 = vld [vmem:[#allocation2 + $0x30] sm:$0xf0] }
 0x104   : > { %994 = vst.msk [vmem:[#allocation2 + $0x68] sm:$0xf] %vm449_vm2, %v956_v5  ;;  %v2426_v17 = vor.u32 %v2425_v9, %v2422_v3  ;;  %992 = vst.msk [vmem:[#allocation2 + $0x58] sm:$0xf] %vm449_vm2, %v955_v11  ;;  %v899_v21 = vmax.f32 %v867_v12, 0.0  ;;  %v868_v22 = vadd.f32 %v7420_v32, %v829_v13  ;;  %v2432_v24 = vshll.u32 %v2381_v4, 16 }
 0x105   : > { %991 = vst.msk [vmem:[#allocation2 + $0x50] sm:$0xf0] %vm466_vm3, %v955_v11  ;;  %v2437_v25 = vshrl.u32 %v7490_v10, 16  ;;  %v7501_v26 = vld [vmem:[#allocation2 + $0x38] sm:$0xf]  ;;  %v902_v27 = vmax.f32 %v870_v16, 0.0 }
 0x106   : > { %v2427_v31 = vsel %vm1047_vm5, %v2418_v14, %v2426_v17  ;;  %v2431_v33 = vrot.slane %v2429_v18, 3  ;;  %v2440_v34 = vshll.u32 %v7490_v10, 16  ;;  %v900_v37 = vmax.f32 %v868_v22, 0.0  ;;  %v6505_v40 = vpop.f32.mrb[16].mxu0  ;;  %v2383_v55 = vld [vmem:[#allocation2 + $0x30] sm:$0xf8] }
 0x107   : > { %6623 = vmatprep.mubr.msk.bf16.mxu1 %vm442_vm1, %v2427_v31  ;;  %v2434_v38 = vrot.slane %v2432_v24, 4  ;;  %v2439_v39 = vrot.slane %v2437_v25, 3  ;;  %v1379_v41 = vrot.slane %v1324_v20, 4  ;;  %v926_v43 = vpack.c.bf16 %v902_v27, %v901_v15  ;;  %v746_v46 = vpop.f32.mrb[17].mxu0  ;;  %v7517_v1 = vld [vmem:[#allocation2 + $0x38] sm:$0xf] }
 0x108   : > { %v2442_v44 = vrot.slane %v2440_v34, 4  ;;  %v834_v45 = vmul.f32 %v6505_v40, %v7415_v30  ;;  %v1380_v47 = vrot.slane %v7501_v26, 4  ;;  %v925_v49 = vpack.c.bf16 %v900_v37, %v899_v21  ;;  %v6506_v53 = vpop.f32.mrb[18].mxu0  ;;  %v2385_v6 = vld [vmem:[#allocation2 + $0x40] sm:$0xf8] }
 0x109   : > { %v2435_v51 = vor.u32 %v2434_v38, %v2431_v33  ;;  %v832_v52 = vmul.f32 %v7415_v30, %v746_v46  ;;  %v1382_v54 = vrot.slane %v1325_v35, 4  ;;  %v958_v56 = vrot.slane %v926_v43, 4  ;;  %v749_v60 = vpop.f32.mrb[19].mxu0  ;;  %v7528_v12 = vld [vmem:[#allocation2 + $0x48] sm:$0xf] }
 0x10a   : > { %v2443_v57 = vor.u32 %v2442_v44, %v2439_v39  ;;  %v873_v58 = vadd.f32 %v7420_v32, %v834_v45  ;;  %v1381_v59 = vsel %vm1369_vm4, %v1379_v41, %v1380_v47  ;;  %v957_v61 = vrot.slane %v925_v49, 4 }
 0x10b   : > { %v871_v62 = vadd.f32 %v7420_v32, %v832_v52  ;;  %6526 = vmatmul.mubr.msk.bf16.gmra.mrb[36].mxu0 %vm442_vm1, %v1381_v59  ;;  %v835_v63 = vmul.f32 %v6506_v53, %v7415_v30  ;;  %v1383_v0 = vrot.slane %v7508_v48, 4  ;;  %997 = vst.msk [vmem:[#allocation2 + $0x80] sm:$0xf0] %vm466_vm3, %v958_v56  ;;  %v833_v4 = vmul.f32 %v7415_v30, %v749_v60  ;;  %v7539_v45 = vld [vmem:[#allocation2 + $0x58] sm:$0xf] }
 0x10c   : > { %998 = vst.msk [vmem:[#allocation2 + $0x88] sm:$0xf] %vm449_vm2, %v958_v56  ;;  %v2444_v2 = vsel %vm1047_vm5, %v2435_v51, %v2443_v57  ;;  %v905_v3 = vmax.f32 %v873_v58, 0.0  ;;  %v2446_v5 = vshrl.u32 %v2383_v55, 16  ;;  %996 = vst.msk [vmem:[#allocation2 + $0x78] sm:$0xf] %vm449_vm2, %v957_v61 }
 0x10d   : > { %995 = vst.msk [vmem:[#allocation2 + $0x70] sm:$0xf0] %vm466_vm3, %v957_v61  ;;  %6624 = vmatmul.mubr.msk.bf16.vlgmr.msra.gmra.mrb[0].mxu1 %vm442_vm1, %v2444_v2  ;;  %v903_v7 = vmax.f32 %v871_v62, 0.0  ;;  %v874_v8 = vadd.f32 %v7420_v32, %v835_v63  ;;  %v1384_v9 = vsel %vm1369_vm4, %v1382_v54, %v1383_v0  ;;  %v2449_v11 = vshll.u32 %v2383_v55, 16  ;;  %v6509_v22 = vpop.f32.mrb[20].mxu0 }
 0x10e   : > { %6656 = vmatpush3.bf16.msra.mxu1 %v7451_v23  ;;  %6529 = vmatprep.mubr.msk.bf16.mxu0 %vm442_vm1, %v1384_v9  ;;  %v872_v13 = vadd.f32 %v7420_v32, %v833_v4  ;;  %v2448_v14 = vrot.slane %v2446_v5, 3  ;;  %v2454_v15 = vshrl.u32 %v7517_v1, 16  ;;  %v2457_v16 = vshll.u32 %v7517_v1, 16  ;;  %v762_v31 = vpop.f32.mrb[21].mxu0  ;;  %v1326_v38 = vld [vmem:[#allocation2 + $0x50] sm:$0xf0] }
 0x10f   : > { %v906_v17 = vmax.f32 %v874_v8, 0.0  ;;  %v2451_v18 = vrot.slane %v2449_v11, 4  ;;  %v2463_v20 = vshrl.u32 %v2385_v6, 16  ;;  %v2466_v21 = vshll.u32 %v2385_v6, 16  ;;  %7155 = vmatprep.subr.msk.bf16.mxu1 %vm644_vm0, %v7446_v19  ;;  %v6510_v39 = vpop.f32.mrb[22].mxu0 }
 0x110   : > { %v904_v24 = vmax.f32 %v872_v13, 0.0  ;;  %v2456_v25 = vrot.slane %v2454_v15, 3  ;;  %v2459_v23 = vrot.slane %v2457_v16, 4  ;;  %v2471_v27 = vshrl.u32 %v7528_v12, 16  ;;  %v765_v19 = vpop.f32.mrb[23].mxu0 }
 0x111   : > { %v928_v33 = vpack.c.bf16 %v906_v17, %v905_v3  ;;  %v2452_v34 = vor.u32 %v2451_v18, %v2448_v14  ;;  %v2465_v35 = vrot.slane %v2463_v20, 3  ;;  %v2468_v37 = vrot.slane %v2466_v21, 4  ;;  %v7543_v52 = vld [vmem:[#allocation2 + $0x68] sm:$0xf]  ;;  %v1327_v53 = vld [vmem:[#allocation2 + $0x60] sm:$0xf0] }
 0x112   : > { %v927_v40 = vpack.c.bf16 %v904_v24, %v903_v7  ;;  %v2460_v41 = vor.u32 %v2459_v23, %v2456_v25  ;;  %v2473_v43 = vrot.slane %v2471_v27, 3  ;;  %v2474_v44 = vshll.u32 %v7528_v12, 16  ;;  %v2387_v62 = vld [vmem:[#allocation2 + $0x50] sm:$0xf8]  ;;  %v7557_v4 = vld [vmem:[#allocation2 + $0x58] sm:$0xf] }
 0x113   : > { %v960_v46 = vrot.slane %v928_v33, 4  ;;  %v2469_v47 = vor.u32 %v2468_v37, %v2465_v35  ;;  %v838_v49 = vmul.f32 %v6509_v22, %v7415_v30  ;;  %v836_v51 = vmul.f32 %v7415_v30, %v762_v31  ;;  %v2389_v9 = vld [vmem:[#allocation2 + $0x60] sm:$0xf8]  ;;  %v7565_v17 = vld [vmem:[#allocation2 + $0x68] sm:$0xf] }
 0x114   : > { %v959_v54 = vrot.slane %v927_v40, 4  ;;  %v2461_v55 = vsel %vm1047_vm5, %v2452_v34, %v2460_v41  ;;  %v2476_v56 = vrot.slane %v2474_v44, 4  ;;  %v1385_v57 = vrot.slane %v1326_v38, 4 }
 0x115   : > { %1001 = vst.msk [vmem:[#allocation2 + $0xa0] sm:$0xf0] %vm466_vm3, %v960_v46  ;;  %6627 = vmatprep.mubr.msk.bf16.mxu1 %vm442_vm1, %v2461_v55  ;;  %v877_v58 = vadd.f32 %v7420_v32, %v838_v49  ;;  %v875_v59 = vadd.f32 %v7420_v32, %v836_v51  ;;  %v1386_v60 = vrot.slane %v7539_v45, 4  ;;  %v839_v61 = vmul.f32 %v6510_v39, %v7415_v30  ;;  %v6513_v11 = vpop.f32.mrb[24].mxu0 }
 0x116   : > { %1002 = vst.msk [vmem:[#allocation2 + $0xa8] sm:$0xf] %vm449_vm2, %v960_v46  ;;  %1000 = vst.msk [vmem:[#allocation2 + $0x98] sm:$0xf] %vm449_vm2, %v959_v54  ;;  %v2477_v63 = vor.u32 %v2476_v56, %v2473_v43  ;;  %v1388_v0 = vrot.slane %v1327_v53, 4  ;;  %v1389_v2 = vrot.slane %v7543_v52, 4  ;;  %v837_v3 = vmul.f32 %v7415_v30, %v765_v19 }
 0x117   : > { %999 = vst.msk [vmem:[#allocation2 + $0x90] sm:$0xf0] %vm466_vm3, %v959_v54  ;;  %v909_v5 = vmax.f32 %v877_v58, 0.0  ;;  %v907_v6 = vmax.f32 %v875_v59, 0.0  ;;  %v1387_v7 = vsel %vm1369_vm4, %v1385_v57, %v1386_v60  ;;  %v878_v8 = vadd.f32 %v7420_v32, %v839_v61  ;;  %v778_v18 = vpop.f32.mrb[25].mxu0 }
 0x118   : > { %v2478_v13 = vsel %vm1047_vm5, %v2469_v47, %v2477_v63  ;;  %6530 = vmatmul.mubr.msk.bf16.gmra.mrb[40].mxu0 %vm442_vm1, %v1387_v7  ;;  %v1390_v14 = vsel %vm1369_vm4, %v1388_v0, %v1389_v2  ;;  %v876_v15 = vadd.f32 %v7420_v32, %v837_v3  ;;  %v2480_v16 = vshrl.u32 %v2387_v62, 16  ;;  %v6514_v25 = vpop.f32.mrb[26].mxu0  ;;  %v1328_v19 = vld [vmem:[#allocation2 + $0x70] sm:$0xf0]  ;;  %v7573_v53 = vld [vmem:[#allocation2 + $0x78] sm:$0xf] }
 0x119   : > { %6628 = vmatmul.mubr.msk.bf16.gmra.mrb[4].mxu1 %vm442_vm1, %v2478_v13  ;;  %v910_v20 = vmax.f32 %v878_v8, 0.0  ;;  %6533 = vmatprep.mubr.msk.bf16.mxu0 %vm442_vm1, %v1390_v14  ;;  %v2483_v21 = vshll.u32 %v2387_v62, 16  ;;  %v2488_v22 = vshrl.u32 %v7557_v4, 16  ;;  %v2491_v24 = vshll.u32 %v7557_v4, 16  ;;  %v781_v34 = vpop.f32.mrb[27].mxu0 }
 0x11a   : > { %v908_v23 = vmax.f32 %v876_v15, 0.0  ;;  %v2482_v27 = vrot.slane %v2480_v16, 3  ;;  %v2497_v31 = vshrl.u32 %v2389_v9, 16  ;;  %v2500_v33 = vshll.u32 %v2389_v9, 16  ;;  %v1329_v54 = vld [vmem:[#allocation2 + $0x80] sm:$0xf0] }
 0x11b   : > { %v930_v35 = vpack.c.bf16 %v910_v20, %v909_v5  ;;  %v2485_v37 = vrot.slane %v2483_v21, 4  ;;  %v2490_v38 = vrot.slane %v2488_v22, 3  ;;  %v2493_v39 = vrot.slane %v2491_v24, 4  ;;  %v7576_v59 = vld [vmem:[#allocation2 + $0x88] sm:$0xf] }
 0x11c   : > { %v929_v40 = vpack.c.bf16 %v908_v23, %v907_v6  ;;  %v2499_v41 = vrot.slane %v2497_v31, 3  ;;  %v2502_v43 = vrot.slane %v2500_v33, 4  ;;  %v2505_v44 = vshrl.u32 %v7565_v17, 16  ;;  %v2391_v0 = vld [vmem:[#allocation2 + $0x70] sm:$0xf8] }
 0x11d   : > { %v962_v46 = vrot.slane %v930_v35, 4  ;;  %v2486_v47 = vor.u32 %v2485_v37, %v2482_v27  ;;  %v2494_v49 = vor.u32 %v2493_v39, %v2490_v38  ;;  %v2508_v51 = vshll.u32 %v7565_v17, 16  ;;  %v6517_v2 = vpop.f32.mrb[28].mxu0  ;;  %v7591_v15 = vld [vmem:[#allocation2 + $0x78] sm:$0xf] }
 0x11e   : > { %v961_v55 = vrot.slane %v929_v40, 4  ;;  %v2503_v56 = vor.u32 %v2502_v43, %v2499_v41  ;;  %v2507_v57 = vrot.slane %v2505_v44, 3  ;;  %v842_v58 = vmul.f32 %v6513_v11, %v7415_v30  ;;  %v794_v8 = vpop.f32.mrb[29].mxu0  ;;  %v2393_v24 = vld [vmem:[#allocation2 + $0x80] sm:$0xf8] }
 0x11f   : > { %1005 = vst.msk [vmem:[#allocation2 + $0xc0] sm:$0xf0] %vm466_vm3, %v962_v46  ;;  %v2495_v60 = vsel %vm1047_vm5, %v2486_v47, %v2494_v49  ;;  %v2510_v61 = vrot.slane %v2508_v51, 4  ;;  %v840_v62 = vmul.f32 %v7415_v30, %v778_v18  ;;  %v1391_v63 = vrot.slane %v1328_v19, 4  ;;  %v6518_v16 = vpop.f32.mrb[30].mxu0 }
 0x120   : > { %1006 = vst.msk [vmem:[#allocation2 + $0xc8] sm:$0xf] %vm449_vm2, %v962_v46  ;;  %1004 = vst.msk [vmem:[#allocation2 + $0xb8] sm:$0xf] %vm449_vm2, %v961_v55  ;;  %6631 = vmatprep.mubr.msk.bf16.mxu1 %vm442_vm1, %v2495_v60  ;;  %v881_v3 = vadd.f32 %v7420_v32, %v842_v58  ;;  %v1392_v5 = vrot.slane %v7573_v53, 4  ;;  %v843_v6 = vmul.f32 %v6514_v25, %v7415_v30  ;;  %v1394_v7 = vrot.slane %v1329_v54, 4 }
 0x121   : > { %1003 = vst.msk [vmem:[#allocation2 + $0xb0] sm:$0xf0] %vm466_vm3, %v961_v55  ;;  %v2511_v9 = vor.u32 %v2510_v61, %v2507_v57  ;;  %v879_v11 = vadd.f32 %v7420_v32, %v840_v62  ;;  %v1395_v13 = vrot.slane %v7576_v59, 4  ;;  %v841_v14 = vmul.f32 %v7415_v30, %v781_v34  ;;  %v797_v25 = vpop.f32.mrb[31].mxu0  ;;  %v7599_v34 = vld [vmem:[#allocation2 + $0x88] sm:$0xf] }
 0x122   : > { %v913_v18 = vmax.f32 %v881_v3, 0.0  ;;  %v1393_v20 = vsel %vm1369_vm4, %v1391_v63, %v1392_v5  ;;  %v882_v21 = vadd.f32 %v7420_v32, %v843_v6  ;;  %v2514_v22 = vshrl.u32 %v2391_v0, 16  ;;  %v7606_v51 = vld [vmem:[#allocation2 + $0x98] sm:$0xf]  ;;  %v1330_v58 = vld [vmem:[#allocation2 + $0x90] sm:$0xf0] }
 0x123   : > { %v2512_v23 = vsel %vm1047_vm5, %v2503_v56, %v2511_v9  ;;  %v911_v27 = vmax.f32 %v879_v11, 0.0  ;;  %6534 = vmatmul.mubr.msk.bf16.gmra.mrb[44].mxu0 %vm442_vm1, %v1393_v20  ;;  %v1396_v31 = vsel %vm1369_vm4, %v1394_v7, %v1395_v13  ;;  %v880_v33 = vadd.f32 %v7420_v32, %v841_v14  ;;  %v7610_v9 = vld [vmem:[#allocation2 + $0xa8] sm:$0xf]  ;;  %v2395_v20 = vld [vmem:[#allocation2 + $0x90] sm:$0xf8] }
 0x124   : > { %6632 = vmatmul.mubr.msk.bf16.gmra.mrb[8].mxu1 %vm442_vm1, %v2512_v23  ;;  %v914_v35 = vmax.f32 %v882_v21, 0.0  ;;  %6537 = vmatprep.mubr.msk.bf16.mxu0 %vm442_vm1, %v1396_v31  ;;  %v2516_v37 = vrot.slane %v2514_v22, 3  ;;  %v2517_v38 = vshll.u32 %v2391_v0, 16  ;;  %v2522_v39 = vshrl.u32 %v7591_v15, 16  ;;  %v1331_v0 = vld [vmem:[#allocation2 + $0xa0] sm:$0xf0] }
 0x125   : > { %v912_v40 = vmax.f32 %v880_v33, 0.0  ;;  %v2525_v41 = vshll.u32 %v7591_v15, 16  ;;  %v2531_v43 = vshrl.u32 %v2393_v24, 16  ;;  %v2534_v44 = vshll.u32 %v2393_v24, 16  ;;  %v7625_v33 = vld [vmem:[#allocation2 + $0x98] sm:$0xf] }
 0x126   : > { %v932_v19 = vpack.c.bf16 %v914_v35, %v913_v18  ;;  %v2519_v46 = vrot.slane %v2517_v38, 4  ;;  %v2524_v47 = vrot.slane %v2522_v39, 3  ;;  %v2539_v49 = vshrl.u32 %v7599_v34, 16  ;;  %v2397_v39 = vld [vmem:[#allocation2 + $0xa0] sm:$0xf8] }
 0x127   : > { %v931_v54 = vpack.c.bf16 %v912_v40, %v911_v27  ;;  %v2527_v55 = vrot.slane %v2525_v41, 4  ;;  %v2533_v56 = vrot.slane %v2531_v43, 3  ;;  %v2536_v57 = vrot.slane %v2534_v44, 4 }
 0x128   : > { %v964_v60 = vrot.slane %v932_v19, 4  ;;  %v2520_v61 = vor.u32 %v2519_v46, %v2516_v37  ;;  %v2541_v62 = vrot.slane %v2539_v49, 3  ;;  %v2542_v63 = vshll.u32 %v7599_v34, 16  ;;  %v7632_v19 = vld [vmem:[#allocation2 + $0xa8] sm:$0xf] }
 0x129   : > { %v963_v3 = vrot.slane %v931_v54, 4  ;;  %v2528_v5 = vor.u32 %v2527_v55, %v2524_v47  ;;  %v2537_v6 = vor.u32 %v2536_v57, %v2533_v56  ;;  %v846_v7 = vmul.f32 %v6517_v2, %v7415_v30  ;;  %v7639_v57 = vld [vmem:[#allocation2 + $0xb8] sm:$0xf] }
 0x12a   : > { %1009 = vst.msk [vmem:[#allocation2 + $0xe0] sm:$0xf0] %vm466_vm3, %v964_v60  ;;  %v2544_v11 = vrot.slane %v2542_v63, 4  ;;  %v844_v13 = vmul.f32 %v7415_v30, %v794_v8  ;;  %v1397_v14 = vrot.slane %v1330_v58, 4  ;;  %v1398_v18 = vrot.slane %v7606_v51, 4 }
 0x12b   : > { %1010 = vst.msk [vmem:[#allocation2 + $0xe8] sm:$0xf] %vm449_vm2, %v964_v60  ;;  %1008 = vst.msk [vmem:[#allocation2 + $0xd8] sm:$0xf] %vm449_vm2, %v963_v3  ;;  %v2529_v21 = vsel %vm1047_vm5, %v2520_v61, %v2528_v5  ;;  %v885_v2 = vadd.f32 %v7420_v32, %v846_v7  ;;  %v847_v22 = vmul.f32 %v6518_v16, %v7415_v30  ;;  %v1400_v24 = vrot.slane %v1331_v0, 4 }
 0x12c   : > { %1007 = vst.msk [vmem:[#allocation2 + $0xd0] sm:$0xf0] %vm466_vm3, %v963_v3  ;;  %6635 = vmatprep.mubr.msk.bf16.mxu1 %vm442_vm1, %v2529_v21  ;;  %v2545_v23 = vor.u32 %v2544_v11, %v2541_v62  ;;  %v883_v8 = vadd.f32 %v7420_v32, %v844_v13  ;;  %v1399_v27 = vsel %vm1369_vm4, %v1397_v14, %v1398_v18  ;;  %v1401_v31 = vrot.slane %v7610_v9, 4  ;;  %v7641_v58 = vld [vmem:[#allocation2 + $0xc8] sm:$0xf] }
 0x12d   : > { %v917_v35 = vmax.f32 %v885_v2, 0.0  ;;  %6538 = vmatmul.mubr.msk.bf16.gmra.mrb[48].mxu0 %vm442_vm1, %v1399_v27  ;;  %v886_v37 = vadd.f32 %v7420_v32, %v847_v22  ;;  %v845_v38 = vmul.f32 %v7415_v30, %v797_v25  ;;  %v2548_v16 = vshrl.u32 %v2395_v20, 16  ;;  %v1332_v0 = vld [vmem:[#allocation2 + $0xb0] sm:$0xf0]  ;;  %v1333_v7 = vld [vmem:[#allocation2 + $0xc0] sm:$0xf0] }
 0x12e   : > { %v2546_v40 = vsel %vm1047_vm5, %v2537_v6, %v2545_v23  ;;  %v915_v41 = vmax.f32 %v883_v8, 0.0  ;;  %v1402_v43 = vsel %vm1369_vm4, %v1400_v24, %v1401_v31  ;;  %v2551_v44 = vshll.u32 %v2395_v20, 16  ;;  %v2399_v20 = vld [vmem:[#allocation2 + $0xb0] sm:$0xf8]  ;;  %v7646_v23 = vld [vmem:[#allocation2 + $0xb8] sm:$0xf] }
 0x12f   : > { %6636 = vmatmul.mubr.msk.bf16.gmra.mrb[12].mxu1 %vm442_vm1, %v2546_v40  ;;  %v918_v46 = vmax.f32 %v886_v37, 0.0  ;;  %6541 = vmatprep.mubr.msk.bf16.mxu0 %vm442_vm1, %v1402_v43  ;;  %v884_v47 = vadd.f32 %v7420_v32, %v845_v38  ;;  %v2550_v49 = vrot.slane %v2548_v16, 3  ;;  %v2556_v30 = vshrl.u32 %v7625_v33, 16  ;;  %v2401_v37 = vld [vmem:[#allocation2 + $0xc0] sm:$0xf8] }
 0x130   : > { %v2553_v25 = vrot.slane %v2551_v44, 4  ;;  %v2559_v54 = vshll.u32 %v7625_v33, 16  ;;  %v2565_v55 = vshrl.u32 %v2397_v39, 16  ;;  %v2568_v56 = vshll.u32 %v2397_v39, 16 }
 0x131   : > { %v934_v60 = vpack.c.bf16 %v918_v46, %v917_v35  ;;  %v916_v61 = vmax.f32 %v884_v47, 0.0  ;;  %v2558_v62 = vrot.slane %v2556_v30, 3  ;;  %v2573_v63 = vshrl.u32 %v7632_v19, 16 }
 0x132   : > { %v2554_v3 = vor.u32 %v2553_v25, %v2550_v49  ;;  %v2561_v32 = vrot.slane %v2559_v54, 4  ;;  %v2567_v5 = vrot.slane %v2565_v55, 3  ;;  %v2570_v6 = vrot.slane %v2568_v56, 4  ;;  %v7662_v49 = vld [vmem:[#allocation2 + $0xd8] sm:$0xf] }
 0x133   : > { %v966_v11 = vrot.slane %v934_v60, 4  ;;  %v933_v13 = vpack.c.bf16 %v916_v61, %v915_v41  ;;  %v2575_v14 = vrot.slane %v2573_v63, 3  ;;  %v2576_v18 = vshll.u32 %v7632_v19, 16  ;;  %v7653_v41 = vld [vmem:[#allocation2 + $0xc8] sm:$0xf] }
 0x134   : > { %v2562_v21 = vor.u32 %v2561_v32, %v2558_v62  ;;  %v2571_v2 = vor.u32 %v2570_v6, %v2567_v5  ;;  %v1403_v22 = vrot.slane %v1332_v0, 4  ;;  %v1404_v24 = vrot.slane %v7639_v57, 4  ;;  %v1334_v30 = vld [vmem:[#allocation2 + $0xd0] sm:$0xf0]  ;;  %v7664_v25 = vld [vmem:[#allocation2 + $0xe8] sm:$0xf] }
 0x135   : > { %1013 = vst.msk [vmem:[#allocation2 + $0x100] sm:$0xf0] %vm466_vm3, %v966_v11  ;;  %v965_v8 = vrot.slane %v933_v13, 4  ;;  %v2578_v27 = vrot.slane %v2576_v18, 4  ;;  %v1406_v31 = vrot.slane %v1333_v7, 4  ;;  %v1407_v35 = vrot.slane %v7641_v58, 4 }
 0x136   : > { %1014 = vst.msk [vmem:[#allocation2 + $0x108] sm:$0xf] %vm449_vm2, %v966_v11  ;;  %v2563_v38 = vsel %vm1047_vm5, %v2554_v3, %v2562_v21  ;;  %v1405_v16 = vsel %vm1369_vm4, %v1403_v22, %v1404_v24  ;;  %v2582_v39 = vshrl.u32 %v2399_v20, 16  ;;  %v2585_v40 = vshll.u32 %v2399_v20, 16  ;;  %v1335_v61 = vld [vmem:[#allocation2 + $0xe0] sm:$0xf0] }
 0x137   : > { %1011 = vst.msk [vmem:[#allocation2 + $0xf0] sm:$0xf0] %vm466_vm3, %v965_v8  ;;  %6639 = vmatprep.mubr.msk.bf16.mxu1 %vm442_vm1, %v2563_v38  ;;  %v2579_v43 = vor.u32 %v2578_v27, %v2575_v14  ;;  %6542 = vmatmul.mubr.msk.bf16.gmra.mrb[52].mxu0 %vm442_vm1, %v1405_v16  ;;  %v1408_v44 = vsel %vm1369_vm4, %v1406_v31, %v1407_v35  ;;  %v2590_v46 = vshrl.u32 %v7646_v23, 16  ;;  %v2593_v47 = vshll.u32 %v7646_v23, 16  ;;  %v2403_v32 = vld [vmem:[#allocation2 + $0xd0] sm:$0xf8] }
 0x138   : > { %1012 = vst.msk [vmem:[#allocation2 + $0xf8] sm:$0xf] %vm449_vm2, %v965_v8  ;;  %6545 = vmatprep.mubr.msk.bf16.mxu0 %vm442_vm1, %v1408_v44  ;;  %v2584_v54 = vrot.slane %v2582_v39, 3  ;;  %v2587_v55 = vrot.slane %v2585_v40, 4  ;;  %v2599_v56 = vshrl.u32 %v2401_v37, 16  ;;  %v2602_v60 = vshll.u32 %v2401_v37, 16 }
 0x139   : > { %v2580_v62 = vsel %vm1047_vm5, %v2571_v2, %v2579_v43  ;;  %v2592_v63 = vrot.slane %v2590_v46, 3  ;;  %v2595_v0 = vrot.slane %v2593_v47, 4  ;;  %v2607_v3 = vshrl.u32 %v7653_v41, 16  ;;  %v7674_v13 = vld [vmem:[%s8816_s2 + $0x4] sm:$0x3] }
 0x13a   : > { %6640 = vmatmul.mubr.msk.bf16.gmra.mrb[16].mxu1 %vm442_vm1, %v2580_v62  ;;  %v2588_v5 = vor.u32 %v2587_v55, %v2584_v54  ;;  %v2601_v6 = vrot.slane %v2599_v56, 3  ;;  %v2604_v7 = vrot.slane %v2602_v60, 4  ;;  %v2610_v11 = vshll.u32 %v7653_v41, 16  ;;  %v7677_v2 = vld [vmem:[#allocation2 + $0xd8] sm:$0xf]  ;;  %7152 = vmatprep.subr.msk.bf16.mxu0 %vm644_vm0, %v7674_v13 }
 0x13b   : > { %v2596_v14 = vor.u32 %v2595_v0, %v2592_v63  ;;  %v2609_v18 = vrot.slane %v2607_v3, 3  ;;  %v1409_v20 = vrot.slane %v1334_v30, 4  ;;  %v1410_v21 = vrot.slane %v7662_v49, 4  ;;  %v2405_v31 = vld [vmem:[#allocation2 + $0xe0] sm:$0xf8] }
 0x13c   : > { %v2605_v22 = vor.u32 %v2604_v7, %v2601_v6  ;;  %v2612_v24 = vrot.slane %v2610_v11, 4  ;;  %v1412_v8 = vrot.slane %v1335_v61, 4  ;;  %v1413_v27 = vrot.slane %v7664_v25, 4  ;;  %v7684_v39 = vld [vmem:[#allocation2 + $0xe8] sm:$0xf] }
 0x13d   : > { %v2597_v35 = vsel %vm1047_vm5, %v2588_v5, %v2596_v14  ;;  %v1411_v37 = vsel %vm1369_vm4, %v1409_v20, %v1410_v21  ;;  %v2616_v38 = vshrl.u32 %v2403_v32, 16  ;;  %v2619_v16 = vshll.u32 %v2403_v32, 16 }
 0x13e   : > { %6643 = vmatprep.mubr.msk.bf16.mxu1 %vm442_vm1, %v2597_v35  ;;  %v2613_v40 = vor.u32 %v2612_v24, %v2609_v18  ;;  %v1414_v43 = vsel %vm1369_vm4, %v1412_v8, %v1413_v27  ;;  %v2624_v44 = vshrl.u32 %v7677_v2, 16  ;;  %v2627_v46 = vshll.u32 %v7677_v2, 16  ;;  %v1336_v60 = vld [vmem:[#allocation2 + $0xf0] sm:$0xf0]  ;;  %v7701_v35 = vld [vmem:[#allocation2 + $0x108] sm:$0xf] }
 0x13f   : > { %v7690_v47 = vld [vmem:[#allocation2 + $0xf8] sm:$0xf]  ;;  %6546 = vmatmul.mubr.msk.bf16.gmra.mrb[56].mxu0 %vm442_vm1, %v1411_v37  ;;  %v2618_v30 = vrot.slane %v2616_v38, 3  ;;  %v2621_v54 = vrot.slane %v2619_v16, 4  ;;  %v2633_v55 = vshrl.u32 %v2405_v31, 16  ;;  %v2636_v56 = vshll.u32 %v2405_v31, 16 }
 0x140   : > { %v2614_v61 = vsel %vm1047_vm5, %v2605_v22, %v2613_v40  ;;  %6549 = vmatprep.mubr.msk.bf16.mxu0 %vm442_vm1, %v1414_v43  ;;  %v2626_v62 = vrot.slane %v2624_v44, 3  ;;  %v2629_v63 = vrot.slane %v2627_v46, 4  ;;  %v2641_v0 = vshrl.u32 %v7684_v39, 16  ;;  %v2407_v3 = vld [vmem:[#allocation2 + $0xf0] sm:$0xf8] }
 0x141   : > { %v2622_v32 = vor.u32 %v2621_v54, %v2618_v30  ;;  %v2635_v5 = vrot.slane %v2633_v55, 3  ;;  %v2638_v6 = vrot.slane %v2636_v56, 4  ;;  %v2644_v7 = vshll.u32 %v7684_v39, 16  ;;  %v7697_v11 = vld [vmem:[#allocation2 + $0xf8] sm:$0xf] }
 0x142   : > { %6644 = vmatmul.mubr.msk.bf16.gmra.mrb[20].mxu1 %vm442_vm1, %v2614_v61  ;;  %v2630_v14 = vor.u32 %v2629_v63, %v2626_v62  ;;  %v2643_v18 = vrot.slane %v2641_v0, 3  ;;  %v1415_v20 = vrot.slane %v1336_v60, 4  ;;  %v1416_v21 = vrot.slane %v7690_v47, 4  ;;  %v2409_v22 = vld [vmem:[#allocation2 + $0x100] sm:$0xf8] }
 0x143   : > { %v2639_v24 = vor.u32 %v2638_v6, %v2635_v5  ;;  %v2646_v8 = vrot.slane %v2644_v7, 4  ;;  %v2650_v27 = vshrl.u32 %v2407_v3, 16  ;;  %v2653_v31 = vshll.u32 %v2407_v3, 16  ;;  %v7708_v54 = vld [vmem:[#allocation2 + $0x10] sm:$0xf0] }
 0x144   : > { %v2631_v37 = vsel %vm1047_vm5, %v2622_v32, %v2630_v14  ;;  %v1417_v38 = vsel %vm1369_vm4, %v1415_v20, %v1416_v21  ;;  %v2658_v16 = vshrl.u32 %v7697_v11, 16  ;;  %v2661_v40 = vshll.u32 %v7697_v11, 16  ;;  %v1017_v62 = vld [vmem:[#allocation2 + $0x10] sm:$0xf8] }
 0x145   : > { %6647 = vmatprep.mubr.msk.bf16.mxu1 %vm442_vm1, %v2631_v37  ;;  %v2647_v43 = vor.u32 %v2646_v8, %v2643_v18  ;;  %v2652_v44 = vrot.slane %v2650_v27, 3  ;;  %v2655_v46 = vrot.slane %v2653_v31, 4  ;;  %v2667_v30 = vshrl.u32 %v2409_v22, 16 }
 0x146   : > { %v2660_v55 = vrot.slane %v2658_v16, 3  ;;  %v2663_v56 = vrot.slane %v2661_v40, 4  ;;  %v2670_v60 = vshll.u32 %v2409_v22, 16  ;;  %v2675_v61 = vshrl.u32 %v7701_v35, 16 }
 0x147   : > { %v2648_v63 = vsel %vm1047_vm5, %v2639_v24, %v2647_v43  ;;  %6550 = vmatmul.mubr.msk.bf16.gmra.mrb[60].mxu0 %vm442_vm1, %v1417_v38  ;;  %v2656_v0 = vor.u32 %v2655_v46, %v2652_v44  ;;  %v2669_v3 = vrot.slane %v2667_v30, 3  ;;  %v2678_v32 = vshll.u32 %v7701_v35, 16  ;;  %v1019_v24 = vld [vmem:[#allocation2 + $0x20] sm:$0xf8] }
 0x148   : > { %v2664_v5 = vor.u32 %v2663_v56, %v2660_v55  ;;  %v2672_v6 = vrot.slane %v2670_v60, 4  ;;  %v2677_v7 = vrot.slane %v2675_v61, 3  ;;  %v2977_v14 = vrot.slane %v7708_v54, 4  ;;  %6555 = vmatprep.mubr.msk.bf16.mxu0 %vm442_vm1, %v7471_v42  ;;  %v7726_v55 = vld [vmem:[#allocation2 + $0x30] sm:$0xf0] }
 0x149   : > { %v2680_v18 = vrot.slane %v2678_v32, 4  ;;  %v2978_v20 = vrot.slane %v7478_v50, 4  ;;  %v1066_v21 = vshrl.u32 %v1017_v62, 16  ;;  %v1069_v22 = vshll.u32 %v1017_v62, 16  ;;  %v7724_v50 = vld [vmem:[#allocation2 + $0x20] sm:$0xf0] }
 0x14a   : > { %6648 = vmatmul.mubr.msk.bf16.gmra.mrb[24].mxu1 %vm442_vm1, %v2648_v63  ;;  %v2665_v8 = vsel %vm1047_vm5, %v2656_v0, %v2664_v5  ;;  %v2673_v27 = vor.u32 %v2672_v6, %v2669_v3  ;;  %v1074_v31 = vshrl.u32 %v7468_v29, 16  ;;  %v1077_v37 = vshll.u32 %v7468_v29, 16  ;;  %v1021_v62 = vld [vmem:[#allocation2 + $0x30] sm:$0xf8] }
 0x14b   : > { %6651 = vmatprep.mubr.msk.bf16.mxu1 %vm442_vm1, %v2665_v8  ;;  %v2681_v38 = vor.u32 %v2680_v18, %v2677_v7  ;;  %v2979_v42 = vsel %vm1369_vm4, %v2977_v14, %v2978_v20  ;;  %v1068_v16 = vrot.slane %v1066_v21, 3  ;;  %v1071_v40 = vrot.slane %v1069_v22, 4  ;;  %v1023_v18 = vld [vmem:[#allocation2 + $0x40] sm:$0xf8] }
 0x14c   : > { %v1076_v43 = vrot.slane %v1074_v31, 3  ;;  %v1079_v44 = vrot.slane %v1077_v37, 4  ;;  %v1083_v46 = vshrl.u32 %v1019_v24, 16  ;;  %v1086_v30 = vshll.u32 %v1019_v24, 16 }
 0x14d   : > { %v2682_v56 = vsel %vm1047_vm5, %v2673_v27, %v2681_v38  ;;  %v1072_v60 = vor.u32 %v1071_v40, %v1068_v16  ;;  %v1091_v29 = vshrl.u32 %v7459_v36, 16  ;;  %v1094_v61 = vshll.u32 %v7459_v36, 16  ;;  %v7742_v40 = vld [vmem:[#allocation2 + $0x40] sm:$0xf0] }
 0x14e   : > { %v1080_v63 = vor.u32 %v1079_v44, %v1076_v43  ;;  %v1085_v0 = vrot.slane %v1083_v46, 3  ;;  %v1088_v3 = vrot.slane %v1086_v30, 4  ;;  %v2980_v32 = vrot.slane %v7724_v50, 4  ;;  %v7746_v30 = vld [vmem:[#allocation2 + $0x50] sm:$0xf0] }
 0x14f   : > { %v1093_v5 = vrot.slane %v1091_v29, 3  ;;  %v1096_v6 = vrot.slane %v1094_v61, 4  ;;  %v2981_v7 = vrot.slane %v7490_v10, 4  ;;  %v2983_v14 = vrot.slane %v7726_v55, 4  ;;  %v1025_v61 = vld [vmem:[#allocation2 + $0x50] sm:$0xf8] }
 0x150   : > { %v1081_v20 = vsel %vm1047_vm5, %v1072_v60, %v1080_v63  ;;  %v1089_v21 = vor.u32 %v1088_v3, %v1085_v0  ;;  %v2984_v22 = vrot.slane %v7517_v1, 4  ;;  %v1100_v24 = vshrl.u32 %v1021_v62, 16 }
 0x151   : > { %6556 = vmatmul.mubr.msk.bf16.vlgmr.msra.gmra.mrb[32].mxu0 %vm442_vm1, %v1081_v20  ;;  %v1097_v36 = vor.u32 %v1096_v6, %v1093_v5  ;;  %v2982_v8 = vsel %vm1369_vm4, %v2980_v32, %v2981_v7  ;;  %v1103_v27 = vshll.u32 %v1021_v62, 16  ;;  %v1108_v31 = vshrl.u32 %v7501_v26, 16  ;;  %v1027_v7 = vld [vmem:[#allocation2 + $0x60] sm:$0xf8] }
 0x152   : > { %6652 = vmatmul.mubr.msk.bf16.gmra.mrb[28].mxu1 %vm442_vm1, %v2682_v56  ;;  %v2985_v10 = vsel %vm1369_vm4, %v2983_v14, %v2984_v22  ;;  %v1102_v37 = vrot.slane %v1100_v24, 3  ;;  %v1111_v38 = vshll.u32 %v7501_v26, 16  ;;  %v1117_v16 = vshrl.u32 %v1023_v18, 16 }
 0x153   : > { %6657 = vmatprep.mubr.msk.bf16.mxu1 %vm442_vm1, %v2979_v42  ;;  %v1098_v1 = vsel %vm1047_vm5, %v1089_v21, %v1097_v36  ;;  %v1105_v43 = vrot.slane %v1103_v27, 4  ;;  %v1110_v44 = vrot.slane %v1108_v31, 3  ;;  %v1120_v46 = vshll.u32 %v1023_v18, 16  ;;  %v7758_v27 = vld [vmem:[#allocation2 + $0x60] sm:$0xf0] }
 0x154   : > { %6559 = vmatprep.mubr.msk.bf16.mxu0 %vm442_vm1, %v1098_v1  ;;  %v1113_v56 = vrot.slane %v1111_v38, 4  ;;  %v1119_v60 = vrot.slane %v1117_v16, 3  ;;  %v1125_v29 = vshrl.u32 %v7508_v48, 16  ;;  %v1128_v26 = vshll.u32 %v7508_v48, 16 }
 0x155   : > { %v1106_v62 = vor.u32 %v1105_v43, %v1102_v37  ;;  %v1122_v63 = vrot.slane %v1120_v46, 4  ;;  %v2986_v42 = vrot.slane %v7742_v40, 4  ;;  %v2987_v0 = vrot.slane %v7528_v12, 4  ;;  %v7770_v46 = vld [vmem:[#allocation2 + $0x70] sm:$0xf0] }
 0x156   : > { %v1114_v3 = vor.u32 %v1113_v56, %v1110_v44  ;;  %v1127_v32 = vrot.slane %v1125_v29, 3  ;;  %v1130_v5 = vrot.slane %v1128_v26, 4  ;;  %v2989_v6 = vrot.slane %v7746_v30, 4  ;;  %v1029_v26 = vld [vmem:[#allocation2 + $0x70] sm:$0xf8] }
 0x157   : > { %v1123_v14 = vor.u32 %v1122_v63, %v1119_v60  ;;  %v2988_v18 = vsel %vm1369_vm4, %v2986_v42, %v2987_v0  ;;  %v2990_v20 = vrot.slane %v7557_v4, 4  ;;  %v1134_v21 = vshrl.u32 %v1025_v61, 16  ;;  %v7766_v4 = vld [vmem:[%s8816_s2 + $0xc] sm:$0x3] }
 0x158   : > { %v1115_v48 = vsel %vm1047_vm5, %v1106_v62, %v1114_v3  ;;  %v1131_v22 = vor.u32 %v1130_v5, %v1127_v32  ;;  %v1137_v24 = vshll.u32 %v1025_v61, 16  ;;  %v1142_v36 = vshrl.u32 %v7539_v45, 16  ;;  %v1031_v3 = vld [vmem:[#allocation2 + $0x80] sm:$0xf8] }
 0x159   : > { %6560 = vmatmul.mubr.msk.bf16.gmra.mrb[36].mxu0 %vm442_vm1, %v1115_v48  ;;  %v2991_v12 = vsel %vm1369_vm4, %v2989_v6, %v2990_v20  ;;  %v1136_v31 = vrot.slane %v1134_v21, 3  ;;  %v1145_v37 = vshll.u32 %v7539_v45, 16  ;;  %v1151_v38 = vshrl.u32 %v1027_v7, 16 }
 0x15a   : > { %6658 = vmatmul.mubr.msk.bf16.vlgmr.msra.gmra.mrb[0].mxu1 %vm442_vm1, %v2982_v8  ;;  %v1132_v16 = vsel %vm1047_vm5, %v1123_v14, %v1131_v22  ;;  %v1139_v1 = vrot.slane %v1137_v24, 4  ;;  %v1144_v43 = vrot.slane %v1142_v36, 3  ;;  %v1154_v44 = vshll.u32 %v1027_v7, 16  ;;  %v7788_v36 = vld [vmem:[#allocation2 + $0x80] sm:$0xf0] }
 0x15b   : > { %6690 = vmatpush3.bf16.msra.mxu1 %v7463_v28  ;;  %6661 = vmatprep.mubr.msk.bf16.mxu1 %vm442_vm1, %v2985_v10  ;;  %v1147_v45 = vrot.slane %v1145_v37, 4  ;;  %v1153_v56 = vrot.slane %v1151_v38, 3  ;;  %v1159_v60 = vshrl.u32 %v7543_v52, 16  ;;  %v1162_v29 = vshll.u32 %v7543_v52, 16 }
 0x15c   : > { %6563 = vmatprep.mubr.msk.bf16.mxu0 %vm442_vm1, %v1132_v16  ;;  %v1140_v8 = vor.u32 %v1139_v1, %v1136_v31  ;;  %v1156_v61 = vrot.slane %v1154_v44, 4  ;;  %v2992_v62 = vrot.slane %v7758_v27, 4  ;;  %v2993_v63 = vrot.slane %v7565_v17, 4  ;;  %7156 = vmatprep.subr.msk.bf16.mxu1 %vm644_vm0, %v7766_v4  ;;  %v7792_v16 = vld [vmem:[#allocation2 + $0x90] sm:$0xf0] }
 0x15d   : > { %v1148_v28 = vor.u32 %v1147_v45, %v1144_v43  ;;  %v1161_v10 = vrot.slane %v1159_v60, 3  ;;  %v1164_v42 = vrot.slane %v1162_v29, 4  ;;  %v2995_v0 = vrot.slane %v7770_v46, 4  ;;  %v1033_v45 = vld [vmem:[#allocation2 + $0x90] sm:$0xf8] }
 0x15e   : > { %v1157_v32 = vor.u32 %v1156_v61, %v1153_v56  ;;  %v2994_v52 = vsel %vm1369_vm4, %v2992_v62, %v2993_v63  ;;  %v2996_v5 = vrot.slane %v7591_v15, 4  ;;  %v1168_v6 = vshrl.u32 %v1029_v26, 16  ;;  %v1035_v63 = vld [vmem:[#allocation2 + $0xa0] sm:$0xf8] }
 0x15f   : > { %v1149_v7 = vsel %vm1047_vm5, %v1140_v8, %v1148_v28  ;;  %v1165_v14 = vor.u32 %v1164_v42, %v1161_v10  ;;  %v1171_v20 = vshll.u32 %v1029_v26, 16  ;;  %v1176_v17 = vshrl.u32 %v7573_v53, 16 }
 0x160   : > { %v2997_v21 = vsel %vm1369_vm4, %v2995_v0, %v2996_v5  ;;  %v1170_v48 = vrot.slane %v1168_v6, 3  ;;  %v1179_v22 = vshll.u32 %v7573_v53, 16  ;;  %v1185_v24 = vshrl.u32 %v1031_v3, 16 }
 0x161   : > { %6564 = vmatmul.mubr.msk.bf16.gmra.mrb[40].mxu0 %vm442_vm1, %v1149_v7  ;;  %v1166_v31 = vsel %vm1047_vm5, %v1157_v32, %v1165_v14  ;;  %v1173_v15 = vrot.slane %v1171_v20, 4  ;;  %v1178_v37 = vrot.slane %v1176_v17, 3  ;;  %v1188_v38 = vshll.u32 %v1031_v3, 16  ;;  %v7812_v14 = vld [vmem:[#allocation2 + $0xa0] sm:$0xf0] }
 0x162   : > { %6662 = vmatmul.mubr.msk.bf16.gmra.mrb[4].mxu1 %vm442_vm1, %v2988_v18  ;;  %6567 = vmatprep.mubr.msk.bf16.mxu0 %vm442_vm1, %v1166_v31  ;;  %v1181_v1 = vrot.slane %v1179_v22, 4  ;;  %v1187_v43 = vrot.slane %v1185_v24, 3  ;;  %v1193_v53 = vshrl.u32 %v7576_v59, 16  ;;  %v1196_v44 = vshll.u32 %v7576_v59, 16  ;;  %v7815_v22 = vld [vmem:[#allocation2 + $0xb0] sm:$0xf0] }
 0x163   : > { %6665 = vmatprep.mubr.msk.bf16.mxu1 %vm442_vm1, %v2991_v12  ;;  %v1174_v56 = vor.u32 %v1173_v15, %v1170_v48  ;;  %v1190_v60 = vrot.slane %v1188_v38, 4  ;;  %v2998_v29 = vrot.slane %v7788_v36, 4  ;;  %v2999_v26 = vrot.slane %v7599_v34, 4  ;;  %v1037_v38 = vld [vmem:[#allocation2 + $0xb0] sm:$0xf8] }
 0x164   : > { %v1182_v8 = vor.u32 %v1181_v1, %v1178_v37  ;;  %v1195_v61 = vrot.slane %v1193_v53, 3  ;;  %v1198_v18 = vrot.slane %v1196_v44, 4  ;;  %v3001_v62 = vrot.slane %v7792_v16, 4 }
 0x165   : > { %v1191_v28 = vor.u32 %v1190_v60, %v1187_v43  ;;  %v7803_v10 = vsel %vm1369_vm4, %v2998_v29, %v2999_v26  ;;  %v3002_v59 = vrot.slane %v7625_v33, 4  ;;  %v1202_v42 = vshrl.u32 %v1033_v45, 16  ;;  %v1039_v29 = vld [vmem:[#allocation2 + $0xc0] sm:$0xf8] }
 0x166   : > { %v1183_v12 = vsel %vm1047_vm5, %v1174_v56, %v1182_v8  ;;  %v1199_v0 = vor.u32 %v1198_v18, %v1195_v61  ;;  %v1205_v3 = vshll.u32 %v1033_v45, 16  ;;  %v1210_v32 = vshrl.u32 %v7606_v51, 16 }
 0x167   : > { %v7809_v34 = vsel %vm1369_vm4, %v3001_v62, %v3002_v59  ;;  %v1204_v5 = vrot.slane %v1202_v42, 3  ;;  %v1213_v6 = vshll.u32 %v7606_v51, 16  ;;  %v1219_v7 = vshrl.u32 %v1035_v63, 16  ;;  %v7836_v42 = vld [vmem:[#allocation2 + $0xc0] sm:$0xf0] }
 0x168   : > { %v1200_v20 = vsel %vm1047_vm5, %v1191_v28, %v1199_v0  ;;  %v1207_v17 = vrot.slane %v1205_v3, 4  ;;  %v1212_v33 = vrot.slane %v1210_v32, 3  ;;  %v1222_v48 = vshll.u32 %v1035_v63, 16  ;;  %v7839_v32 = vld [vmem:[#allocation2 + $0xd0] sm:$0xf0] }
 0x169   : > { %6568 = vmatmul.mubr.msk.bf16.gmra.mrb[44].mxu0 %vm442_vm1, %v1183_v12  ;;  %v1215_v24 = vrot.slane %v1213_v6, 4  ;;  %v1221_v31 = vrot.slane %v1219_v7, 3  ;;  %v1227_v15 = vshrl.u32 %v7610_v9, 16  ;;  %v1230_v37 = vshll.u32 %v7610_v9, 16 }
 0x16a   : > { %6666 = vmatmul.mubr.msk.bf16.gmra.mrb[8].mxu1 %vm442_vm1, %v2994_v52  ;;  %6571 = vmatprep.mubr.msk.bf16.mxu0 %vm442_vm1, %v1200_v20  ;;  %v1208_v51 = vor.u32 %v1207_v17, %v1204_v5  ;;  %v1224_v1 = vrot.slane %v1222_v48, 4  ;;  %v3004_v43 = vrot.slane %v7812_v14, 4  ;;  %v3005_v53 = vrot.slane %v7632_v19, 4  ;;  %v1041_v17 = vld [vmem:[#allocation2 + $0xd0] sm:$0xf8] }
 0x16b   : > { %6669 = vmatprep.mubr.msk.bf16.mxu1 %vm442_vm1, %v2997_v21  ;;  %v1216_v44 = vor.u32 %v1215_v24, %v1212_v33  ;;  %v1229_v45 = vrot.slane %v1227_v15, 3  ;;  %v1232_v56 = vrot.slane %v1230_v37, 4  ;;  %v3007_v60 = vrot.slane %v7815_v22, 4 }
 0x16c   : > { %v1225_v9 = vor.u32 %v1224_v1, %v1221_v31  ;;  %v7827_v26 = vsel %vm1369_vm4, %v3004_v43, %v3005_v53  ;;  %v3008_v52 = vrot.slane %v7646_v23, 4  ;;  %v1236_v8 = vshrl.u32 %v1037_v38, 16 }
 0x16d   : > { %v1217_v61 = vsel %vm1047_vm5, %v1208_v51, %v1216_v44  ;;  %v1233_v18 = vor.u32 %v1232_v56, %v1229_v45  ;;  %v1239_v62 = vshll.u32 %v1037_v38, 16  ;;  %v1244_v19 = vshrl.u32 %v7639_v57, 16 }
 0x16e   : > { %v7833_v21 = vsel %vm1369_vm4, %v3007_v60, %v3008_v52  ;;  %v1238_v63 = vrot.slane %v1236_v8, 3  ;;  %v1247_v28 = vshll.u32 %v7639_v57, 16  ;;  %v1253_v59 = vshrl.u32 %v1039_v29, 16 }
 0x16f   : > { %v1234_v12 = vsel %vm1047_vm5, %v1225_v9, %v1233_v18  ;;  %v1241_v0 = vrot.slane %v1239_v62, 4  ;;  %v1246_v23 = vrot.slane %v1244_v19, 3  ;;  %v1256_v3 = vshll.u32 %v1039_v29, 16  ;;  %v7862_v9 = vld [vmem:[#allocation2 + $0xe0] sm:$0xf0] }
 0x170   : > { %v1249_v5 = vrot.slane %v1247_v28, 4  ;;  %v1255_v6 = vrot.slane %v1253_v59, 3  ;;  %v1261_v7 = vshrl.u32 %v7641_v58, 16  ;;  %v1264_v20 = vshll.u32 %v7641_v58, 16  ;;  %v1043_v58 = vld [vmem:[#allocation2 + $0xe0] sm:$0xf8] }
 0x171   : > { %6572 = vmatmul.mubr.msk.bf16.gmra.mrb[48].mxu0 %vm442_vm1, %v1217_v61  ;;  %v1242_v57 = vor.u32 %v1241_v0, %v1238_v63  ;;  %v1258_v33 = vrot.slane %v1256_v3, 4  ;;  %v3010_v48 = vrot.slane %v7836_v42, 4  ;;  %v3011_v24 = vrot.slane %v7653_v41, 4  ;;  %v7865_v18 = vld [vmem:[#allocation2 + $0xf0] sm:$0xf0] }
 0x172   : > { %6670 = vmatmul.mubr.msk.bf16.gmra.mrb[12].mxu1 %vm442_vm1, %v7803_v10  ;;  %6575 = vmatprep.mubr.msk.bf16.mxu0 %vm442_vm1, %v1234_v12  ;;  %v1250_v31 = vor.u32 %v1249_v5, %v1246_v23  ;;  %v1263_v15 = vrot.slane %v1261_v7, 3  ;;  %v1266_v37 = vrot.slane %v1264_v20, 4  ;;  %v3013_v38 = vrot.slane %v7839_v32, 4  ;;  %v1045_v59 = vld [vmem:[#allocation2 + $0xf0] sm:$0xf8] }
 0x173   : > { %6673 = vmatprep.mubr.msk.bf16.mxu1 %vm442_vm1, %v7809_v34  ;;  %v1259_v51 = vor.u32 %v1258_v33, %v1255_v6  ;;  %v7853_v1 = vsel %vm1369_vm4, %v3010_v48, %v3011_v24  ;;  %v3014_v41 = vrot.slane %v7677_v2, 4  ;;  %v1270_v43 = vshrl.u32 %v1041_v17, 16 }
 0x174   : > { %v1251_v10 = vsel %vm1047_vm5, %v1242_v57, %v1250_v31  ;;  %v1267_v53 = vor.u32 %v1266_v37, %v1263_v15  ;;  %v1273_v44 = vshll.u32 %v1041_v17, 16  ;;  %v1278_v45 = vshrl.u32 %v7662_v49, 16 }
 0x175   : > { %v7859_v56 = vsel %vm1369_vm4, %v3013_v38, %v3014_v41  ;;  %v1272_v60 = vrot.slane %v1270_v43, 3  ;;  %v1281_v29 = vshll.u32 %v7662_v49, 16  ;;  %v1287_v34 = vshrl.u32 %v1043_v58, 16  ;;  %v3271_v38 = vld [vmem:[#allocation2 + $0x18] sm:$0x1f] }
 0x176   : > { %v1268_v52 = vsel %vm1047_vm5, %v1259_v51, %v1267_v53  ;;  %v1275_v8 = vrot.slane %v1273_v44, 4  ;;  %v1280_v2 = vrot.slane %v1278_v45, 3  ;;  %v1290_v61 = vshll.u32 %v1043_v58, 16 }
 0x177   : > { %v1283_v62 = vrot.slane %v1281_v29, 4  ;;  %v1289_v19 = vrot.slane %v1287_v34, 3  ;;  %v1295_v63 = vshrl.u32 %v7664_v25, 16  ;;  %v1298_v28 = vshll.u32 %v7664_v25, 16  ;;  %v1844_v29 = vld [vmem:[#allocation2 + $0x8] sm:$0x1f] }
 0x178   : > { %v1276_v12 = vor.u32 %v1275_v8, %v1272_v60  ;;  %v1292_v0 = vrot.slane %v1290_v61, 4  ;;  %v3016_v49 = vrot.slane %v7862_v9, 4  ;;  %v3017_v23 = vrot.slane %v7684_v39, 4  ;;  %v7880_v39 = vld [vmem:[#allocation2 + $0x100] sm:$0xf0] }
 0x179   : > { %6576 = vmatmul.mubr.msk.bf16.gmra.mrb[52].mxu0 %vm442_vm1, %v1251_v10  ;;  %v1284_v3 = vor.u32 %v1283_v62, %v1280_v2  ;;  %v1297_v5 = vrot.slane %v1295_v63, 3  ;;  %v1300_v6 = vrot.slane %v1298_v28, 4  ;;  %v3019_v7 = vrot.slane %v7865_v18, 4  ;;  %v1845_v28 = vld [vmem:[#allocation2 + $0x18] sm:$0x1f] }
 0x17a   : > { %6674 = vmatmul.mubr.msk.bf16.gmra.mrb[16].mxu1 %vm442_vm1, %v7827_v26  ;;  %6579 = vmatprep.mubr.msk.bf16.mxu0 %vm442_vm1, %v1268_v52  ;;  %v1293_v25 = vor.u32 %v1292_v0, %v1289_v19  ;;  %v7877_v20 = vsel %vm1369_vm4, %v3016_v49, %v3017_v23  ;;  %v3020_v17 = vrot.slane %v7697_v11, 4  ;;  %v1304_v57 = vshrl.u32 %v1045_v59, 16 }
 0x17b   : > { %6677 = vmatprep.mubr.msk.bf16.mxu1 %vm442_vm1, %v7833_v21  ;;  %v1285_v33 = vsel %vm1047_vm5, %v1276_v12, %v1284_v3  ;;  %v1301_v48 = vor.u32 %v1300_v6, %v1297_v5  ;;  %v1307_v24 = vshll.u32 %v1045_v59, 16  ;;  %v1312_v26 = vshrl.u32 %v7690_v47, 16  ;;  %v7187_v3 = vld [vmem:[#allocation2 + $0x10] sm:$0xf0] }
 0x17c   : > { %v7887_v31 = vsel %vm1369_vm4, %v3019_v7, %v3020_v17  ;;  %v1306_v15 = vrot.slane %v1304_v57, 3  ;;  %v1315_v37 = vshll.u32 %v7690_v47, 16  ;;  %v2184_v11 = vsel %vm644_vm0, %v7674_v13, 0  ;;  %v7186_v13 = vld [vmem:[#allocation2] sm:$0xf0] }
 0x17d   : > { %v1302_v58 = vsel %vm1047_vm5, %v1293_v25, %v1301_v48  ;;  %v1309_v51 = vrot.slane %v1307_v24, 4  ;;  %v1314_v21 = vrot.slane %v1312_v26, 3  ;;  %6588 = vmatpush3.bf16.msra.mxu0 %v2184_v11  ;;  %v3022_v41 = vrot.slane %v7880_v39, 4 }
 0x17e   : > { %v1317_v43 = vrot.slane %v1315_v37, 4  ;;  %v3023_v10 = vrot.slane %v7701_v35, 4  ;;  %v3288_v53 = vshrl.u32 %v7708_v54, 16  ;;  %v3291_v44 = vshll.u32 %v7708_v54, 16 }
 0x17f   : > { %v1310_v45 = vor.u32 %v1309_v51, %v1306_v15  ;;  %v3296_v47 = vshrl.u32 %v3271_v38, 16  ;;  %v3299_v60 = vshll.u32 %v3271_v38, 16  ;;  %v1862_v34 = vshrl.u32 %v7186_v13, 16 }
 0x180   : > { %v1318_v52 = vor.u32 %v1317_v43, %v1314_v21  ;;  %v7898_v8 = vsel %vm1369_vm4, %v3022_v41, %v3023_v10  ;;  %v3290_v2 = vrot.slane %v3288_v53, 4  ;;  %v3293_v61 = vrot.slane %v3291_v44, 5  ;;  %v3272_v43 = vld [vmem:[#allocation2 + $0x28] sm:$0x1f] }
 0x181   : > { %6580 = vmatmul.mubr.msk.bf16.gmra.mrb[56].mxu0 %vm442_vm1, %v1285_v33  ;;  %v3298_v62 = vrot.slane %v3296_v47, 4  ;;  %v3301_v35 = vrot.slane %v3299_v60, 5  ;;  %v1864_v19 = vrot.slane %v1862_v34, 4  ;;  %v1865_v63 = vshll.u32 %v7186_v13, 16 }
 0x182   : > { %6678 = vmatmul.mubr.msk.bf16.gmra.mrb[20].mxu1 %vm442_vm1, %v7853_v1  ;;  %6583 = vmatprep.mubr.msk.bf16.mxu0 %vm442_vm1, %v1302_v58  ;;  %v1319_v54 = vsel %vm1047_vm5, %v1310_v45, %v1318_v52  ;;  %v3294_v59 = vor.u32 %v3293_v61, %v3290_v2  ;;  %v1870_v12 = vshrl.u32 %v1844_v29, 16  ;;  %v1873_v0 = vshll.u32 %v1844_v29, 16  ;;  %v1846_v1 = vld [vmem:[#allocation2 + $0x28] sm:$0x1f] }
 0x183   : > { %6681 = vmatprep.mubr.msk.bf16.mxu1 %vm442_vm1, %v7859_v56  ;;  %v3302_v49 = vor.u32 %v3301_v35, %v3298_v62  ;;  %v1867_v23 = vrot.slane %v1865_v63, 5  ;;  %v1879_v5 = vshrl.u32 %v7187_v3, 16  ;;  %v1882_v6 = vshll.u32 %v7187_v3, 16  ;;  %v7188_v56 = vld [vmem:[#allocation2 + $0x20] sm:$0xf0] }
 0x184   : > { %v1872_v7 = vrot.slane %v1870_v12, 4  ;;  %v1875_v25 = vrot.slane %v1873_v0, 5  ;;  %v1887_v17 = vshrl.u32 %v1845_v28, 16  ;;  %v1890_v57 = vshll.u32 %v1845_v28, 16  ;;  %v3273_v62 = vld [vmem:[#allocation2 + $0x38] sm:$0x1f] }
 0x185   : > { %v7908_v33 = vsel %vm1860_vm6, %v3294_v59, %v3302_v49  ;;  %v1868_v48 = vor.u32 %v1867_v23, %v1864_v19  ;;  %v1881_v24 = vrot.slane %v1879_v5, 4  ;;  %v1884_v26 = vrot.slane %v1882_v6, 5  ;;  %v1847_v12 = vld [vmem:[#allocation2 + $0x38] sm:$0x1f] }
 0x186   : > { %v1876_v15 = vor.u32 %v1875_v25, %v1872_v7  ;;  %v1889_v37 = vrot.slane %v1887_v17, 4  ;;  %v1892_v11 = vrot.slane %v1890_v57, 5  ;;  %v1896_v38 = vshrl.u32 %v7188_v56, 16  ;;  %v7189_v7 = vld [vmem:[#allocation2 + $0x30] sm:$0xf0] }
 0x187   : > { %v1885_v58 = vor.u32 %v1884_v26, %v1881_v24  ;;  %v1899_v51 = vshll.u32 %v7188_v56, 16  ;;  %v1904_v21 = vshrl.u32 %v1846_v1, 16  ;;  %v1907_v41 = vshll.u32 %v1846_v1, 16 }
 0x188   : > { %v1877_v10 = vsel %vm1860_vm6, %v1868_v48, %v1876_v15  ;;  %v1893_v53 = vor.u32 %v1892_v11, %v1889_v37  ;;  %v1898_v44 = vrot.slane %v1896_v38, 4  ;;  %v3305_v45 = vshrl.u32 %v7724_v50, 16  ;;  %v1848_v48 = vld [vmem:[#allocation2 + $0x48] sm:$0x1f]  ;;  %v7190_v38 = vld [vmem:[#allocation2 + $0x40] sm:$0xf0] }
 0x189   : > { %6584 = vmatmul.mubr.msk.bf16.gmra.mrb[60].mxu0 %vm442_vm1, %v1319_v54  ;;  %v1901_v47 = vrot.slane %v1899_v51, 5  ;;  %v1906_v60 = vrot.slane %v1904_v21, 4  ;;  %v1909_v29 = vrot.slane %v1907_v41, 5  ;;  %v3308_v13 = vshll.u32 %v7724_v50, 16 }
 0x18a   : > { %6682 = vmatmul.mubr.msk.bf16.gmra.mrb[24].mxu1 %vm442_vm1, %v7877_v20  ;;  %6589 = vmatprep.mubr.msk.bf16.mxu0 %vm442_vm1, %v1877_v10  ;;  %v1894_v34 = vsel %vm1860_vm6, %v1885_v58, %v1893_v53  ;;  %v3307_v52 = vrot.slane %v3305_v45, 4  ;;  %v3313_v2 = vshrl.u32 %v3272_v43, 16  ;;  %v3316_v61 = vshll.u32 %v3272_v43, 16  ;;  %v3274_v10 = vld [vmem:[#allocation2 + $0x48] sm:$0x1f] }
 0x18b   : > { %6685 = vmatprep.mubr.msk.bf16.mxu1 %vm442_vm1, %v7887_v31  ;;  %v1902_v35 = vor.u32 %v1901_v47, %v1898_v44  ;;  %v1910_v19 = vor.u32 %v1909_v29, %v1906_v60  ;;  %v3310_v63 = vrot.slane %v3308_v13, 5  ;;  %v7922_v50 = vsel %vm644_vm0, %v7766_v4, 0 }
 0x18c   : > { %v3315_v28 = vrot.slane %v3313_v2, 4  ;;  %v3318_v20 = vrot.slane %v3316_v61, 5  ;;  %v3322_v54 = vshrl.u32 %v7726_v55, 16  ;;  %v3325_v59 = vshll.u32 %v7726_v55, 16 }
 0x18d   : > { %v1911_v0 = vsel %vm1860_vm6, %v1902_v35, %v1910_v19  ;;  %v3311_v49 = vor.u32 %v3310_v63, %v3307_v52  ;;  %v3330_v23 = vshrl.u32 %v3273_v62, 16  ;;  %v3333_v3 = vshll.u32 %v3273_v62, 16  ;;  %v3275_v62 = vld [vmem:[#allocation2 + $0x58] sm:$0x1f] }
 0x18e   : > { %v3319_v31 = vor.u32 %v3318_v20, %v3315_v28  ;;  %v3324_v5 = vrot.slane %v3322_v54, 4  ;;  %v3327_v6 = vrot.slane %v3325_v59, 5  ;;  %v1913_v25 = vshrl.u32 %v7189_v7, 16 }
 0x18f   : > { %v3332_v17 = vrot.slane %v3330_v23, 4  ;;  %v3335_v4 = vrot.slane %v3333_v3, 5  ;;  %v1916_v57 = vshll.u32 %v7189_v7, 16  ;;  %v1921_v1 = vshrl.u32 %v1847_v12, 16 }
 0x190   : > { %v3320_v24 = vsel %vm1860_vm6, %v3311_v49, %v3319_v31  ;;  %v3328_v26 = vor.u32 %v3327_v6, %v3324_v5  ;;  %v1915_v55 = vrot.slane %v1913_v25, 4  ;;  %v1924_v15 = vshll.u32 %v1847_v12, 16  ;;  %v1849_v12 = vld [vmem:[#allocation2 + $0x58] sm:$0x1f]  ;;  %v7191_v6 = vld [vmem:[#allocation2 + $0x50] sm:$0xf0] }
 0x191   : > { %6590 = vmatmul.mubr.msk.bf16.vlgmr.msra.gmra.mrb[32].mxu0 %vm442_vm1, %v1894_v34  ;;  %v3336_v37 = vor.u32 %v3335_v4, %v3332_v17  ;;  %v1918_v11 = vrot.slane %v1916_v57, 5  ;;  %v1923_v56 = vrot.slane %v1921_v1, 4  ;;  %v1930_v58 = vshrl.u32 %v7190_v38, 16  ;;  %v7945_v25 = vld [vmem:[%s8816_s2 + $0xe] sm:$0x3] }
 0x192   : > { %6686 = vmatmul.mubr.msk.bf16.gmra.mrb[28].mxu1 %vm442_vm1, %v7898_v8  ;;  %6593 = vmatprep.mubr.msk.bf16.mxu0 %vm442_vm1, %v1911_v0  ;;  %v1926_v51 = vrot.slane %v1924_v15, 5  ;;  %v1933_v21 = vshll.u32 %v7190_v38, 16  ;;  %v1938_v41 = vshrl.u32 %v1848_v48, 16  ;;  %v1941_v43 = vshll.u32 %v1848_v48, 16  ;;  %v1850_v1 = vld [vmem:[#allocation2 + $0x68] sm:$0x1f] }
 0x193   : > { %6691 = vmatprep.mubr.msk.bf16.mxu1 %vm442_vm1, %v7908_v33  ;;  %v3337_v53 = vsel %vm1860_vm6, %v3328_v26, %v3336_v37  ;;  %v1919_v44 = vor.u32 %v1918_v11, %v1915_v55  ;;  %v1932_v45 = vrot.slane %v1930_v58, 4  ;;  %v3339_v47 = vshrl.u32 %v7742_v40, 16 }
 0x194   : > { %v1927_v60 = vor.u32 %v1926_v51, %v1923_v56  ;;  %v1935_v29 = vrot.slane %v1933_v21, 5  ;;  %v1940_v13 = vrot.slane %v1938_v41, 4  ;;  %v1943_v8 = vrot.slane %v1941_v43, 5 }
 0x195   : > { %v3341_v34 = vrot.slane %v3339_v47, 4  ;;  %v3342_v52 = vshll.u32 %v7742_v40, 16  ;;  %v3347_v2 = vshrl.u32 %v3274_v10, 16  ;;  %v3350_v61 = vshll.u32 %v3274_v10, 16 }
 0x196   : > { %v1928_v35 = vsel %vm1860_vm6, %v1919_v44, %v1927_v60  ;;  %v1936_v19 = vor.u32 %v1935_v29, %v1932_v45  ;;  %v1944_v33 = vor.u32 %v1943_v8, %v1940_v13  ;;  %v3356_v63 = vshrl.u32 %v7746_v30, 16 }
 0x197   : > { %v3344_v28 = vrot.slane %v3342_v52, 5  ;;  %v3349_v20 = vrot.slane %v3347_v2, 4  ;;  %v3352_v54 = vrot.slane %v3350_v61, 5  ;;  %v3359_v59 = vshll.u32 %v7746_v30, 16  ;;  %v3277_v2 = vld [vmem:[#allocation2 + $0x78] sm:$0x1f] }
 0x198   : > { %v1945_v0 = vsel %vm1860_vm6, %v1936_v19, %v1944_v33  ;;  %v3358_v49 = vrot.slane %v3356_v63, 4  ;;  %v3364_v23 = vshrl.u32 %v3275_v62, 16  ;;  %v3367_v40 = vshll.u32 %v3275_v62, 16 }
 0x199   : > { %6594 = vmatmul.mubr.msk.bf16.gmra.mrb[36].mxu0 %vm442_vm1, %v1928_v35  ;;  %v3345_v3 = vor.u32 %v3344_v28, %v3341_v34  ;;  %v3353_v31 = vor.u32 %v3352_v54, %v3349_v20  ;;  %v3361_v5 = vrot.slane %v3359_v59, 5  ;;  %v1947_v7 = vshrl.u32 %v7191_v6, 16  ;;  %v1851_v54 = vld [vmem:[#allocation2 + $0x78] sm:$0x1f] }
 0x19a   : > { %6692 = vmatmul.mubr.msk.bf16.vlgmr.msra.gmra.mrb[0].mxu1 %vm442_vm1, %v3320_v24  ;;  %6597 = vmatprep.mubr.msk.bf16.mxu0 %vm442_vm1, %v1945_v0  ;;  %v3366_v30 = vrot.slane %v3364_v23, 4  ;;  %v3369_v17 = vrot.slane %v3367_v40, 5  ;;  %v1950_v4 = vshll.u32 %v7191_v6, 16  ;;  %v1955_v57 = vshrl.u32 %v1849_v12, 16  ;;  %v7192_v24 = vld [vmem:[#allocation2 + $0x60] sm:$0xf0] }
 0x19b   : > { %6724 = vmatpush3.bf16.msra.mxu1 %v7922_v50  ;;  %6695 = vmatprep.mubr.msk.bf16.mxu1 %vm442_vm1, %v3337_v53  ;;  %v3354_v48 = vsel %vm1860_vm6, %v3345_v3, %v3353_v31  ;;  %v3362_v26 = vor.u32 %v3361_v5, %v3358_v49  ;;  %v1949_v55 = vrot.slane %v1947_v7, 4  ;;  %v1958_v15 = vshll.u32 %v1849_v12, 16  ;;  %v3276_v50 = vld [vmem:[#allocation2 + $0x68] sm:$0x1f]  ;;  %v7193_v3 = vld [vmem:[#allocation2 + $0x70] sm:$0xf0] }
 0x19c   : > { %v3370_v37 = vor.u32 %v3369_v17, %v3366_v30  ;;  %v1952_v11 = vrot.slane %v1950_v4, 5  ;;  %v1957_v56 = vrot.slane %v1955_v57, 4  ;;  %v1964_v38 = vshrl.u32 %v7192_v24, 16  ;;  %7157 = vmatprep.subr.msk.bf16.mxu1 %vm644_vm0, %v7945_v25 }
 0x19d   : > { %v1960_v58 = vrot.slane %v1958_v15, 5  ;;  %v1967_v51 = vshll.u32 %v7192_v24, 16  ;;  %v1972_v21 = vshrl.u32 %v1850_v1, 16  ;;  %v1975_v41 = vshll.u32 %v1850_v1, 16  ;;  %v7194_v15 = vld [vmem:[#allocation2 + $0x80] sm:$0xf0] }
 0x19e   : > { %v3371_v43 = vsel %vm1860_vm6, %v3362_v26, %v3370_v37  ;;  %v1953_v10 = vor.u32 %v1952_v11, %v1949_v55  ;;  %v1966_v53 = vrot.slane %v1964_v38, 4  ;;  %v3373_v44 = vshrl.u32 %v7758_v27, 16 }
 0x19f   : > { %v1961_v45 = vor.u32 %v1960_v58, %v1957_v56  ;;  %v1969_v47 = vrot.slane %v1967_v51, 5  ;;  %v1974_v60 = vrot.slane %v1972_v21, 4  ;;  %v1977_v29 = vrot.slane %v1975_v41, 5  ;;  %v3278_v58 = vld [vmem:[#allocation2 + $0x88] sm:$0x1f] }
 0x1a0   : > { %v3375_v13 = vrot.slane %v3373_v44, 4  ;;  %v3376_v8 = vshll.u32 %v7758_v27, 16  ;;  %v3381_v34 = vshrl.u32 %v3276_v50, 16  ;;  %v3384_v52 = vshll.u32 %v3276_v50, 16 }
 0x1a1   : > { %v1962_v61 = vsel %vm1860_vm6, %v1953_v10, %v1961_v45  ;;  %v1970_v62 = vor.u32 %v1969_v47, %v1966_v53  ;;  %v1978_v35 = vor.u32 %v1977_v29, %v1974_v60  ;;  %v3390_v19 = vshrl.u32 %v7770_v46, 16 }
 0x1a2   : > { %6696 = vmatmul.mubr.msk.bf16.gmra.mrb[4].mxu1 %vm442_vm1, %v3354_v48  ;;  %6598 = vmatmul.mubr.msk.bf16.gmra.mrb[40].mxu0 %vm442_vm1, %v1962_v61  ;;  %v3378_v33 = vrot.slane %v3376_v8, 5  ;;  %v3383_v63 = vrot.slane %v3381_v34, 4  ;;  %v3386_v28 = vrot.slane %v3384_v52, 5  ;;  %v3393_v20 = vshll.u32 %v7770_v46, 16  ;;  %v1852_v46 = vld [vmem:[#allocation2 + $0x88] sm:$0x1f] }
 0x1a3   : > { %6699 = vmatprep.mubr.msk.bf16.mxu1 %vm442_vm1, %v3371_v43  ;;  %v1979_v27 = vsel %vm1860_vm6, %v1970_v62, %v1978_v35  ;;  %v3392_v59 = vrot.slane %v3390_v19, 4  ;;  %v3398_v12 = vshrl.u32 %v3277_v2, 16  ;;  %v3401_v0 = vshll.u32 %v3277_v2, 16 }
 0x1a4   : > { %6601 = vmatprep.mubr.msk.bf16.mxu0 %vm442_vm1, %v1979_v27  ;;  %v3379_v49 = vor.u32 %v3378_v33, %v3375_v13  ;;  %v3387_v23 = vor.u32 %v3386_v28, %v3383_v63  ;;  %v3395_v40 = vrot.slane %v3393_v20, 5  ;;  %v1981_v31 = vshrl.u32 %v7193_v3, 16  ;;  %v3279_v13 = vld [vmem:[#allocation2 + $0x98] sm:$0x1f] }
 0x1a5   : > { %v3400_v5 = vrot.slane %v3398_v12, 4  ;;  %v3403_v6 = vrot.slane %v3401_v0, 5  ;;  %v1984_v7 = vshll.u32 %v7193_v3, 16  ;;  %v1989_v30 = vshrl.u32 %v1851_v54, 16  ;;  %v1853_v33 = vld [vmem:[#allocation2 + $0x98] sm:$0x1f] }
 0x1a6   : > { %v3388_v17 = vsel %vm1860_vm6, %v3379_v49, %v3387_v23  ;;  %v3396_v4 = vor.u32 %v3395_v40, %v3392_v59  ;;  %v1983_v57 = vrot.slane %v1981_v31, 4  ;;  %v1992_v1 = vshll.u32 %v1851_v54, 16  ;;  %v7195_v12 = vld [vmem:[#allocation2 + $0x90] sm:$0xf0]  ;;  %v1854_v31 = vld [vmem:[#allocation2 + $0xa8] sm:$0x1f] }
 0x1a7   : > { %v3404_v48 = vor.u32 %v3403_v6, %v3400_v5  ;;  %v1986_v26 = vrot.slane %v1984_v7, 5  ;;  %v1991_v55 = vrot.slane %v1989_v30, 4  ;;  %v1998_v37 = vshrl.u32 %v7194_v15, 16 }
 0x1a8   : > { %v1994_v11 = vrot.slane %v1992_v1, 5  ;;  %v2001_v56 = vshll.u32 %v7194_v15, 16  ;;  %v2006_v24 = vshrl.u32 %v1852_v46, 16  ;;  %v2009_v38 = vshll.u32 %v1852_v46, 16  ;;  %v3280_v15 = vld [vmem:[#allocation2 + $0xa8] sm:$0x1f] }
 0x1a9   : > { %v3405_v51 = vsel %vm1860_vm6, %v3396_v4, %v3404_v48  ;;  %v1987_v21 = vor.u32 %v1986_v26, %v1983_v57  ;;  %v2000_v41 = vrot.slane %v1998_v37, 4  ;;  %v3407_v50 = vshrl.u32 %v7788_v36, 16  ;;  %v7196_v4 = vld [vmem:[#allocation2 + $0xa0] sm:$0xf0] }
 0x1aa   : > { %6700 = vmatmul.mubr.msk.bf16.gmra.mrb[8].mxu1 %vm442_vm1, %v3388_v17  ;;  %v1995_v43 = vor.u32 %v1994_v11, %v1991_v55  ;;  %v2003_v10 = vrot.slane %v2001_v56, 5  ;;  %v2008_v53 = vrot.slane %v2006_v24, 4  ;;  %v2011_v44 = vrot.slane %v2009_v38, 5 }
 0x1ab   : > { %6703 = vmatprep.mubr.msk.bf16.mxu1 %vm442_vm1, %v3405_v51  ;;  %v3409_v45 = vrot.slane %v3407_v50, 4  ;;  %v3410_v47 = vshll.u32 %v7788_v36, 16  ;;  %v3415_v60 = vshrl.u32 %v3278_v58, 16  ;;  %v3418_v29 = vshll.u32 %v3278_v58, 16 }
 0x1ac   : > { %v1996_v8 = vsel %vm1860_vm6, %v1987_v21, %v1995_v43  ;;  %v2004_v34 = vor.u32 %v2003_v10, %v2000_v41  ;;  %v2012_v52 = vor.u32 %v2011_v44, %v2008_v53  ;;  %v3424_v2 = vshrl.u32 %v7792_v16, 16  ;;  %v3281_v53 = vld [vmem:[#allocation2 + $0xb8] sm:$0x1f] }
 0x1ad   : > { %6602 = vmatmul.mubr.msk.bf16.gmra.mrb[44].mxu0 %vm442_vm1, %v1996_v8  ;;  %v3412_v61 = vrot.slane %v3410_v47, 5  ;;  %v3417_v62 = vrot.slane %v3415_v60, 4  ;;  %v3420_v35 = vrot.slane %v3418_v29, 5  ;;  %v3427_v19 = vshll.u32 %v7792_v16, 16 }
 0x1ae   : > { %v2013_v63 = vsel %vm1860_vm6, %v2004_v34, %v2012_v52  ;;  %v3426_v36 = vrot.slane %v3424_v2, 4  ;;  %v3432_v28 = vshrl.u32 %v3279_v13, 16  ;;  %v3435_v20 = vshll.u32 %v3279_v13, 16  ;;  %v1855_v52 = vld [vmem:[#allocation2 + $0xb8] sm:$0x1f] }
 0x1af   : > { %6605 = vmatprep.mubr.msk.bf16.mxu0 %vm442_vm1, %v2013_v63  ;;  %v3413_v54 = vor.u32 %v3412_v61, %v3409_v45  ;;  %v3421_v27 = vor.u32 %v3420_v35, %v3417_v62  ;;  %v3429_v59 = vrot.slane %v3427_v19, 5  ;;  %v2015_v0 = vshrl.u32 %v7195_v12, 16  ;;  %v7197_v63 = vld [vmem:[#allocation2 + $0xb0] sm:$0xf0] }
 0x1b0   : > { %v3434_v49 = vrot.slane %v3432_v28, 4  ;;  %v3437_v23 = vrot.slane %v3435_v20, 5  ;;  %v2018_v40 = vshll.u32 %v7195_v12, 16  ;;  %v2023_v3 = vshrl.u32 %v1853_v33, 16 }
 0x1b1   : > { %v3422_v16 = vsel %vm1860_vm6, %v3413_v54, %v3421_v27  ;;  %v3430_v5 = vor.u32 %v3429_v59, %v3426_v36  ;;  %v2017_v6 = vrot.slane %v2015_v0, 4  ;;  %v2026_v7 = vshll.u32 %v1853_v33, 16  ;;  %v1856_v59 = vld [vmem:[#allocation2 + $0xc8] sm:$0x1f] }
 0x1b2   : > { %6704 = vmatmul.mubr.msk.bf16.gmra.mrb[12].mxu1 %vm442_vm1, %v3422_v16  ;;  %v3438_v30 = vor.u32 %v3437_v23, %v3434_v49  ;;  %v2020_v46 = vrot.slane %v2018_v40, 5  ;;  %v2025_v17 = vrot.slane %v2023_v3, 4  ;;  %v2032_v57 = vshrl.u32 %v7196_v4, 16 }
 0x1b3   : > { %v2028_v1 = vrot.slane %v2026_v7, 5  ;;  %v2035_v48 = vshll.u32 %v7196_v4, 16  ;;  %v2040_v26 = vshrl.u32 %v1854_v31, 16  ;;  %v2043_v55 = vshll.u32 %v1854_v31, 16  ;;  %v7198_v31 = vld [vmem:[#allocation2 + $0xc0] sm:$0xf0] }
 0x1b4   : > { %v3439_v37 = vsel %vm1860_vm6, %v3430_v5, %v3438_v30  ;;  %v2021_v11 = vor.u32 %v2020_v46, %v2017_v6  ;;  %v2034_v56 = vrot.slane %v2032_v57, 4  ;;  %v3441_v24 = vshrl.u32 %v7812_v14, 16  ;;  %v3282_v46 = vld [vmem:[#allocation2 + $0xc8] sm:$0x1f] }
 0x1b5   : > { %6707 = vmatprep.mubr.msk.bf16.mxu1 %vm442_vm1, %v3439_v37  ;;  %v2029_v38 = vor.u32 %v2028_v1, %v2025_v17  ;;  %v2037_v58 = vrot.slane %v2035_v48, 5  ;;  %v2042_v51 = vrot.slane %v2040_v26, 4  ;;  %v2045_v21 = vrot.slane %v2043_v55, 5 }
 0x1b6   : > { %v3443_v41 = vrot.slane %v3441_v24, 4  ;;  %v3444_v50 = vshll.u32 %v7812_v14, 16  ;;  %v3449_v43 = vshrl.u32 %v3280_v15, 16  ;;  %v3452_v10 = vshll.u32 %v3280_v15, 16 }
 0x1b7   : > { %v2030_v44 = vsel %vm1860_vm6, %v2021_v11, %v2029_v38  ;;  %v2038_v45 = vor.u32 %v2037_v58, %v2034_v56  ;;  %v2046_v47 = vor.u32 %v2045_v21, %v2042_v51  ;;  %v3458_v60 = vshrl.u32 %v7815_v22, 16  ;;  %v3283_v38 = vld [vmem:[#allocation2 + $0xd8] sm:$0x1f] }
 0x1b8   : > { %6606 = vmatmul.mubr.msk.bf16.gmra.mrb[48].mxu0 %vm442_vm1, %v2030_v44  ;;  %v3446_v29 = vrot.slane %v3444_v50, 5  ;;  %v3451_v13 = vrot.slane %v3449_v43, 4  ;;  %v3454_v8 = vrot.slane %v3452_v10, 5  ;;  %v3461_v34 = vshll.u32 %v7815_v22, 16  ;;  %v1857_v44 = vld [vmem:[#allocation2 + $0xd8] sm:$0x1f] }
 0x1b9   : > { %v2047_v2 = vsel %vm1860_vm6, %v2038_v45, %v2046_v47  ;;  %v3460_v14 = vrot.slane %v3458_v60, 4  ;;  %v3466_v61 = vshrl.u32 %v3281_v53, 16  ;;  %v3469_v62 = vshll.u32 %v3281_v53, 16 }
 0x1ba   : > { %6609 = vmatprep.mubr.msk.bf16.mxu0 %vm442_vm1, %v2047_v2  ;;  %v3447_v35 = vor.u32 %v3446_v29, %v3443_v41  ;;  %v3455_v19 = vor.u32 %v3454_v8, %v3451_v13  ;;  %v3463_v33 = vrot.slane %v3461_v34, 5  ;;  %v2049_v36 = vshrl.u32 %v7197_v63, 16  ;;  %v7199_v34 = vld [vmem:[#allocation2 + $0xd0] sm:$0xf0] }
 0x1bb   : > { %v3468_v28 = vrot.slane %v3466_v61, 4  ;;  %v3471_v20 = vrot.slane %v3469_v62, 5  ;;  %v2052_v54 = vshll.u32 %v7197_v63, 16  ;;  %v2057_v27 = vshrl.u32 %v1855_v52, 16 }
 0x1bc   : > { %v3456_v22 = vsel %vm1860_vm6, %v3447_v35, %v3455_v19  ;;  %v3464_v12 = vor.u32 %v3463_v33, %v3460_v14  ;;  %v2051_v0 = vrot.slane %v2049_v36, 4  ;;  %v2060_v49 = vshll.u32 %v1855_v52, 16  ;;  %v1858_v35 = vld [vmem:[#allocation2 + $0xe8] sm:$0x1f] }
 0x1bd   : > { %6708 = vmatmul.mubr.msk.bf16.gmra.mrb[16].mxu1 %vm442_vm1, %v3456_v22  ;;  %v3472_v23 = vor.u32 %v3471_v20, %v3468_v28  ;;  %v2054_v40 = vrot.slane %v2052_v54, 5  ;;  %v2059_v3 = vrot.slane %v2057_v27, 4  ;;  %v2066_v16 = vshrl.u32 %v7198_v31, 16  ;;  %v7200_v54 = vld [vmem:[#allocation2 + $0xe0] sm:$0xf0] }
 0x1be   : > { %v2062_v5 = vrot.slane %v2060_v49, 5  ;;  %v2069_v6 = vshll.u32 %v7198_v31, 16  ;;  %v2074_v7 = vshrl.u32 %v1856_v59, 16  ;;  %v2077_v30 = vshll.u32 %v1856_v59, 16  ;;  %v3284_v49 = vld [vmem:[#allocation2 + $0xe8] sm:$0x1f] }
 0x1bf   : > { %v3473_v17 = vsel %vm1860_vm6, %v3464_v12, %v3472_v23  ;;  %v2055_v4 = vor.u32 %v2054_v40, %v2051_v0  ;;  %v2068_v57 = vrot.slane %v2066_v16, 4  ;;  %v3475_v1 = vshrl.u32 %v7836_v42, 16 }
 0x1c0   : > { %6711 = vmatprep.mubr.msk.bf16.mxu1 %vm442_vm1, %v3473_v17  ;;  %v2063_v48 = vor.u32 %v2062_v5, %v2059_v3  ;;  %v2071_v26 = vrot.slane %v2069_v6, 5  ;;  %v2076_v55 = vrot.slane %v2074_v7, 4  ;;  %v2079_v15 = vrot.slane %v2077_v30, 5 }
 0x1c1   : > { %v3477_v37 = vrot.slane %v3475_v1, 4  ;;  %v3478_v11 = vshll.u32 %v7836_v42, 16  ;;  %v3483_v56 = vshrl.u32 %v3282_v46, 16  ;;  %v3486_v24 = vshll.u32 %v3282_v46, 16 }
 0x1c2   : > { %v2064_v58 = vsel %vm1860_vm6, %v2055_v4, %v2063_v48  ;;  %v2072_v51 = vor.u32 %v2071_v26, %v2068_v57  ;;  %v2080_v21 = vor.u32 %v2079_v15, %v2076_v55  ;;  %v3492_v41 = vshrl.u32 %v7839_v32, 16  ;;  %v3285_v57 = vld [vmem:[#allocation2 + $0xf8] sm:$0x1f] }
 0x1c3   : > { %6610 = vmatmul.mubr.msk.bf16.gmra.mrb[52].mxu0 %vm442_vm1, %v2064_v58  ;;  %v3480_v50 = vrot.slane %v3478_v11, 5  ;;  %v3485_v43 = vrot.slane %v3483_v56, 4  ;;  %v3488_v10 = vrot.slane %v3486_v24, 5  ;;  %v3495_v53 = vshll.u32 %v7839_v32, 16  ;;  %v1859_v24 = vld [vmem:[#allocation2 + $0xf8] sm:$0x1f] }
 0x1c4   : > { %v2081_v45 = vsel %vm1860_vm6, %v2072_v51, %v2080_v21  ;;  %v3494_v42 = vrot.slane %v3492_v41, 4  ;;  %v3500_v47 = vshrl.u32 %v3283_v38, 16  ;;  %v3503_v60 = vshll.u32 %v3283_v38, 16 }
 0x1c5   : > { %6613 = vmatprep.mubr.msk.bf16.mxu0 %vm442_vm1, %v2081_v45  ;;  %v3481_v29 = vor.u32 %v3480_v50, %v3477_v37  ;;  %v3489_v13 = vor.u32 %v3488_v10, %v3485_v43  ;;  %v3497_v8 = vrot.slane %v3495_v53, 5  ;;  %v2083_v52 = vshrl.u32 %v7199_v34, 16  ;;  %v7201_v43 = vld [vmem:[#allocation2 + $0xf0] sm:$0xf0] }
 0x1c6   : > { %v3502_v2 = vrot.slane %v3500_v47, 4  ;;  %v3505_v14 = vrot.slane %v3503_v60, 5  ;;  %v2086_v61 = vshll.u32 %v7199_v34, 16  ;;  %v2091_v62 = vshrl.u32 %v1857_v44, 16  ;;  %v3286_v47 = vld [vmem:[#allocation2 + $0x108] sm:$0x1f] }
 0x1c7   : > { %v3490_v32 = vsel %vm1860_vm6, %v3481_v29, %v3489_v13  ;;  %v3498_v19 = vor.u32 %v3497_v8, %v3494_v42  ;;  %v2085_v33 = vrot.slane %v2083_v52, 4  ;;  %v2094_v63 = vshll.u32 %v1857_v44, 16  ;;  %v3806_v8 = vld [vmem:[#allocation2 + $0x20] sm:$0xf8] }
 0x1c8   : > { %6712 = vmatmul.mubr.msk.bf16.gmra.mrb[20].mxu1 %vm442_vm1, %v3490_v32  ;;  %v3506_v36 = vor.u32 %v3505_v14, %v3502_v2  ;;  %v2088_v28 = vrot.slane %v2086_v61, 5  ;;  %v2093_v20 = vrot.slane %v2091_v62, 4  ;;  %v2100_v27 = vshrl.u32 %v7200_v54, 16 }
 0x1c9   : > { %v2096_v59 = vrot.slane %v2094_v63, 5  ;;  %v2103_v22 = vshll.u32 %v7200_v54, 16  ;;  %v2108_v12 = vshrl.u32 %v1858_v35, 16  ;;  %v2111_v0 = vshll.u32 %v1858_v35, 16 }
 0x1ca   : > { %v3507_v23 = vsel %vm1860_vm6, %v3498_v19, %v3506_v36  ;;  %v2089_v40 = vor.u32 %v2088_v28, %v2085_v33  ;;  %v2102_v3 = vrot.slane %v2100_v27, 4  ;;  %v3509_v31 = vshrl.u32 %v7862_v9, 16  ;;  %v8017_v19 = vld [vmem:[#allocation2 + $0x28] sm:$0xf] }
 0x1cb   : > { %6715 = vmatprep.mubr.msk.bf16.mxu1 %vm442_vm1, %v3507_v23  ;;  %v2097_v16 = vor.u32 %v2096_v59, %v2093_v20  ;;  %v2105_v5 = vrot.slane %v2103_v22, 5  ;;  %v2110_v6 = vrot.slane %v2108_v12, 4  ;;  %v2113_v7 = vrot.slane %v2111_v0, 5  ;;  %v3808_v20 = vld [vmem:[#allocation2 + $0x30] sm:$0xf8] }
 0x1cc   : > { %v3511_v30 = vrot.slane %v3509_v31, 4  ;;  %v3512_v46 = vshll.u32 %v7862_v9, 16  ;;  %v3517_v17 = vshrl.u32 %v3284_v49, 16  ;;  %v3520_v4 = vshll.u32 %v3284_v49, 16  ;;  %v8023_v23 = vld [vmem:[#allocation2 + $0x38] sm:$0xf] }
 0x1cd   : > { %v2098_v1 = vsel %vm1860_vm6, %v2089_v40, %v2097_v16  ;;  %v2106_v48 = vor.u32 %v2105_v5, %v2102_v3  ;;  %v2114_v26 = vor.u32 %v2113_v7, %v2110_v6  ;;  %v3526_v55 = vshrl.u32 %v7865_v18, 16 }
 0x1ce   : > { %6614 = vmatmul.mubr.msk.bf16.gmra.mrb[56].mxu0 %vm442_vm1, %v2098_v1  ;;  %v3514_v15 = vrot.slane %v3512_v46, 5  ;;  %v3519_v37 = vrot.slane %v3517_v17, 4  ;;  %v3522_v11 = vrot.slane %v3520_v4, 5  ;;  %v3529_v56 = vshll.u32 %v7865_v18, 16  ;;  %v3810_v46 = vld [vmem:[#allocation2 + $0x40] sm:$0xf8] }
 0x1cf   : > { %v2115_v38 = vsel %vm1860_vm6, %v2106_v48, %v2114_v26  ;;  %v3528_v9 = vrot.slane %v3526_v55, 4  ;;  %v3534_v58 = vshrl.u32 %v3285_v57, 16  ;;  %v3537_v51 = vshll.u32 %v3285_v57, 16  ;;  %v8030_v48 = vld [vmem:[#allocation2 + $0x48] sm:$0xf] }
 0x1d0   : > { %6617 = vmatprep.mubr.msk.bf16.mxu0 %vm442_vm1, %v2115_v38  ;;  %v3515_v21 = vor.u32 %v3514_v15, %v3511_v30  ;;  %v3523_v41 = vor.u32 %v3522_v11, %v3519_v37  ;;  %v3531_v50 = vrot.slane %v3529_v56, 5  ;;  %v2117_v10 = vshrl.u32 %v7201_v43, 16  ;;  %v3812_v11 = vld [vmem:[#allocation2 + $0x50] sm:$0xf8] }
 0x1d1   : > { %v3536_v53 = vrot.slane %v3534_v58, 4  ;;  %v3539_v44 = vrot.slane %v3537_v51, 5  ;;  %v2120_v45 = vshll.u32 %v7201_v43, 16  ;;  %v2125_v42 = vshrl.u32 %v1859_v24, 16  ;;  %v8035_v58 = vld [vmem:[#allocation2 + $0x58] sm:$0xf] }
 0x1d2   : > { %v3524_v18 = vsel %vm1860_vm6, %v3515_v21, %v3523_v41  ;;  %v3532_v60 = vor.u32 %v3531_v50, %v3528_v9  ;;  %v2119_v29 = vrot.slane %v2117_v10, 4  ;;  %v2128_v13 = vshll.u32 %v1859_v24, 16 }
 0x1d3   : > { %6716 = vmatmul.mubr.msk.bf16.gmra.mrb[24].mxu1 %vm442_vm1, %v3524_v18  ;;  %v3540_v34 = vor.u32 %v3539_v44, %v3536_v53  ;;  %v2122_v52 = vrot.slane %v2120_v45, 5  ;;  %v2127_v2 = vrot.slane %v2125_v42, 4  ;;  %v3543_v14 = vshrl.u32 %v7880_v39, 16  ;;  %v3814_v44 = vld [vmem:[#allocation2 + $0x60] sm:$0xf8] }
 0x1d4   : > { %v2130_v61 = vrot.slane %v2128_v13, 5  ;;  %v3546_v62 = vshll.u32 %v7880_v39, 16  ;;  %v3551_v35 = vshrl.u32 %v3286_v47, 16  ;;  %v3554_v32 = vshll.u32 %v3286_v47, 16 }
 0x1d5   : > { %v3541_v33 = vsel %vm1860_vm6, %v3532_v60, %v3540_v34  ;;  %v2123_v63 = vor.u32 %v2122_v52, %v2119_v29  ;;  %v3545_v36 = vrot.slane %v3543_v14, 4  ;;  %v3839_v28 = vshrl.u32 %v3806_v8, 16  ;;  %v8042_v60 = vld [vmem:[#allocation2 + $0x68] sm:$0xf]  ;;  %v3816_v52 = vld [vmem:[#allocation2 + $0x70] sm:$0xf8] }
 0x1d6   : > { %6719 = vmatprep.mubr.msk.bf16.mxu1 %vm442_vm1, %v3541_v33  ;;  %v2131_v54 = vor.u32 %v2130_v61, %v2127_v2  ;;  %v3548_v27 = vrot.slane %v3546_v62, 5  ;;  %v3553_v59 = vrot.slane %v3551_v35, 4  ;;  %v3556_v22 = vrot.slane %v3554_v32, 5  ;;  %v8046_v35 = vld [vmem:[#allocation2 + $0x78] sm:$0xf] }
 0x1d7   : > { %v3841_v12 = vrot.slane %v3839_v28, 3  ;;  %v3842_v0 = vshll.u32 %v3806_v8, 16  ;;  %v3847_v39 = vshrl.u32 %v8017_v19, 16  ;;  %v3850_v49 = vshll.u32 %v8017_v19, 16  ;;  %v8053_v28 = vld [vmem:[%s8816_s2 + $0x10] sm:$0x3] }
 0x1d8   : > { %v2132_v40 = vsel %vm1860_vm6, %v2123_v63, %v2131_v54  ;;  %v3549_v3 = vor.u32 %v3548_v27, %v3545_v36  ;;  %v3557_v31 = vor.u32 %v3556_v22, %v3553_v59  ;;  %v3856_v16 = vshrl.u32 %v3808_v20, 16 }
 0x1d9   : > { %6618 = vmatmul.mubr.msk.bf16.gmra.mrb[60].mxu0 %vm442_vm1, %v2132_v40  ;;  %v3844_v5 = vrot.slane %v3842_v0, 4  ;;  %v3849_v6 = vrot.slane %v3847_v39, 3  ;;  %v3852_v7 = vrot.slane %v3850_v49, 4  ;;  %v3859_v30 = vshll.u32 %v3808_v20, 16  ;;  %v3818_v0 = vld [vmem:[#allocation2 + $0x80] sm:$0xf8] }
 0x1da   : > { %v3558_v17 = vsel %vm1860_vm6, %v3549_v3, %v3557_v31  ;;  %v3858_v4 = vrot.slane %v3856_v16, 3  ;;  %v3864_v57 = vshrl.u32 %v8023_v23, 16  ;;  %v3867_v1 = vshll.u32 %v8023_v23, 16  ;;  %v8060_v3 = vld [vmem:[#allocation2 + $0x88] sm:$0xf] }
 0x1db   : > { %6720 = vmatmul.mubr.msk.bf16.gmra.mrb[28].mxu1 %vm442_vm1, %v3558_v17  ;;  %v3845_v26 = vor.u32 %v3844_v5, %v3841_v12  ;;  %v3853_v55 = vor.u32 %v3852_v7, %v3849_v6  ;;  %v3861_v15 = vrot.slane %v3859_v30, 4  ;;  %v4503_v37 = vsel %vm644_vm0, %v7945_v25, 0 }
 0x1dc   : > { %v3866_v56 = vrot.slane %v3864_v57, 3  ;;  %v3869_v24 = vrot.slane %v3867_v1, 4  ;;  %v3873_v38 = vshrl.u32 %v3810_v46, 16  ;;  %v3876_v9 = vshll.u32 %v3810_v46, 16 }
 0x1dd   : > { %v3854_v51 = vsel %vm1047_vm5, %v3845_v26, %v3853_v55  ;;  %v3862_v21 = vor.u32 %v3861_v15, %v3858_v4  ;;  %v3881_v41 = vshrl.u32 %v8030_v48, 16  ;;  %v3884_v50 = vshll.u32 %v8030_v48, 16 }
 0x1de   : > { %6725 = vmatprep.mubr.msk.bf16.mxu1 %vm442_vm1, %v3854_v51  ;;  %v3870_v43 = vor.u32 %v3869_v24, %v3866_v56  ;;  %v3875_v10 = vrot.slane %v3873_v38, 3  ;;  %v3878_v53 = vrot.slane %v3876_v9, 4  ;;  %v3890_v25 = vshrl.u32 %v3812_v11, 16  ;;  %v3822_v56 = vld [vmem:[#allocation2 + $0xa0] sm:$0xf8] }
 0x1df   : > { %v3883_v45 = vrot.slane %v3881_v41, 3  ;;  %v3886_v42 = vrot.slane %v3884_v50, 4  ;;  %v3893_v47 = vshll.u32 %v3812_v11, 16  ;;  %v3898_v18 = vshrl.u32 %v8035_v58, 16  ;;  %v8068_v11 = vld [vmem:[#allocation2 + $0x98] sm:$0xf] }
 0x1e0   : > { %v3871_v29 = vsel %vm1047_vm5, %v3862_v21, %v3870_v43  ;;  %v3879_v13 = vor.u32 %v3878_v53, %v3875_v10  ;;  %v3892_v8 = vrot.slane %v3890_v25, 3  ;;  %v3901_v34 = vshll.u32 %v8035_v58, 16  ;;  %v8071_v21 = vld [vmem:[#allocation2 + $0xa8] sm:$0xf] }
 0x1e1   : > { %v3887_v2 = vor.u32 %v3886_v42, %v3883_v45  ;;  %v3895_v14 = vrot.slane %v3893_v47, 4  ;;  %v3900_v61 = vrot.slane %v3898_v18, 3  ;;  %v3907_v62 = vshrl.u32 %v3814_v44, 16 }
 0x1e2   : > { %v3903_v32 = vrot.slane %v3901_v34, 4  ;;  %v3910_v33 = vshll.u32 %v3814_v44, 16  ;;  %v3915_v63 = vshrl.u32 %v8042_v60, 16  ;;  %v3918_v36 = vshll.u32 %v8042_v60, 16 }
 0x1e3   : > { %6726 = vmatmul.mubr.msk.bf16.vlgmr.msra.gmra.mrb[0].mxu1 %vm442_vm1, %v3871_v29  ;;  %v3888_v20 = vsel %vm1047_vm5, %v3879_v13, %v3887_v2  ;;  %v3909_v54 = vrot.slane %v3907_v62, 3  ;;  %v3924_v27 = vshrl.u32 %v3816_v52, 16  ;;  %v3927_v39 = vshll.u32 %v3816_v52, 16 }
 0x1e4   : > { %6758 = vmatpush3.bf16.msra.mxu1 %v4503_v37  ;;  %6729 = vmatprep.mubr.msk.bf16.mxu1 %vm442_vm1, %v3888_v20  ;;  %v3912_v59 = vrot.slane %v3910_v33, 4  ;;  %v3917_v22 = vrot.slane %v3915_v63, 3  ;;  %v3920_v12 = vrot.slane %v3918_v36, 4  ;;  %v3932_v49 = vshrl.u32 %v8046_v35, 16  ;;  %v3820_v37 = vld [vmem:[#allocation2 + $0x90] sm:$0xf8] }
 0x1e5   : > { %v3935_v40 = vshll.u32 %v8046_v35, 16  ;;  %7158 = vmatprep.subr.msk.bf16.mxu1 %vm644_vm0, %v8053_v28  ;;  %v3896_v31 = vor.u32 %v3895_v14, %v3892_v8  ;;  %v3904_v16 = vor.u32 %v3903_v32, %v3900_v61  ;;  %v3926_v7 = vrot.slane %v3924_v27, 3  ;;  %v3824_v8 = vld [vmem:[#allocation2 + $0xb0] sm:$0xf8]  ;;  %v8079_v61 = vld [vmem:[#allocation2 + $0xb8] sm:$0xf] }
 0x1e6   : > { %v3913_v5 = vor.u32 %v3912_v59, %v3909_v54  ;;  %v3921_v6 = vor.u32 %v3920_v12, %v3917_v22  ;;  %v3929_v30 = vrot.slane %v3927_v39, 4  ;;  %v3941_v46 = vshrl.u32 %v3818_v0, 16  ;;  %v3826_v20 = vld [vmem:[#allocation2 + $0xc0] sm:$0xf8]  ;;  %v8086_v12 = vld [vmem:[#allocation2 + $0xc8] sm:$0xf] }
 0x1e7   : > { %v3944_v17 = vshll.u32 %v3818_v0, 16  ;;  %v3934_v4 = vrot.slane %v3932_v49, 3  ;;  %v3937_v57 = vrot.slane %v3935_v40, 4  ;;  %v3949_v1 = vshrl.u32 %v8060_v3, 16 }
 0x1e8   : > { %v3952_v26 = vshll.u32 %v8060_v3, 16  ;;  %v3905_v55 = vsel %vm1047_vm5, %v3896_v31, %v3904_v16  ;;  %v3922_v15 = vsel %vm1047_vm5, %v3913_v5, %v3921_v6  ;;  %v3943_v24 = vrot.slane %v3941_v46, 3 }
 0x1e9   : > { %v3946_v38 = vrot.slane %v3944_v17, 4  ;;  %v3951_v9 = vrot.slane %v3949_v1, 3  ;;  %v3930_v41 = vor.u32 %v3929_v30, %v3926_v7  ;;  %v3938_v50 = vor.u32 %v3937_v57, %v3934_v4  ;;  %v3828_v1 = vld [vmem:[#allocation2 + $0xd0] sm:$0xf8] }
 0x1ea   : > { %v3954_v51 = vrot.slane %v3952_v26, 4  ;;  %v3958_v43 = vshrl.u32 %v3820_v37, 16  ;;  %v3961_v10 = vshll.u32 %v3820_v37, 16  ;;  %v3966_v53 = vshrl.u32 %v8068_v11, 16  ;;  %v8092_v26 = vld [vmem:[#allocation2 + $0xd8] sm:$0xf] }
 0x1eb   : > { %6730 = vmatmul.mubr.msk.bf16.gmra.mrb[4].mxu1 %vm442_vm1, %v3905_v55  ;;  %v3969_v25 = vshll.u32 %v8068_v11, 16  ;;  %v3975_v44 = vshrl.u32 %v3822_v56, 16  ;;  %v3978_v45 = vshll.u32 %v3822_v56, 16  ;;  %v3983_v42 = vshrl.u32 %v8071_v21, 16  ;;  %v3830_v55 = vld [vmem:[#allocation2 + $0xe0] sm:$0xf8] }
 0x1ec   : > { %6733 = vmatprep.mubr.msk.bf16.mxu1 %vm442_vm1, %v3922_v15  ;;  %v3986_v47 = vshll.u32 %v8071_v21, 16  ;;  %v3947_v18 = vor.u32 %v3946_v38, %v3943_v24  ;;  %v3955_v29 = vor.u32 %v3954_v51, %v3951_v9  ;;  %v3939_v13 = vsel %vm1047_vm5, %v3930_v41, %v3938_v50  ;;  %v8095_v38 = vld [vmem:[#allocation2 + $0xe8] sm:$0xf] }
 0x1ed   : > { %v3960_v34 = vrot.slane %v3958_v43, 3  ;;  %v3963_v52 = vrot.slane %v3961_v10, 4  ;;  %v3968_v2 = vrot.slane %v3966_v53, 3  ;;  %v3971_v14 = vrot.slane %v3969_v25, 4 }
 0x1ee   : > { %v3977_v62 = vrot.slane %v3975_v44, 3  ;;  %v3980_v32 = vrot.slane %v3978_v45, 4  ;;  %v3985_v33 = vrot.slane %v3983_v42, 3  ;;  %v3988_v63 = vrot.slane %v3986_v47, 4 }
 0x1ef   : > { %v3956_v36 = vsel %vm1047_vm5, %v3947_v18, %v3955_v29  ;;  %v3992_v54 = vshrl.u32 %v3824_v8, 16  ;;  %v3995_v27 = vshll.u32 %v3824_v8, 16  ;;  %v4000_v59 = vshrl.u32 %v8079_v61, 16 }
 0x1f0   : > { %v4003_v22 = vshll.u32 %v8079_v61, 16  ;;  %v3964_v0 = vor.u32 %v3963_v52, %v3960_v34  ;;  %v3972_v39 = vor.u32 %v3971_v14, %v3968_v2  ;;  %v3981_v49 = vor.u32 %v3980_v32, %v3977_v62  ;;  %v3832_v32 = vld [vmem:[#allocation2 + $0xf0] sm:$0xf8] }
 0x1f1   : > { %v3989_v40 = vor.u32 %v3988_v63, %v3985_v33  ;;  %v4009_v31 = vshrl.u32 %v3826_v20, 16  ;;  %v4012_v16 = vshll.u32 %v3826_v20, 16  ;;  %v4017_v5 = vshrl.u32 %v8086_v12, 16  ;;  %v8105_v63 = vld [vmem:[#allocation2 + $0xf8] sm:$0xf] }
 0x1f2   : > { %v4020_v6 = vshll.u32 %v8086_v12, 16  ;;  %v3994_v7 = vrot.slane %v3992_v54, 3  ;;  %v3997_v30 = vrot.slane %v3995_v27, 4  ;;  %v4002_v46 = vrot.slane %v4000_v59, 3  ;;  %v8108_v20 = vld [vmem:[#allocation2 + $0x108] sm:$0xf] }
 0x1f3   : > { %6734 = vmatmul.mubr.msk.bf16.gmra.mrb[8].mxu1 %vm442_vm1, %v3939_v13  ;;  %v4005_v17 = vrot.slane %v4003_v22, 4  ;;  %v3973_v4 = vsel %vm1047_vm5, %v3964_v0, %v3972_v39  ;;  %v3990_v57 = vsel %vm1047_vm5, %v3981_v49, %v3989_v40  ;;  %v4011_v15 = vrot.slane %v4009_v31, 3 }
 0x1f4   : > { %6737 = vmatprep.mubr.msk.bf16.mxu1 %vm442_vm1, %v3956_v36  ;;  %v4014_v37 = vrot.slane %v4012_v16, 4  ;;  %v4019_v56 = vrot.slane %v4017_v5, 3  ;;  %v4022_v24 = vrot.slane %v4020_v6, 4  ;;  %v3998_v9 = vor.u32 %v3997_v30, %v3994_v7  ;;  %v3834_v36 = vld [vmem:[#allocation2 + $0x100] sm:$0xf8] }
 0x1f5   : > { %v4006_v51 = vor.u32 %v4005_v17, %v4002_v46  ;;  %v4026_v41 = vshrl.u32 %v3828_v1, 16  ;;  %v4029_v50 = vshll.u32 %v3828_v1, 16  ;;  %v4034_v43 = vshrl.u32 %v8092_v26, 16  ;;  %v3836_v46 = vld [vmem:[#allocation2 + $0x110] sm:$0xf8] }
 0x1f6   : > { %v4037_v10 = vshll.u32 %v8092_v26, 16  ;;  %v4043_v53 = vshrl.u32 %v3830_v55, 16  ;;  %v4046_v25 = vshll.u32 %v3830_v55, 16  ;;  %v4051_v44 = vshrl.u32 %v8095_v38, 16  ;;  %v8115_v17 = vld [vmem:[#allocation2 + $0x118] sm:$0xf] }
 0x1f7   : > { %v4054_v45 = vshll.u32 %v8095_v38, 16  ;;  %v4015_v42 = vor.u32 %v4014_v37, %v4011_v15  ;;  %v4023_v47 = vor.u32 %v4022_v24, %v4019_v56  ;;  %v4007_v18 = vsel %vm1047_vm5, %v3998_v9, %v4006_v51 }
 0x1f8   : > { %v4028_v29 = vrot.slane %v4026_v41, 3  ;;  %v4031_v13 = vrot.slane %v4029_v50, 4  ;;  %v4036_v8 = vrot.slane %v4034_v43, 3  ;;  %v4039_v34 = vrot.slane %v4037_v10, 4 }
 0x1f9   : > { %v4045_v52 = vrot.slane %v4043_v53, 3  ;;  %v4048_v2 = vrot.slane %v4046_v25, 4  ;;  %v4053_v14 = vrot.slane %v4051_v44, 3  ;;  %v4056_v62 = vrot.slane %v4054_v45, 4 }
 0x1fa   : > { %v4024_v33 = vsel %vm1047_vm5, %v4015_v42, %v4023_v47  ;;  %v4032_v54 = vor.u32 %v4031_v13, %v4028_v29  ;;  %v4040_v27 = vor.u32 %v4039_v34, %v4036_v8  ;;  %v4060_v59 = vshrl.u32 %v3832_v32, 16  ;;  %v8126_v34 = vld [vmem:[#allocation2 + $0x20] sm:$0xf0] }
 0x1fb   : > { %6738 = vmatmul.mubr.msk.bf16.gmra.mrb[12].mxu1 %vm442_vm1, %v3973_v4  ;;  %v4063_v22 = vshll.u32 %v3832_v32, 16  ;;  %v4049_v0 = vor.u32 %v4048_v2, %v4045_v52  ;;  %v4057_v39 = vor.u32 %v4056_v62, %v4053_v14  ;;  %v4068_v49 = vshrl.u32 %v8105_v63, 16  ;;  %v8133_v32 = vld [vmem:[#allocation2 + $0x30] sm:$0xf0] }
 0x1fc   : > { %6741 = vmatprep.mubr.msk.bf16.mxu1 %vm442_vm1, %v3990_v57  ;;  %v4071_v40 = vshll.u32 %v8105_v63, 16  ;;  %v4077_v31 = vshrl.u32 %v3834_v36, 16  ;;  %v4080_v16 = vshll.u32 %v3834_v36, 16  ;;  %v4085_v5 = vshrl.u32 %v8108_v20, 16 }
 0x1fd   : > { %v4088_v6 = vshll.u32 %v8108_v20, 16  ;;  %v4041_v7 = vsel %vm1047_vm5, %v4032_v54, %v4040_v27  ;;  %v4062_v30 = vrot.slane %v4060_v59, 3  ;;  %v4058_v4 = vsel %vm1047_vm5, %v4049_v0, %v4057_v39  ;;  %v8147_v39 = vld [vmem:[#allocation2 + $0x50] sm:$0xf0] }
 0x1fe   : > { %v4065_v57 = vrot.slane %v4063_v22, 4  ;;  %v4070_v1 = vrot.slane %v4068_v49, 3  ;;  %v4073_v55 = vrot.slane %v4071_v40, 4  ;;  %v4079_v15 = vrot.slane %v4077_v31, 3  ;;  %v8150_v49 = vld [vmem:[#allocation2 + $0x60] sm:$0xf0] }
 0x1ff   : > { %v4082_v37 = vrot.slane %v4080_v16, 4  ;;  %v4087_v56 = vrot.slane %v4085_v5, 3  ;;  %v4090_v24 = vrot.slane %v4088_v6, 4  ;;  %v4094_v9 = vshrl.u32 %v3836_v46, 16  ;;  %v8159_v5 = vld [vmem:[#allocation2 + $0x70] sm:$0xf0] }
 0x200   : > { %v4097_v51 = vshll.u32 %v3836_v46, 16  ;;  %v4102_v41 = vshrl.u32 %v8115_v17, 16  ;;  %v4105_v50 = vshll.u32 %v8115_v17, 16  ;;  %v4066_v43 = vor.u32 %v4065_v57, %v4062_v30  ;;  %v8162_v6 = vld [vmem:[#allocation2 + $0x80] sm:$0xf0] }
 0x201   : > { %v4074_v10 = vor.u32 %v4073_v55, %v4070_v1  ;;  %v4083_v53 = vor.u32 %v4082_v37, %v4079_v15  ;;  %v4091_v25 = vor.u32 %v4090_v24, %v4087_v56  ;;  %v4096_v44 = vrot.slane %v4094_v9, 3  ;;  %v5358_v46 = vld [vmem:[%s8817_s3] sm:$0x3]  ;;  %v8175_v1 = vld [vmem:[#allocation2 + $0x90] sm:$0xf0] }
 0x202   : > { %v4099_v45 = vrot.slane %v4097_v51, 4  ;;  %v4104_v42 = vrot.slane %v4102_v41, 3  ;;  %v4107_v47 = vrot.slane %v4105_v50, 4  ;;  %v4404_v52 = vrot.slane %v8126_v34, 4  ;;  %7159 = vmatprep.subr.msk.bf16.mxu0 %vm644_vm0, %v5358_v46  ;;  %v8188_v51 = vld [vmem:[#allocation2 + $0xb0] sm:$0xf0] }
 0x203   : > { %6742 = vmatmul.mubr.msk.bf16.gmra.mrb[16].mxu1 %vm442_vm1, %v4007_v18  ;;  %v4075_v18 = vsel %vm1047_vm5, %v4066_v43, %v4074_v10  ;;  %v4092_v29 = vsel %vm1047_vm5, %v4083_v53, %v4091_v25  ;;  %v4405_v2 = vrot.slane %v8017_v19, 4  ;;  %v4407_v36 = vrot.slane %v8133_v32, 4  ;;  %v8191_v41 = vld [vmem:[#allocation2 + $0xc0] sm:$0xf0]  ;;  %v8200_v25 = vld [vmem:[#allocation2 + $0xd0] sm:$0xf0] }
 0x204   : > { %6745 = vmatprep.mubr.msk.bf16.mxu1 %vm442_vm1, %v4024_v33  ;;  %v4100_v13 = vor.u32 %v4099_v45, %v4096_v44  ;;  %v4108_v8 = vor.u32 %v4107_v47, %v4104_v42  ;;  %v8136_v33 = vld [vmem:[#allocation2 + $0x40] sm:$0xf0]  ;;  %v4408_v54 = vrot.slane %v8023_v23, 4  ;;  %v4411_v19 = vrot.slane %v8030_v48, 4 }
 0x205   : > { %v4406_v62 = vsel %vm1369_vm4, %v4404_v52, %v4405_v2  ;;  %v4410_v27 = vrot.slane %v8136_v33, 4  ;;  %v5037_v59 = vsel %vm644_vm0, %v8053_v28, 0  ;;  %v4413_v23 = vrot.slane %v8147_v39, 4  ;;  %v8203_v44 = vld [vmem:[#allocation2 + $0xe0] sm:$0xf0] }
 0x206   : > { %v4109_v14 = vsel %vm1047_vm5, %v4100_v13, %v4108_v8  ;;  %v4409_v22 = vsel %vm1369_vm4, %v4407_v36, %v4408_v54  ;;  %v4414_v48 = vrot.slane %v8035_v58, 4  ;;  %v4416_v40 = vrot.slane %v8150_v49, 4  ;;  %v8215_v13 = vld [vmem:[#allocation2 + $0x100] sm:$0xf0]  ;;  %v4698_v8 = vld [vmem:[#allocation2 + $0x28] sm:$0x1f] }
 0x207   : > { %v4412_v0 = vsel %vm1369_vm4, %v4410_v27, %v4411_v19  ;;  %v4417_v28 = vrot.slane %v8042_v60, 4  ;;  %v4420_v58 = vrot.slane %v8046_v35, 4  ;;  %v4422_v30 = vrot.slane %v8162_v6, 4  ;;  %v8178_v35 = vld [vmem:[#allocation2 + $0xa0] sm:$0xf0] }
 0x208   : > { %v4415_v31 = vsel %vm1369_vm4, %v4413_v23, %v4414_v48  ;;  %v4423_v60 = vrot.slane %v8060_v3, 4  ;;  %v4425_v3 = vrot.slane %v8175_v1, 4  ;;  %v4426_v55 = vrot.slane %v8068_v11, 4  ;;  %v8223_v27 = vld [vmem:[#allocation2 + $0x110] sm:$0xf0] }
 0x209   : > { %v4418_v16 = vsel %vm1369_vm4, %v4416_v40, %v4417_v28  ;;  %v4428_v15 = vrot.slane %v8178_v35, 4  ;;  %v4429_v37 = vrot.slane %v8071_v21, 4  ;;  %v5408_v24 = vsel %vm644_vm0, %v5358_v46, 0  ;;  %v4699_v48 = vld [vmem:[#allocation2 + $0x38] sm:$0x1f] }
 0x20a   : > { %v4424_v57 = vsel %vm1369_vm4, %v4422_v30, %v4423_v60  ;;  %v4427_v56 = vsel %vm1369_vm4, %v4425_v3, %v4426_v55  ;;  %6826 = vmatpush3.bf16.msra.mxu0 %v5408_v24  ;;  %v4431_v11 = vrot.slane %v8188_v51, 4  ;;  %v4432_v50 = vrot.slane %v8079_v61, 4  ;;  %v4700_v40 = vld [vmem:[#allocation2 + $0x48] sm:$0x1f]  ;;  %v4701_v24 = vld [vmem:[#allocation2 + $0x58] sm:$0x1f] }
 0x20b   : > { %6746 = vmatmul.mubr.msk.bf16.gmra.mrb[20].mxu1 %vm442_vm1, %v4041_v7  ;;  %v4419_v7 = vrot.slane %v8159_v5, 4  ;;  %v4430_v9 = vsel %vm1369_vm4, %v4428_v15, %v4429_v37  ;;  %v4434_v21 = vrot.slane %v8191_v41, 4  ;;  %v4435_v43 = vrot.slane %v8086_v12, 4 }
 0x20c   : > { %6749 = vmatprep.mubr.msk.bf16.mxu1 %vm442_vm1, %v4058_v4  ;;  %v4433_v10 = vsel %vm1369_vm4, %v4431_v11, %v4432_v50  ;;  %v4437_v45 = vrot.slane %v8200_v25, 4  ;;  %v4438_v61 = vrot.slane %v8092_v26, 4  ;;  %v4440_v42 = vrot.slane %v8203_v44, 4 }
 0x20d   : > { %v4421_v4 = vsel %vm1369_vm4, %v4419_v7, %v4420_v58  ;;  %v4436_v53 = vsel %vm1369_vm4, %v4434_v21, %v4435_v43  ;;  %v4441_v12 = vrot.slane %v8095_v38, 4  ;;  %v4444_v26 = vrot.slane %v8105_v63, 4 }
 0x20e   : > { %v4439_v47 = vsel %vm1369_vm4, %v4437_v45, %v4438_v61  ;;  %v4715_v2 = vshrl.u32 %v8126_v34, 16  ;;  %v4718_v38 = vshll.u32 %v8126_v34, 16  ;;  %v4723_v36 = vshrl.u32 %v4698_v8, 16 }
 0x20f   : > { %v4726_v54 = vshll.u32 %v4698_v8, 16  ;;  %v4449_v34 = vrot.slane %v8223_v27, 4  ;;  %v4732_v28 = vshrl.u32 %v8133_v32, 16  ;;  %v4740_v7 = vshrl.u32 %v4699_v48, 16 }
 0x210   : > { %v4743_v58 = vshll.u32 %v4699_v48, 16  ;;  %v4749_v30 = vshrl.u32 %v8136_v33, 16  ;;  %v4752_v46 = vshll.u32 %v8136_v33, 16  ;;  %v4702_v33 = vld [vmem:[#allocation2 + $0x68] sm:$0x1f]  ;;  %v4766_v21 = vshrl.u32 %v8147_v39, 16 }
 0x211   : > { %v4728_v23 = vrot.slane %v4726_v54, 5  ;;  %v4734_v55 = vrot.slane %v4732_v28, 4  ;;  %v4769_v43 = vshll.u32 %v8147_v39, 16  ;;  %v4791_v8 = vshrl.u32 %v4702_v33, 16 }
 0x212   : > { %v4745_v37 = vrot.slane %v4743_v58, 5 }
 0x213   : > { %6750 = vmatmul.mubr.msk.bf16.gmra.mrb[24].mxu1 %vm442_vm1, %v4075_v18  ;;  %v4442_v18 = vsel %vm1369_vm4, %v4440_v42, %v4441_v12  ;;  %v4783_v42 = vshrl.u32 %v8150_v49, 16  ;;  %v4786_v12 = vshll.u32 %v8150_v49, 16 }
 0x214   : > { %6753 = vmatprep.mubr.msk.bf16.mxu1 %vm442_vm1, %v4092_v29  ;;  %v8212_v29 = vld [vmem:[#allocation2 + $0xf0] sm:$0xf0] }
 0x215   : > { %v4443_v52 = vrot.slane %v8212_v29, 4  ;;  %v4788_v39 = vrot.slane %v4786_v12, 5  ;;  %v4854_v12 = vshll.u32 %v8178_v35, 16 }
 0x217   : > { %v4445_v19 = vsel %vm1369_vm4, %v4443_v52, %v4444_v26  ;;  %v4794_v52 = vshll.u32 %v4702_v33, 16  ;;  %v4768_v26 = vrot.slane %v4766_v21, 4  ;;  %v4834_v33 = vshrl.u32 %v8175_v1, 16 }
 0x218   : > { %v4837_v21 = vshll.u32 %v8175_v1, 16 }
 0x21b   : > { %6754 = vmatmul.mubr.msk.bf16.gmra.mrb[28].mxu1 %vm442_vm1, %v4109_v14  ;;  %v4446_v14 = vrot.slane %v8215_v13, 4 }
 0x21c   : > { %6759 = vmatprep.mubr.msk.bf16.mxu1 %vm442_vm1, %v4406_v62  ;;  %v4447_v62 = vrot.slane %v8108_v20, 4  ;;  %v4450_v20 = vrot.slane %v8115_v17, 4  ;;  %v4742_v17 = vrot.slane %v4740_v7, 4  ;;  %v4817_v7 = vshrl.u32 %v8162_v6, 16 }
 0x21e   : > { %v4448_v63 = vsel %vm1369_vm4, %v4446_v14, %v4447_v62  ;;  %v4451_v3 = vsel %vm1369_vm4, %v4449_v34, %v4450_v20  ;;  %v4746_v61 = vor.u32 %v4745_v37, %v4742_v17  ;;  %v4800_v34 = vshrl.u32 %v8159_v5, 16  ;;  %v4705_v37 = vld [vmem:[#allocation2 + $0x98] sm:$0x1f] }
 0x21f   : > { %v4803_v20 = vshll.u32 %v8159_v5, 16  ;;  %v4819_v17 = vrot.slane %v4817_v7, 4 }
 0x223   : > { %6760 = vmatmul.mubr.msk.bf16.vlgmr.msra.gmra.mrb[0].mxu1 %vm442_vm1, %v4409_v22  ;;  %v4720_v22 = vrot.slane %v4718_v38, 5 }
 0x224   : > { %6792 = vmatpush3.bf16.msra.mxu1 %v5037_v59  ;;  %6763 = vmatprep.mubr.msk.bf16.mxu1 %vm442_vm1, %v4412_v0  ;;  %v4717_v59 = vrot.slane %v4715_v2, 4  ;;  %v4725_v0 = vrot.slane %v4723_v36, 4  ;;  %v4771_v2 = vrot.slane %v4769_v43, 5  ;;  %v4785_v36 = vrot.slane %v4783_v42, 4 }
 0x225   : > { %v4842_v43 = vshrl.u32 %v4705_v37, 16  ;;  %v4851_v42 = vshrl.u32 %v8178_v35, 16 }
 0x226   : > { %v4729_v60 = vor.u32 %v4728_v23, %v4725_v0  ;;  %v4772_v0 = vor.u32 %v4771_v2, %v4768_v26  ;;  %v4836_v2 = vrot.slane %v4834_v33, 4 }
 0x22b   : > { %6764 = vmatmul.mubr.msk.bf16.gmra.mrb[4].mxu1 %vm442_vm1, %v4415_v31  ;;  %v4735_v31 = vshll.u32 %v8133_v32, 16 }
 0x22c   : > { %6767 = vmatprep.mubr.msk.bf16.mxu1 %vm442_vm1, %v4418_v16  ;;  %v4721_v16 = vor.u32 %v4720_v22, %v4717_v59  ;;  %v4796_v59 = vrot.slane %v4794_v52, 5  ;;  %v4703_v22 = vld [vmem:[#allocation2 + $0x78] sm:$0x1f] }
 0x22d   : > { %v4737_v15 = vrot.slane %v4735_v31, 5  ;;  %v4808_v31 = vshrl.u32 %v4703_v22, 16 }
 0x22e   : > { %v4730_v32 = vsel %vm1860_vm6, %v4721_v16, %v4729_v60  ;;  %v4811_v16 = vshll.u32 %v4703_v22, 16  ;;  %v4820_v60 = vshll.u32 %v8162_v6, 16  ;;  %v4708_v22 = vld [vmem:[#allocation2 + $0xc8] sm:$0x1f] }
 0x22f   : > { %v4738_v45 = vor.u32 %v4737_v15, %v4734_v55  ;;  %v4805_v55 = vrot.slane %v4803_v20, 5  ;;  %v4810_v15 = vrot.slane %v4808_v31, 4  ;;  %v4871_v20 = vshll.u32 %v8188_v51, 16 }
 0x230   : > { %v4813_v5 = vrot.slane %v4811_v16, 5 }
 0x231   : > { %v4747_v62 = vsel %vm1860_vm6, %v4738_v45, %v4746_v61 }
 0x232   : > { %v4814_v45 = vor.u32 %v4813_v5, %v4810_v15 }
 0x233   : > { %6768 = vmatmul.mubr.msk.bf16.gmra.mrb[8].mxu1 %vm442_vm1, %v4421_v4  ;;  %v4757_v4 = vshrl.u32 %v4700_v40, 16 }
 0x234   : > { %6771 = vmatprep.mubr.msk.bf16.mxu1 %vm442_vm1, %v4424_v57  ;;  %v4760_v57 = vshll.u32 %v4700_v40, 16  ;;  %v4789_v40 = vor.u32 %v4788_v39, %v4785_v36  ;;  %v4853_v36 = vrot.slane %v4851_v42, 4  ;;  %v4856_v39 = vrot.slane %v4854_v12, 5 }
 0x235   : > { %v4759_v11 = vrot.slane %v4757_v4, 4  ;;  %v4919_v12 = vshrl.u32 %v8203_v44, 16 }
 0x236   : > { %v4762_v50 = vrot.slane %v4760_v57, 5 }
 0x23b   : > { %6772 = vmatmul.mubr.msk.bf16.gmra.mrb[12].mxu1 %vm442_vm1, %v4427_v56  ;;  %v4751_v56 = vrot.slane %v4749_v30, 4 }
 0x23c   : > { %6775 = vmatprep.mubr.msk.bf16.mxu1 %vm442_vm1, %v4430_v9  ;;  %v4754_v9 = vrot.slane %v4752_v46, 5 }
 0x243   : > { %6776 = vmatmul.mubr.msk.bf16.gmra.mrb[16].mxu1 %vm442_vm1, %v4433_v10  ;;  %v4774_v10 = vshrl.u32 %v4701_v24, 16 }
 0x244   : > { %6779 = vmatprep.mubr.msk.bf16.mxu1 %vm442_vm1, %v4436_v53  ;;  %v4777_v53 = vshll.u32 %v4701_v24, 16  ;;  %v4822_v24 = vrot.slane %v4820_v60, 5 }
 0x245   : > { %v4776_v38 = vrot.slane %v4774_v10, 4  ;;  %v4845_v10 = vshll.u32 %v4705_v37, 16 }
 0x246   : > { %v4779_v14 = vrot.slane %v4777_v53, 5 }
 0x247   : > { %v4847_v1 = vrot.slane %v4845_v10, 5 }
 0x248   : > { %v4780_v23 = vor.u32 %v4779_v14, %v4776_v38  ;;  %v4839_v38 = vrot.slane %v4837_v21, 5  ;;  %v4844_v14 = vrot.slane %v4842_v43, 4  ;;  %v4902_v21 = vshrl.u32 %v8200_v25, 16 }
 0x249   : > { %v4905_v43 = vshll.u32 %v8200_v25, 16 }
 0x24a   : > { %v4781_v57 = vsel %vm1860_vm6, %v4772_v0, %v4780_v23  ;;  %v4848_v0 = vor.u32 %v4847_v1, %v4844_v14  ;;  %v4904_v1 = vrot.slane %v4902_v21, 4 }
 0x24b   : > { %6780 = vmatmul.mubr.msk.bf16.gmra.mrb[20].mxu1 %vm442_vm1, %v4439_v47  ;;  %v4755_v47 = vor.u32 %v4754_v9, %v4751_v56 }
 0x24c   : > { %6783 = vmatprep.mubr.msk.bf16.mxu1 %vm442_vm1, %v4442_v18  ;;  %v4763_v18 = vor.u32 %v4762_v50, %v4759_v11  ;;  %v4706_v11 = vld [vmem:[#allocation2 + $0xa8] sm:$0x1f] }
 0x24d   : > { %v4859_v52 = vshrl.u32 %v4706_v11, 16  ;;  %v4862_v26 = vshll.u32 %v4706_v11, 16 }
 0x24e   : > { %v4764_v54 = vsel %vm1860_vm6, %v4755_v47, %v4763_v18  ;;  %v4823_v47 = vor.u32 %v4822_v24, %v4819_v17  ;;  %v4709_v24 = vld [vmem:[#allocation2 + $0xd8] sm:$0x1f] }
 0x24f   : > { %v4864_v35 = vrot.slane %v4862_v26, 5  ;;  %v4910_v10 = vshrl.u32 %v4709_v24, 16 }
 0x253   : > { %6784 = vmatmul.mubr.msk.bf16.gmra.mrb[24].mxu1 %vm442_vm1, %v4445_v19  ;;  %v4793_v19 = vrot.slane %v4791_v8, 4 }
 0x254   : > { %6787 = vmatprep.mubr.msk.bf16.mxu1 %vm442_vm1, %v4448_v63  ;;  %v4704_v63 = vld [vmem:[#allocation2 + $0x88] sm:$0x1f] }
 0x255   : > { %v4797_v58 = vor.u32 %v4796_v59, %v4793_v19  ;;  %v4825_v46 = vshrl.u32 %v4704_v63, 16  ;;  %v4828_v4 = vshll.u32 %v4704_v63, 16  ;;  %v4861_v19 = vrot.slane %v4859_v52, 4  ;;  %v4707_v59 = vld [vmem:[#allocation2 + $0xb8] sm:$0x1f] }
 0x256   : > { %v4840_v63 = vor.u32 %v4839_v38, %v4836_v2  ;;  %v4876_v16 = vshrl.u32 %v4707_v59, 16  ;;  %v4879_v7 = vshll.u32 %v4707_v59, 16 }
 0x257   : > { %v4798_v56 = vsel %vm1860_vm6, %v4789_v40, %v4797_v58  ;;  %v4830_v9 = vrot.slane %v4828_v4, 5  ;;  %v4857_v40 = vor.u32 %v4856_v39, %v4853_v36  ;;  %v4885_v58 = vshrl.u32 %v8191_v41, 16 }
 0x258   : > { %v4865_v60 = vor.u32 %v4864_v35, %v4861_v19  ;;  %v4888_v4 = vshll.u32 %v8191_v41, 16  ;;  %v4849_v15 = vsel %vm1860_vm6, %v4840_v63, %v4848_v0  ;;  %v4878_v17 = vrot.slane %v4876_v16, 4  ;;  %v4710_v41 = vld [vmem:[#allocation2 + $0xe8] sm:$0x1f]  ;;  %v4711_v0 = vld [vmem:[#allocation2 + $0xf8] sm:$0x1f] }
 0x259   : > { %v4881_v37 = vrot.slane %v4879_v7, 5  ;;  %v4927_v26 = vshrl.u32 %v4710_v41, 16  ;;  %v4930_v2 = vshll.u32 %v4710_v41, 16  ;;  %v4912_v36 = vrot.slane %v4910_v10, 4 }
 0x25a   : > { %v4921_v19 = vrot.slane %v4919_v12, 4  ;;  %v4936_v16 = vshrl.u32 %v8212_v29, 16  ;;  %v4939_v7 = vshll.u32 %v8212_v29, 16  ;;  %v4970_v10 = vshrl.u32 %v8223_v27, 16 }
 0x25b   : > { %6788 = vmatmul.mubr.msk.bf16.gmra.mrb[28].mxu1 %vm442_vm1, %v4451_v3  ;;  %v4802_v3 = vrot.slane %v4800_v34, 4  ;;  %v4868_v34 = vshrl.u32 %v8188_v51, 16  ;;  %v4873_v51 = vrot.slane %v4871_v20, 5  ;;  %v4882_v42 = vor.u32 %v4881_v37, %v4878_v17 }
 0x25c   : > { %6793 = vmatprep.mubr.msk.bf16.mxu1 %vm442_vm1, %v4730_v32  ;;  %v4827_v32 = vrot.slane %v4825_v46, 4  ;;  %v4932_v63 = vrot.slane %v4930_v2, 5  ;;  %v4938_v37 = vrot.slane %v4936_v16, 4 }
 0x25d   : > { %v4806_v53 = vor.u32 %v4805_v55, %v4802_v3  ;;  %v4896_v3 = vshll.u32 %v4708_v22, 16  ;;  %v4870_v5 = vrot.slane %v4868_v34, 4  ;;  %v4712_v34 = vld [vmem:[#allocation2 + $0x108] sm:$0x1f] }
 0x25e   : > { %v4831_v18 = vor.u32 %v4830_v9, %v4827_v32  ;;  %v4866_v32 = vsel %vm1860_vm6, %v4857_v40, %v4865_v60  ;;  %v4890_v9 = vrot.slane %v4888_v4, 5  ;;  %v4944_v60 = vshrl.u32 %v4711_v0, 16 }
 0x25f   : > { %v4898_v33 = vrot.slane %v4896_v3, 5  ;;  %v4947_v4 = vshll.u32 %v4711_v0, 16 }
 0x263   : > { %6794 = vmatmul.mubr.msk.bf16.vlgmr.msra.gmra.mrb[0].mxu1 %vm442_vm1, %v4747_v62  ;;  %v4815_v62 = vsel %vm1860_vm6, %v4806_v53, %v4814_v45  ;;  %v4913_v53 = vshll.u32 %v4709_v24, 16  ;;  %v4874_v45 = vor.u32 %v4873_v51, %v4870_v5  ;;  %v4961_v5 = vshrl.u32 %v4712_v34, 16 }
 0x264   : > { %6797 = vmatprep.mubr.msk.bf16.mxu1 %vm442_vm1, %v4764_v54  ;;  %v8247_v49 = vpop.f32.mrb[32].mxu0  ;;  %v4832_v54 = vsel %vm1860_vm6, %v4823_v47, %v4831_v18  ;;  %v4922_v47 = vshll.u32 %v8203_v44, 16  ;;  %v4964_v51 = vshll.u32 %v4712_v34, 16  ;;  %v4941_v24 = vrot.slane %v4939_v7, 5 }
 0x265   : > { %v8249_v48 = vpop.f32.mrb[33].mxu0  ;;  %v4915_v25 = vrot.slane %v4913_v53, 5  ;;  %v4883_v39 = vsel %vm1860_vm6, %v4874_v45, %v4882_v42  ;;  %v4963_v21 = vrot.slane %v4961_v5, 4  ;;  %v4973_v53 = vshll.u32 %v8223_v27, 16  ;;  %v8366_v5 = vld [vmem:[%s8821_s7] ss:$0 sm:$0xff] }
 0x266   : > { %v8253_v28 = vpop.f32.mrb[34].mxu0  ;;  %v4924_v35 = vrot.slane %v4922_v47, 5  ;;  %v4942_v47 = vor.u32 %v4941_v24, %v4938_v37  ;;  %v8372_v37 = vld [vmem:[%s8822_s8] ss:$0 sm:$0xff] }
 0x267   : > { %v8256_v30 = vpop.f32.mrb[35].mxu0  ;;  %v4916_v40 = vor.u32 %v4915_v25, %v4912_v36 }
 0x26b   : > { %6798 = vmatmul.mubr.msk.bf16.gmra.mrb[4].mxu1 %vm442_vm1, %v4781_v57  ;;  %v4893_v57 = vshrl.u32 %v4708_v22, 16  ;;  %v4929_v22 = vrot.slane %v4927_v26, 4 }
 0x26c   : > { %6801 = vmatprep.mubr.msk.bf16.mxu1 %vm442_vm1, %v4798_v56  ;;  %v8263_v6 = vpop.f32.mrb[36].mxu0  ;;  %v4887_v56 = vrot.slane %v4885_v58, 4  ;;  %v4925_v58 = vor.u32 %v4924_v35, %v4921_v19 }
 0x26d   : > { %v8265_v50 = vpop.f32.mrb[37].mxu0  ;;  %v4895_v11 = vrot.slane %v4893_v57, 4  ;;  %v4953_v57 = vshrl.u32 %v8215_v13, 16  ;;  %v4933_v3 = vor.u32 %v4932_v63, %v4929_v22 }
 0x26e   : > { %v8269_v61 = vpop.f32.mrb[38].mxu0  ;;  %v4891_v18 = vor.u32 %v4890_v9, %v4887_v56  ;;  %v4713_v56 = vld [vmem:[#allocation2 + $0x118] sm:$0x1f]  ;;  %v4949_v9 = vrot.slane %v4947_v4, 5 }
 0x26f   : > { %v8273_v8 = vpop.f32.mrb[39].mxu0  ;;  %v4899_v52 = vor.u32 %v4898_v33, %v4895_v11  ;;  %v4955_v11 = vrot.slane %v4953_v57, 4  ;;  %v4934_v29 = vsel %vm1860_vm6, %v4925_v58, %v4933_v3  ;;  %v4978_v45 = vshrl.u32 %v4713_v56, 16  ;;  %v5649_v3 = vld [vmem:[%s8818_s4] sm:$0x3] }
 0x270   : > { %v4981_v42 = vshll.u32 %v4713_v56, 16  ;;  %7160 = vmatprep.subr.msk.bf16.mxu0 %vm644_vm0, %v5649_v3 }
 0x271   : > { %v4900_v44 = vsel %vm1860_vm6, %v4891_v18, %v4899_v52  ;;  %v4980_v36 = vrot.slane %v4978_v45, 4 }
 0x272   : > { %v4983_v25 = vrot.slane %v4981_v42, 5 }
 0x273   : > { %6802 = vmatmul.mubr.msk.bf16.gmra.mrb[8].mxu1 %vm442_vm1, %v4815_v62  ;;  %v4907_v62 = vrot.slane %v4905_v43, 5  ;;  %v4966_v43 = vrot.slane %v4964_v51, 5 }
 0x274   : > { %6805 = vmatprep.mubr.msk.bf16.mxu1 %vm442_vm1, %v4832_v54  ;;  %v4984_v35 = vor.u32 %v4983_v25, %v4980_v36 }
 0x275   : > { %v8279_v23 = vpop.f32.mrb[40].mxu0  ;;  %v4908_v20 = vor.u32 %v4907_v62, %v4904_v1  ;;  %v4967_v2 = vor.u32 %v4966_v43, %v4963_v21  ;;  %v4972_v1 = vrot.slane %v4970_v10, 4  ;;  %v4975_v62 = vrot.slane %v4973_v53, 5 }
 0x276   : > { %v8283_v31 = vpop.f32.mrb[41].mxu0 }
 0x277   : > { %v8286_v46 = vpop.f32.mrb[42].mxu0  ;;  %v4917_v17 = vsel %vm1860_vm6, %v4908_v20, %v4916_v40  ;;  %v4976_v19 = vor.u32 %v4975_v62, %v4972_v1 }
 0x278   : > { %v8289_v55 = vpop.f32.mrb[43].mxu0 }
 0x279   : > { %v4985_v0 = vsel %vm1860_vm6, %v4976_v19, %v4984_v35 }
 0x27b   : > { %6806 = vmatmul.mubr.msk.bf16.gmra.mrb[12].mxu1 %vm442_vm1, %v4849_v15  ;;  %v4956_v15 = vshll.u32 %v8215_v13, 16 }
 0x27c   : > { %6809 = vmatprep.mubr.msk.bf16.mxu1 %vm442_vm1, %v4866_v32  ;;  %v4946_v32 = vrot.slane %v4944_v60, 4 }
 0x27d   : > { %v4958_v41 = vrot.slane %v4956_v15, 5 }
 0x27e   : > { %v4950_v18 = vor.u32 %v4949_v9, %v4946_v32 }
 0x27f   : > { %v4959_v26 = vor.u32 %v4958_v41, %v4955_v11 }
 0x280   : > { %v8299_v38 = vpop.f32.mrb[44].mxu0 }
 0x281   : > { %v8301_v14 = vpop.f32.mrb[45].mxu0  ;;  %v4968_v27 = vsel %vm1860_vm6, %v4959_v26, %v4967_v2 }
 0x282   : > { %v8304_v54 = vpop.f32.mrb[46].mxu0 }
 0x283   : > { %6810 = vmatmul.mubr.msk.bf16.gmra.mrb[16].mxu1 %vm442_vm1, %v4883_v39  ;;  %v8308_v59 = vpop.f32.mrb[47].mxu0  ;;  %v4951_v39 = vsel %vm1860_vm6, %v4942_v47, %v4950_v18 }
 0x284   : > { %6813 = vmatprep.mubr.msk.bf16.mxu1 %vm442_vm1, %v4900_v44 }
 0x28b   : > { %6814 = vmatmul.mubr.msk.bf16.gmra.mrb[20].mxu1 %vm442_vm1, %v4917_v17  ;;  %v8318_v33 = vpop.f32.mrb[48].mxu0 }
 0x28c   : > { %6817 = vmatprep.mubr.msk.bf16.mxu1 %vm442_vm1, %v4934_v29  ;;  %v8321_v13 = vpop.f32.mrb[49].mxu0 }
 0x28d   : > { %v8325_v12 = vpop.f32.mrb[50].mxu0 }
 0x28e   : > { %v8327_v52 = vpop.f32.mrb[51].mxu0 }
 0x293   : > { %6818 = vmatmul.mubr.msk.bf16.gmra.mrb[24].mxu1 %vm442_vm1, %v4951_v39 }
 0x294   : > { %6821 = vmatprep.mubr.msk.bf16.mxu1 %vm442_vm1, %v4968_v27 }
 0x296   : > { %v8333_v44 = vpop.f32.mrb[52].mxu0 }
 0x297   : > { %v8335_v22 = vpop.f32.mrb[53].mxu0 }
 0x298   : > { %v8337_v63 = vpop.f32.mrb[54].mxu0 }
 0x299   : > { %v8340_v34 = vpop.f32.mrb[55].mxu0 }
 0x29b   : > { %6822 = vmatmul.mubr.msk.bf16.gmra.mrb[28].mxu1 %vm442_vm1, %v4985_v0 }
 0x2a1   : > { %v8343_v20 = vpop.f32.mrb[56].mxu0 }
 0x2a2   : > { %v8345_v40 = vpop.f32.mrb[57].mxu0 }
 0x2a3   : > { %v8347_v16 = vpop.f32.mrb[58].mxu0 }
 0x2a4   : > { %v8349_v7 = vpop.f32.mrb[59].mxu0 }
 0x2ac   : > { %v8351_v58 = vpop.f32.mrb[60].mxu0 }
 0x2ad   : > { %v8353_v60 = vpop.f32.mrb[61].mxu0 }
 0x2ae   : > { %v8355_v4 = vpop.f32.mrb[62].mxu0 }
 0x2af   : > { %v8357_v57 = vpop.f32.mrb[63].mxu0 }
 0x336   : > { %v6795_v15 = vpop.f32.mrb[0].mxu1 }
 0x337   : > { %v6893_v51 = vadd.f32 %v6795_v15, %v8247_v49  ;;  %v5073_v17 = vpop.f32.mrb[1].mxu1  ;;  %v5651_v15 = vsel %vm644_vm0, %v5649_v3, 0 }
 0x338   : > { %v6894_v56 = vadd.f32 %v5073_v17, %v8249_v48  ;;  %v6796_v24 = vpop.f32.mrb[2].mxu1 }
 0x339   : > { %v5241_v32 = vmul.f32 %v6893_v51, %v8366_v5  ;;  %v6895_v9 = vadd.f32 %v6796_v24, %v8253_v28  ;;  %v5076_v11 = vpop.f32.mrb[3].mxu1 }
 0x33a   : > { %v5239_v29 = vmul.f32 %v6894_v56, %v8366_v5  ;;  %v6896_v41 = vadd.f32 %v5076_v11, %v8256_v30 }
 0x33b   : > { %v5280_v49 = vadd.f32 %v8372_v37, %v5241_v32  ;;  %v5242_v21 = vmul.f32 %v6895_v9, %v8366_v5 }
 0x33c   : > { %v5278_v43 = vadd.f32 %v8372_v37, %v5239_v29  ;;  %v5240_v10 = vmul.f32 %v6896_v41, %v8366_v5 }
 0x33d   : > { %v5281_v48 = vadd.f32 %v8372_v37, %v5242_v21  ;;  %v5312_v42 = vmax.f32 %v5280_v49, 0.0 }
 0x33e   : > { %v5279_v53 = vadd.f32 %v8372_v37, %v5240_v10  ;;  %v6799_v45 = vpop.f32.mrb[4].mxu1  ;;  %v5310_v26 = vmax.f32 %v5278_v43, 0.0 }
 0x33f   : > { %v5313_v28 = vmax.f32 %v5281_v48, 0.0  ;;  %v6897_v47 = vadd.f32 %v6799_v45, %v8263_v6  ;;  %v5089_v18 = vpop.f32.mrb[5].mxu1 }
 0x340   : > { %v5311_v30 = vmax.f32 %v5279_v53, 0.0  ;;  %v6898_v2 = vadd.f32 %v5089_v18, %v8265_v50  ;;  %v6800_v1 = vpop.f32.mrb[6].mxu1 }
 0x341   : > { %v5343_v62 = vpack.c.bf16 %v5313_v28, %v5312_v42  ;;  %v5245_v36 = vmul.f32 %v6897_v47, %v8366_v5  ;;  %v6899_v25 = vadd.f32 %v6800_v1, %v8269_v61  ;;  %v5092_v39 = vpop.f32.mrb[7].mxu1 }
 0x342   : > { %v5342_v27 = vpack.c.bf16 %v5311_v30, %v5310_v26  ;;  %v5243_v19 = vmul.f32 %v6898_v2, %v8366_v5  ;;  %v6900_v35 = vadd.f32 %v5092_v39, %v8273_v8 }
 0x343   : > { %v5284_v0 = vadd.f32 %v8372_v37, %v5245_v36  ;;  %v5246_v6 = vmul.f32 %v6899_v25, %v8366_v5 }
 0x344   : > { %v5282_v50 = vadd.f32 %v8372_v37, %v5243_v19  ;;  %v5244_v51 = vmul.f32 %v6900_v35, %v8366_v5  ;;  %6827 = vmatprep.mubr.msk.bf16.mxu0 %vm442_vm1, %v5342_v27 }
 0x345   : > { %v5285_v61 = vadd.f32 %v8372_v37, %v5246_v6  ;;  %6828 = vmatmul.mubr.msk.bf16.vlgmr.msra.gmra.mrb[64].mxu0 %vm442_vm1, %v5343_v62  ;;  %v5316_v56 = vmax.f32 %v5284_v0, 0.0 }
 0x346   : > { %v5283_v17 = vadd.f32 %v8372_v37, %v5244_v51  ;;  %6860 = vmatpush3.bf16.msra.mxu0 %v5651_v15  ;;  %v6803_v8 = vpop.f32.mrb[8].mxu1  ;;  %v5314_v3 = vmax.f32 %v5282_v50, 0.0 }
 0x347   : > { %v5317_v24 = vmax.f32 %v5285_v61, 0.0  ;;  %v6901_v32 = vadd.f32 %v6803_v8, %v8279_v23  ;;  %v5105_v9 = vpop.f32.mrb[9].mxu1 }
 0x348   : > { %v5315_v11 = vmax.f32 %v5283_v17, 0.0  ;;  %v6902_v29 = vadd.f32 %v5105_v9, %v8283_v31  ;;  %v6804_v41 = vpop.f32.mrb[10].mxu1 }
 0x349   : > { %v5345_v49 = vpack.c.bf16 %v5317_v24, %v5316_v56  ;;  %v5249_v21 = vmul.f32 %v6901_v32, %v8366_v5  ;;  %v6903_v43 = vadd.f32 %v6804_v41, %v8286_v46  ;;  %v5108_v10 = vpop.f32.mrb[11].mxu1 }
 0x34a   : > { %v5344_v48 = vpack.c.bf16 %v5315_v11, %v5314_v3  ;;  %v5247_v53 = vmul.f32 %v6902_v29, %v8366_v5  ;;  %v6904_v45 = vadd.f32 %v5108_v10, %v8289_v55 }
 0x34b   : > { %v5288_v42 = vadd.f32 %v8372_v37, %v5249_v21  ;;  %v5250_v23 = vmul.f32 %v6903_v43, %v8366_v5 }
 0x34c   : > { %v5286_v28 = vadd.f32 %v8372_v37, %v5247_v53  ;;  %v5248_v31 = vmul.f32 %v6904_v45, %v8366_v5  ;;  %6831 = vmatprep.mubr.msk.bf16.mxu0 %vm442_vm1, %v5344_v48 }
 0x34d   : > { %v5289_v47 = vadd.f32 %v8372_v37, %v5250_v23  ;;  %6832 = vmatmul.mubr.msk.bf16.gmra.mrb[68].mxu0 %vm442_vm1, %v5345_v49  ;;  %v5320_v26 = vmax.f32 %v5288_v42, 0.0 }
 0x34e   : > { %v5287_v46 = vadd.f32 %v8372_v37, %v5248_v31  ;;  %v6807_v18 = vpop.f32.mrb[12].mxu1  ;;  %v5318_v1 = vmax.f32 %v5286_v28, 0.0 }
 0x34f   : > { %v5321_v30 = vmax.f32 %v5289_v47, 0.0  ;;  %v6905_v55 = vadd.f32 %v6807_v18, %v8299_v38  ;;  %v5121_v2 = vpop.f32.mrb[13].mxu1 }
 0x350   : > { %v5319_v62 = vmax.f32 %v5287_v46, 0.0  ;;  %v6906_v36 = vadd.f32 %v5121_v2, %v8301_v14  ;;  %v6808_v25 = vpop.f32.mrb[14].mxu1 }
 0x351   : > { %v5347_v39 = vpack.c.bf16 %v5321_v30, %v5320_v26  ;;  %v5253_v27 = vmul.f32 %v6905_v55, %v8366_v5  ;;  %v6907_v19 = vadd.f32 %v6808_v25, %v8304_v54  ;;  %v5124_v35 = vpop.f32.mrb[15].mxu1 }
 0x352   : > { %v5346_v0 = vpack.c.bf16 %v5319_v62, %v5318_v1  ;;  %v5251_v6 = vmul.f32 %v6906_v36, %v8366_v5  ;;  %v6908_v15 = vadd.f32 %v5124_v35, %v8308_v59 }
 0x353   : > { %v5292_v50 = vadd.f32 %v8372_v37, %v5253_v27  ;;  %v5254_v38 = vmul.f32 %v6907_v19, %v8366_v5 }
 0x354   : > { %v5290_v51 = vadd.f32 %v8372_v37, %v5251_v6  ;;  %v5252_v14 = vmul.f32 %v6908_v15, %v8366_v5  ;;  %6835 = vmatprep.mubr.msk.bf16.mxu0 %vm442_vm1, %v5346_v0 }
 0x355   : > { %v5293_v61 = vadd.f32 %v8372_v37, %v5254_v38  ;;  %6836 = vmatmul.mubr.msk.bf16.gmra.mrb[72].mxu0 %vm442_vm1, %v5347_v39  ;;  %v5324_v8 = vmax.f32 %v5292_v50, 0.0 }
 0x356   : > { %v5291_v54 = vadd.f32 %v8372_v37, %v5252_v14  ;;  %v6811_v17 = vpop.f32.mrb[16].mxu1  ;;  %v5322_v32 = vmax.f32 %v5290_v51, 0.0 }
 0x357   : > { %v5325_v56 = vmax.f32 %v5293_v61, 0.0  ;;  %v6909_v59 = vadd.f32 %v6811_v17, %v8318_v33  ;;  %v5137_v24 = vpop.f32.mrb[17].mxu1 }
 0x358   : > { %v5323_v9 = vmax.f32 %v5291_v54, 0.0  ;;  %v6910_v3 = vadd.f32 %v5137_v24, %v8321_v13  ;;  %v6812_v11 = vpop.f32.mrb[18].mxu1 }
 0x359   : > { %v5349_v29 = vpack.c.bf16 %v5325_v56, %v5324_v8  ;;  %v5257_v41 = vmul.f32 %v6909_v59, %v8366_v5  ;;  %v6911_v49 = vadd.f32 %v6812_v11, %v8325_v12  ;;  %v5140_v21 = vpop.f32.mrb[19].mxu1 }
 0x35a   : > { %v5348_v43 = vpack.c.bf16 %v5323_v9, %v5322_v32  ;;  %v5255_v10 = vmul.f32 %v6910_v3, %v8366_v5  ;;  %v6912_v48 = vadd.f32 %v5140_v21, %v8327_v52 }
 0x35b   : > { %v5296_v53 = vadd.f32 %v8372_v37, %v5257_v41  ;;  %v5258_v33 = vmul.f32 %v6911_v49, %v8366_v5 }
 0x35c   : > { %v5294_v45 = vadd.f32 %v8372_v37, %v5255_v10  ;;  %v5256_v13 = vmul.f32 %v6912_v48, %v8366_v5  ;;  %6839 = vmatprep.mubr.msk.bf16.mxu0 %vm442_vm1, %v5348_v43 }
 0x35d   : > { %v5297_v42 = vadd.f32 %v8372_v37, %v5258_v33  ;;  %6840 = vmatmul.mubr.msk.bf16.gmra.mrb[76].mxu0 %vm442_vm1, %v5349_v29  ;;  %v5328_v28 = vmax.f32 %v5296_v53, 0.0 }
 0x35e   : > { %v5295_v12 = vadd.f32 %v8372_v37, %v5256_v13  ;;  %v6815_v23 = vpop.f32.mrb[20].mxu1  ;;  %v5326_v46 = vmax.f32 %v5294_v45, 0.0 }
 0x35f   : > { %v5329_v31 = vmax.f32 %v5297_v42, 0.0  ;;  %v6913_v52 = vadd.f32 %v6815_v23, %v8333_v44  ;;  %v5153_v47 = vpop.f32.mrb[21].mxu1 }
 0x360   : > { %v5327_v18 = vmax.f32 %v5295_v12, 0.0  ;;  %v6914_v26 = vadd.f32 %v5153_v47, %v8335_v22  ;;  %v6816_v30 = vpop.f32.mrb[22].mxu1 }
 0x361   : > { %v5351_v55 = vpack.c.bf16 %v5329_v31, %v5328_v28  ;;  %v5261_v2 = vmul.f32 %v6913_v52, %v8366_v5  ;;  %v6915_v1 = vadd.f32 %v6816_v30, %v8337_v63  ;;  %v5156_v62 = vpop.f32.mrb[23].mxu1 }
 0x362   : > { %v5350_v36 = vpack.c.bf16 %v5327_v18, %v5326_v46  ;;  %v5259_v25 = vmul.f32 %v6914_v26, %v8366_v5  ;;  %v6916_v39 = vadd.f32 %v5156_v62, %v8340_v34  ;;  %v7206_v62 = vld [vmem:[%s7316_s15 + $0x20] sm:$0xff]  }
 0x363   : > { %v5300_v27 = vadd.f32 %v8372_v37, %v5261_v2  ;;  %v5262_v44 = vmul.f32 %v6915_v1, %v8366_v5  ;;  %v7203_v2 = vld [vmem:[%s7316_s15 + $0x8] sm:$0xff]   ;;  %v7205_v1 = vld [vmem:[%s7316_s15 + $0x18] sm:$0xff]  }
 0x364   : > { %v5298_v19 = vadd.f32 %v8372_v37, %v5259_v25  ;;  %v5260_v22 = vmul.f32 %v6916_v39, %v8366_v5  ;;  %6843 = vmatprep.mubr.msk.bf16.mxu0 %vm442_vm1, %v5350_v36  ;;  %v7207_v36 = vld [vmem:[%s7316_s15 + $0x28] sm:$0xff]   ;;  %v7208_v25 = vld [vmem:[%s7316_s15 + $0x30] sm:$0xff]   ;;  %v7209_v39 = vld [vmem:[%s7316_s15 + $0x38] sm:$0xff]  }
 0x365   : > { %v5301_v35 = vadd.f32 %v8372_v37, %v5262_v44  ;;  %6844 = vmatmul.mubr.msk.bf16.gmra.mrb[80].mxu0 %vm442_vm1, %v5351_v55  ;;  %v5332_v6 = vmax.f32 %v5300_v27, 0.0  ;;  %v7210_v27 = vld [vmem:[%s7316_s15 + $0x40] sm:$0xff]   ;;  %v7211_v44 = vld [vmem:[%s7316_s15 + $0x48] sm:$0xff]  }
 0x366   : > { %v5299_v63 = vadd.f32 %v8372_v37, %v5260_v22  ;;  %v6819_v0 = vpop.f32.mrb[24].mxu1  ;;  %v5330_v38 = vmax.f32 %v5298_v19, 0.0  ;;  %v7212_v19 = vld [vmem:[%s7316_s15 + $0x50] sm:$0xff]   ;;  %v7213_v22 = vld [vmem:[%s7316_s15 + $0x58] sm:$0xff]  }
 0x367   : > { %v5333_v15 = vmax.f32 %v5301_v35, 0.0  ;;  %v6917_v34 = vadd.f32 %v6819_v0, %v8343_v20  ;;  %v5169_v50 = vpop.f32.mrb[25].mxu1  ;;  %v7214_v35 = vld [vmem:[%s7316_s15 + $0x60] sm:$0xff]   ;;  %v7216_v0 = vld [vmem:[%s7316_s15 + $0x70] sm:$0xff]  }
 0x368   : > { %v5331_v51 = vmax.f32 %v5299_v63, 0.0  ;;  %v6918_v14 = vadd.f32 %v5169_v50, %v8345_v40  ;;  %v6820_v61 = vpop.f32.mrb[26].mxu1  ;;  %v7215_v63 = vld [vmem:[%s7316_s15 + $0x68] sm:$0xff]  }
 0x369   : > { %v5353_v54 = vpack.c.bf16 %v5333_v15, %v5332_v6  ;;  %v5265_v17 = vmul.f32 %v6917_v34, %v8366_v5  ;;  %v6919_v8 = vadd.f32 %v6820_v61, %v8347_v16  ;;  %v5172_v56 = vpop.f32.mrb[27].mxu1  ;;  %v7217_v6 = vld [vmem:[%s7316_s15 + $0x78] sm:$0xff]  }
 0x36a   : > { %v5352_v59 = vpack.c.bf16 %v5331_v51, %v5330_v38  ;;  %v5263_v24 = vmul.f32 %v6918_v14, %v8366_v5  ;;  %v6920_v32 = vadd.f32 %v5172_v56, %v8349_v7 }
 0x36b   : > { %v5304_v9 = vadd.f32 %v8372_v37, %v5265_v17  ;;  %v5266_v20 = vmul.f32 %v6919_v8, %v8366_v5 }
 0x36c   : > { %v5302_v3 = vadd.f32 %v8372_v37, %v5263_v24  ;;  %v5264_v40 = vmul.f32 %v6920_v32, %v8366_v5  ;;  %6847 = vmatprep.mubr.msk.bf16.mxu0 %vm442_vm1, %v5352_v59 }
 0x36d   : > { %v5305_v11 = vadd.f32 %v8372_v37, %v5266_v20  ;;  %6848 = vmatmul.mubr.msk.bf16.gmra.mrb[84].mxu0 %vm442_vm1, %v5353_v54  ;;  %v5336_v41 = vmax.f32 %v5304_v9, 0.0 }
 0x36e   : > { %v5303_v16 = vadd.f32 %v8372_v37, %v5264_v40  ;;  %v6823_v29 = vpop.f32.mrb[28].mxu1  ;;  %v5334_v43 = vmax.f32 %v5302_v3, 0.0 }
 0x36f   : > { %v5337_v49 = vmax.f32 %v5305_v11, 0.0  ;;  %v6921_v7 = vadd.f32 %v6823_v29, %v8351_v58  ;;  %v5185_v21 = vpop.f32.mrb[29].mxu1 }
 0x370   : > { %v5335_v10 = vmax.f32 %v5303_v16, 0.0  ;;  %v6922_v48 = vadd.f32 %v5185_v21, %v8353_v60  ;;  %v6824_v53 = vpop.f32.mrb[30].mxu1 }
 0x371   : > { %v5355_v33 = vpack.c.bf16 %v5337_v49, %v5336_v41  ;;  %v5269_v45 = vmul.f32 %v6921_v7, %v8366_v5  ;;  %v6923_v13 = vadd.f32 %v6824_v53, %v8355_v4  ;;  %v5188_v42 = vpop.f32.mrb[31].mxu1 }
 0x372   : > { %v5354_v12 = vpack.c.bf16 %v5335_v10, %v5334_v43  ;;  %v5267_v23 = vmul.f32 %v6922_v48, %v8366_v5  ;;  %v6924_v28 = vadd.f32 %v5188_v42, %v8357_v57  ;;  %v8571_v42 = vld [vmem:[%s8823_s9] ss:$0 sm:$0xff] }
 0x373   : > { %v5308_v31 = vadd.f32 %v8372_v37, %v5269_v45  ;;  %v5270_v58 = vmul.f32 %v6923_v13, %v8366_v5 }
 0x374   : > { %v5306_v52 = vadd.f32 %v8372_v37, %v5267_v23  ;;  %v5268_v60 = vmul.f32 %v6924_v28, %v8366_v5  ;;  %6851 = vmatprep.mubr.msk.bf16.mxu0 %vm442_vm1, %v5354_v12  ;;  %v7202_v5 = vld [vmem:[%s7316_s15] sm:$0xff]  }
 0x375   : > { %v5309_v4 = vadd.f32 %v8372_v37, %v5270_v58  ;;  %6852 = vmatmul.mubr.msk.bf16.gmra.mrb[88].mxu0 %vm442_vm1, %v5355_v33  ;;  %v5340_v47 = vmax.f32 %v5308_v31, 0.0  ;;  %v8576_v12 = vld [vmem:[%s8825_s11] ss:$0 sm:$0xff] }
 0x376   : > { %v5307_v57 = vadd.f32 %v8372_v37, %v5268_v60  ;;  %v5338_v18 = vmax.f32 %v5306_v52, 0.0  ;;  %v7204_v37 = vld [vmem:[%s7316_s15 + $0x10] sm:$0xff]   ;;  %v8582_v28 = vld [vmem:[%s8824_s10] ss:$0 sm:$0xff] }
 0x377   : > { %v5341_v46 = vmax.f32 %v5309_v4, 0.0  ;;  %v8588_v52 = vld [vmem:[%s8826_s12] ss:$0 sm:$0xff] }
 0x378   : > { %v5339_v26 = vmax.f32 %v5307_v57, 0.0 }
 0x379   : > { %v5357_v30 = vpack.c.bf16 %v5341_v46, %v5340_v47 }
 0x37a   : > { %v5356_v55 = vpack.c.bf16 %v5339_v26, %v5338_v18 }
 0x37c   : > { %6855 = vmatprep.mubr.msk.bf16.mxu0 %vm442_vm1, %v5356_v55 }
 0x37d   : > { %6856 = vmatmul.mubr.msk.bf16.gmra.mrb[92].mxu0 %vm442_vm1, %v5357_v30 }
 0x37e   : > { %6861 = vmatprep.mubr.msk.bf16.mxu0 %vm442_vm1, %v7202_v5 }
 0x385   : > { %6862 = vmatmul.mubr.msk.bf16.vlgmr.msra.gmra.mrb[96].mxu0 %vm442_vm1, %v7203_v2 }
 0x386   : > { %6865 = vmatprep.mubr.msk.bf16.mxu0 %vm442_vm1, %v7204_v37 }
 0x38d   : > { %6866 = vmatmul.mubr.msk.bf16.gmra.mrb[100].mxu0 %vm442_vm1, %v7205_v1 }
 0x38e   : > { %6869 = vmatprep.mubr.msk.bf16.mxu0 %vm442_vm1, %v7206_v62 }
 0x395   : > { %6870 = vmatmul.mubr.msk.bf16.gmra.mrb[104].mxu0 %vm442_vm1, %v7207_v36 }
 0x396   : > { %6873 = vmatprep.mubr.msk.bf16.mxu0 %vm442_vm1, %v7208_v25 }
 0x39d   : > { %6874 = vmatmul.mubr.msk.bf16.gmra.mrb[108].mxu0 %vm442_vm1, %v7209_v39 }
 0x39e   : > { %6877 = vmatprep.mubr.msk.bf16.mxu0 %vm442_vm1, %v7210_v27 }
 0x3a5   : > { %6878 = vmatmul.mubr.msk.bf16.gmra.mrb[112].mxu0 %vm442_vm1, %v7211_v44 }
 0x3a6   : > { %6881 = vmatprep.mubr.msk.bf16.mxu0 %vm442_vm1, %v7212_v19 }
 0x3ad   : > { %6882 = vmatmul.mubr.msk.bf16.gmra.mrb[116].mxu0 %vm442_vm1, %v7213_v22 }
 0x3ae   : > { %6885 = vmatprep.mubr.msk.bf16.mxu0 %vm442_vm1, %v7214_v35 }
 0x3b5   : > { %6886 = vmatmul.mubr.msk.bf16.gmra.mrb[120].mxu0 %vm442_vm1, %v7215_v63 }
 0x3b6   : > { %6889 = vmatprep.mubr.msk.bf16.mxu0 %vm442_vm1, %v7216_v0 }
 0x3bd   : > { %6890 = vmatmul.mubr.msk.bf16.gmra.mrb[124].mxu0 %vm442_vm1, %v7217_v6 }
 0x418   : > { %v6829_v15 = vpop.f32.mrb[64].mxu0 }
 0x419   : > { %v5444_v34 = vpop.f32.mrb[65].mxu0  ;;  %v5580_v23 = vmul.f32 %v6829_v15, %v8571_v42 }
 0x41a   : > { %v6830_v50 = vpop.f32.mrb[66].mxu0  ;;  %v5578_v31 = vmul.f32 %v8571_v42, %v5444_v34 }
 0x41b   : > { %v5447_v38 = vpop.f32.mrb[67].mxu0  ;;  %v5581_v60 = vmul.f32 %v6830_v50, %v8571_v42  ;;  %v5619_v26 = vadd.f32 %v8582_v28, %v5580_v23 }
 0x41c   : > { %v5579_v47 = vmul.f32 %v8571_v42, %v5447_v38  ;;  %v5617_v2 = vadd.f32 %v8582_v28, %v5578_v31 }
 0x41d   : > { %v5620_v62 = vadd.f32 %v8582_v28, %v5581_v60 }
 0x41e   : > { %v5618_v39 = vadd.f32 %v8582_v28, %v5579_v47 }
 0x420   : > { %v6833_v51 = vpop.f32.mrb[68].mxu0 }
 0x421   : > { %v5460_v14 = vpop.f32.mrb[69].mxu0  ;;  %v5584_v19 = vmul.f32 %v6833_v51, %v8571_v42 }
 0x422   : > { %v6834_v61 = vpop.f32.mrb[70].mxu0  ;;  %v5582_v63 = vmul.f32 %v8571_v42, %v5460_v14 }
 0x423   : > { %v8518_v54 = vpop.f32.mrb[71].mxu0  ;;  %v5585_v34 = vmul.f32 %v6834_v61, %v8571_v42  ;;  %v5623_v60 = vadd.f32 %v8582_v28, %v5584_v19 }
 0x424   : > { %v5583_v51 = vmul.f32 %v8571_v42, %v8518_v54  ;;  %v5621_v47 = vadd.f32 %v8582_v28, %v5582_v63 }
 0x428   : > { %v8520_v17 = vpop.f32.mrb[72].mxu0 }
 0x429   : > { %v8522_v8 = vpop.f32.mrb[73].mxu0 }
 0x42a   : > { %v8524_v56 = vpop.f32.mrb[74].mxu0 }
 0x42b   : > { %v8526_v59 = vpop.f32.mrb[75].mxu0 }
 0x430   : > { %v8528_v24 = vpop.f32.mrb[76].mxu0 }
 0x431   : > { %v8530_v32 = vpop.f32.mrb[77].mxu0 }
 0x432   : > { %v8532_v9 = vpop.f32.mrb[78].mxu0 }
 0x433   : > { %v8534_v20 = vpop.f32.mrb[79].mxu0 }
 0x438   : > { %v8536_v3 = vpop.f32.mrb[80].mxu0 }
 0x439   : > { %v8538_v40 = vpop.f32.mrb[81].mxu0 }
 0x43a   : > { %v8540_v11 = vpop.f32.mrb[82].mxu0 }
 0x43b   : > { %v8542_v16 = vpop.f32.mrb[83].mxu0 }
 0x440   : > { %v8544_v29 = vpop.f32.mrb[84].mxu0 }
 0x441   : > { %v8546_v41 = vpop.f32.mrb[85].mxu0 }
 0x442   : > { %v8548_v49 = vpop.f32.mrb[86].mxu0 }
 0x443   : > { %v8550_v7 = vpop.f32.mrb[87].mxu0 }
 0x448   : > { %v8552_v21 = vpop.f32.mrb[88].mxu0 }
 0x449   : > { %v8554_v43 = vpop.f32.mrb[89].mxu0 }
 0x44a   : > { %v8556_v10 = vpop.f32.mrb[90].mxu0 }
 0x44b   : > { %v8558_v48 = vpop.f32.mrb[91].mxu0 }
 0x450   : > { %v8560_v53 = vpop.f32.mrb[92].mxu0 }
 0x451   : > { %v8562_v33 = vpop.f32.mrb[93].mxu0 }
 0x452   : > { %v8564_v45 = vpop.f32.mrb[94].mxu0 }
 0x453   : > { %v8566_v13 = vpop.f32.mrb[95].mxu0 }
 0x458   : > { %v6863_v58 = vpop.f32.mrb[96].mxu0 }
 0x459   : > { %v5823_v4 = vmul.f32 %v6863_v58, %v8576_v12  ;;  %v5687_v57 = vpop.f32.mrb[97].mxu0 }
 0x45a   : > { %v5821_v46 = vmul.f32 %v8576_v12, %v5687_v57  ;;  %v6864_v18 = vpop.f32.mrb[98].mxu0 }
 0x45b   : > { %v5862_v30 = vadd.f32 %v8588_v52, %v5823_v4  ;;  %v5824_v55 = vmul.f32 %v6864_v18, %v8576_v12  ;;  %v5690_v5 = vpop.f32.mrb[99].mxu0  ;;  %v5624_v18 = vadd.f32 %v8582_v28, %v5585_v34 }
 0x45c   : > { %v5860_v37 = vadd.f32 %v8588_v52, %v5821_v46  ;;  %v5822_v1 = vmul.f32 %v8576_v12, %v5690_v5 }
 0x45d   : > { %v5894_v36 = vadd.f32 %v5862_v30, %v5619_v26  ;;  %v5863_v25 = vadd.f32 %v8588_v52, %v5824_v55  ;;  %v5622_v55 = vadd.f32 %v8582_v28, %v5583_v51 }
 0x45e   : > { %v5892_v27 = vadd.f32 %v5860_v37, %v5617_v2  ;;  %v5861_v44 = vadd.f32 %v8588_v52, %v5822_v1  ;;  %v5588_v37 = vmul.f32 %v8520_v17, %v8571_v42  ;;  %v5587_v17 = vmul.f32 %v8571_v42, %v8526_v59 }
 0x45f   : > { %v5926_v22 = vmax.f32 %v5894_v36, 0.0  ;;  %v5895_v35 = vadd.f32 %v5863_v25, %v5620_v62  ;;  %v5586_v36 = vmul.f32 %v8571_v42, %v8522_v8 }
 0x460   : > { %v5924_v0 = vmax.f32 %v5892_v27, 0.0  ;;  %v5893_v6 = vadd.f32 %v5861_v44, %v5618_v39  ;;  %v6867_v15 = vpop.f32.mrb[100].mxu0  ;;  %v5589_v44 = vmul.f32 %v8524_v56, %v8571_v42 }
 0x461   : > { %5959 = vst.msk [vmem:[%s8606_s29 + $0x10] sm:$0xff] %vm5956_vm7, %v5926_v22  ;;  %v5927_v50 = vmax.f32 %v5895_v35, 0.0  ;;  %v5827_v38 = vmul.f32 %v6867_v15, %v8576_v12  ;;  %v5703_v23 = vpop.f32.mrb[101].mxu0 }
 0x462   : > { %5957 = vst.msk [vmem:[%s8606_s29] sm:$0xff] %vm5956_vm7, %v5924_v0  ;;  %v5925_v31 = vmax.f32 %v5893_v6, 0.0  ;;  %v5825_v14 = vmul.f32 %v8576_v12, %v5703_v23  ;;  %v6868_v58 = vpop.f32.mrb[102].mxu0  ;;  %v5627_v6 = vadd.f32 %v8582_v28, %v5588_v37  ;;  %v5628_v23 = vadd.f32 %v8582_v28, %v5589_v44 }
 0x463   : > { %5960 = vst.msk [vmem:[%s8606_s29 + $0x18] sm:$0xff] %vm5956_vm7, %v5927_v50  ;;  %v5866_v61 = vadd.f32 %v8588_v52, %v5827_v38  ;;  %v5828_v4 = vmul.f32 %v6868_v58, %v8576_v12  ;;  %v5706_v57 = vpop.f32.mrb[103].mxu0  ;;  %v5625_v50 = vadd.f32 %v8582_v28, %v5586_v36 }
 0x464   : > { %5958 = vst.msk [vmem:[%s8606_s29 + $0x8] sm:$0xff] %vm5956_vm7, %v5925_v31  ;;  %v5864_v54 = vadd.f32 %v8588_v52, %v5825_v14  ;;  %v5826_v46 = vmul.f32 %v8576_v12, %v5706_v57  ;;  %v5626_v14 = vadd.f32 %v8582_v28, %v5587_v17 }
 0x465   : > { %v5898_v26 = vadd.f32 %v5866_v61, %v5623_v60  ;;  %v5867_v30 = vadd.f32 %v8588_v52, %v5828_v4  ;;  %v5592_v61 = vmul.f32 %v8528_v24, %v8571_v42  ;;  %v5591_v24 = vmul.f32 %v8571_v42, %v8534_v20 }
 0x466   : > { %v5896_v5 = vadd.f32 %v5864_v54, %v5621_v47  ;;  %v5865_v2 = vadd.f32 %v8588_v52, %v5826_v46  ;;  %v5590_v47 = vmul.f32 %v8571_v42, %v8530_v32 }
 0x467   : > { %v5930_v1 = vmax.f32 %v5898_v26, 0.0  ;;  %v5899_v62 = vadd.f32 %v5867_v30, %v5624_v18  ;;  %v5593_v26 = vmul.f32 %v8532_v9, %v8571_v42 }
 0x468   : > { %v5928_v25 = vmax.f32 %v5896_v5, 0.0  ;;  %v5897_v39 = vadd.f32 %v5865_v2, %v5622_v55  ;;  %v6871_v27 = vpop.f32.mrb[104].mxu0 }
 0x469   : > { %5963 = vst.msk [vmem:[%s8606_s29 + $0x30] sm:$0xff] %vm5956_vm7, %v5930_v1  ;;  %v5931_v19 = vmax.f32 %v5899_v62, 0.0  ;;  %v5831_v22 = vmul.f32 %v6871_v27, %v8576_v12  ;;  %v5719_v35 = vpop.f32.mrb[105].mxu0  ;;  %v5631_v1 = vadd.f32 %v8582_v28, %v5592_v61  ;;  %v5632_v27 = vadd.f32 %v8582_v28, %v5593_v26 }
 0x46a   : > { %5961 = vst.msk [vmem:[%s8606_s29 + $0x20] sm:$0xff] %vm5956_vm7, %v5928_v25  ;;  %v5929_v63 = vmax.f32 %v5897_v39, 0.0  ;;  %v5829_v8 = vmul.f32 %v8576_v12, %v5719_v35  ;;  %v6872_v0 = vpop.f32.mrb[106].mxu0  ;;  %v5629_v25 = vadd.f32 %v8582_v28, %v5590_v47 }
 0x46b   : > { %5964 = vst.msk [vmem:[%s8606_s29 + $0x38] sm:$0xff] %vm5956_vm7, %v5931_v19  ;;  %v5870_v56 = vadd.f32 %v8588_v52, %v5831_v22  ;;  %v5832_v15 = vmul.f32 %v6872_v0, %v8576_v12  ;;  %v5722_v34 = vpop.f32.mrb[107].mxu0  ;;  %v5630_v22 = vadd.f32 %v8582_v28, %v5591_v24  ;;  %v5598_v24 = vmul.f32 %v8571_v42, %v8546_v41 }
 0x46c   : > { %5962 = vst.msk [vmem:[%s8606_s29 + $0x28] sm:$0xff] %vm5956_vm7, %v5929_v63  ;;  %v5868_v59 = vadd.f32 %v8588_v52, %v5829_v8  ;;  %v5830_v38 = vmul.f32 %v8576_v12, %v5722_v34  ;;  %v5596_v63 = vmul.f32 %v8536_v3, %v8571_v42  ;;  %v5595_v3 = vmul.f32 %v8571_v42, %v8542_v16 }
 0x46d   : > { %v5902_v51 = vadd.f32 %v5870_v56, %v5627_v6  ;;  %v5871_v31 = vadd.f32 %v8588_v52, %v5832_v15  ;;  %v5594_v6 = vmul.f32 %v8571_v42, %v8538_v40 }
 0x46e   : > { %v5900_v58 = vadd.f32 %v5868_v59, %v5625_v50  ;;  %v5869_v60 = vadd.f32 %v8588_v52, %v5830_v38  ;;  %v5597_v50 = vmul.f32 %v8540_v11, %v8571_v42 }
 0x46f   : > { %v5934_v4 = vmax.f32 %v5902_v51, 0.0  ;;  %v5903_v57 = vadd.f32 %v5871_v31, %v5628_v23  ;;  %v5633_v61 = vadd.f32 %v8582_v28, %v5594_v6 }
 0x470   : > { %v5932_v54 = vmax.f32 %v5900_v58, 0.0  ;;  %v5901_v46 = vadd.f32 %v5869_v60, %v5626_v14  ;;  %v6875_v18 = vpop.f32.mrb[108].mxu0  ;;  %v5635_v14 = vadd.f32 %v8582_v28, %v5596_v63 }
 0x471   : > { %5967 = vst.msk [vmem:[%s8606_s29 + $0x50] sm:$0xff] %vm5956_vm7, %v5934_v4  ;;  %v5935_v30 = vmax.f32 %v5903_v57, 0.0  ;;  %v5835_v55 = vmul.f32 %v6875_v18, %v8576_v12  ;;  %v5735_v5 = vpop.f32.mrb[109].mxu0  ;;  %v5636_v57 = vadd.f32 %v8582_v28, %v5597_v50  ;;  %v5602_v50 = vmul.f32 %v8571_v42, %v8554_v43 }
 0x472   : > { %5965 = vst.msk [vmem:[%s8606_s29 + $0x40] sm:$0xff] %vm5956_vm7, %v5932_v54  ;;  %v5933_v2 = vmax.f32 %v5901_v46, 0.0  ;;  %v5833_v32 = vmul.f32 %v8576_v12, %v5735_v5  ;;  %v6876_v37 = vpop.f32.mrb[110].mxu0  ;;  %v5634_v46 = vadd.f32 %v8582_v28, %v5595_v3  ;;  %v5605_v3 = vmul.f32 %v8556_v10, %v8571_v42 }
 0x473   : > { %5968 = vst.msk [vmem:[%s8606_s29 + $0x58] sm:$0xff] %vm5956_vm7, %v5935_v30  ;;  %v5874_v9 = vadd.f32 %v8588_v52, %v5835_v55  ;;  %v5836_v62 = vmul.f32 %v6876_v37, %v8576_v12  ;;  %v5738_v36 = vpop.f32.mrb[111].mxu0  ;;  %v5600_v30 = vmul.f32 %v8544_v29, %v8571_v42  ;;  %v5599_v29 = vmul.f32 %v8571_v42, %v8550_v7 }
 0x474   : > { %5966 = vst.msk [vmem:[%s8606_s29 + $0x48] sm:$0xff] %vm5956_vm7, %v5933_v2  ;;  %v5872_v20 = vadd.f32 %v8588_v52, %v5833_v32  ;;  %v5834_v39 = vmul.f32 %v8576_v12, %v5738_v36 }
 0x475   : > { %v5906_v44 = vadd.f32 %v5874_v9, %v5631_v1  ;;  %v5875_v19 = vadd.f32 %v8588_v52, %v5836_v62  ;;  %v5601_v1 = vmul.f32 %v8548_v49, %v8571_v42 }
 0x476   : > { %v5904_v35 = vadd.f32 %v5872_v20, %v5629_v25  ;;  %v5873_v17 = vadd.f32 %v8588_v52, %v5834_v39  ;;  %v5639_v39 = vadd.f32 %v8582_v28, %v5600_v30  ;;  %v5608_v30 = vmul.f32 %v8560_v53, %v8571_v42 }
 0x477   : > { %v5938_v8 = vmax.f32 %v5906_v44, 0.0  ;;  %v5907_v0 = vadd.f32 %v5875_v19, %v5632_v27  ;;  %v5637_v19 = vadd.f32 %v8582_v28, %v5598_v24  ;;  %v5606_v24 = vmul.f32 %v8571_v42, %v8562_v33 }
 0x478   : > { %v5936_v56 = vmax.f32 %v5904_v35, 0.0  ;;  %v5905_v15 = vadd.f32 %v5873_v17, %v5630_v22  ;;  %v6879_v34 = vpop.f32.mrb[112].mxu0  ;;  %v5640_v35 = vadd.f32 %v8582_v28, %v5601_v1  ;;  %v5609_v1 = vmul.f32 %v8564_v45, %v8571_v42 }
 0x479   : > { %5971 = vst.msk [vmem:[%s8606_s29 + $0x70] sm:$0xff] %vm5956_vm7, %v5938_v8  ;;  %v5939_v59 = vmax.f32 %v5907_v0, 0.0  ;;  %v5839_v38 = vmul.f32 %v6879_v34, %v8576_v12  ;;  %v5751_v23 = vpop.f32.mrb[113].mxu0  ;;  %v5638_v8 = vadd.f32 %v8582_v28, %v5599_v29  ;;  %v5607_v53 = vmul.f32 %v8571_v42, %v8566_v13 }
 0x47a   : > { %5969 = vst.msk [vmem:[%s8606_s29 + $0x60] sm:$0xff] %vm5956_vm7, %v5936_v56  ;;  %v5937_v51 = vmax.f32 %v5905_v15, 0.0  ;;  %v5837_v40 = vmul.f32 %v8576_v12, %v5751_v23  ;;  %v6880_v31 = vpop.f32.mrb[114].mxu0  ;;  %v5604_v56 = vmul.f32 %v8552_v21, %v8571_v42  ;;  %v5603_v21 = vmul.f32 %v8571_v42, %v8558_v48 }
 0x47b   : > { %5972 = vst.msk [vmem:[%s8606_s29 + $0x78] sm:$0xff] %vm5956_vm7, %v5939_v59  ;;  %v5878_v11 = vadd.f32 %v8588_v52, %v5839_v38  ;;  %v5840_v58 = vmul.f32 %v6880_v31, %v8576_v12  ;;  %v5754_v60 = vpop.f32.mrb[115].mxu0 }
 0x47c   : > { %5970 = vst.msk [vmem:[%s8606_s29 + $0x68] sm:$0xff] %vm5956_vm7, %v5937_v51  ;;  %v5876_v16 = vadd.f32 %v8588_v52, %v5837_v40  ;;  %v5838_v4 = vmul.f32 %v8576_v12, %v5754_v60 }
 0x47d   : > { %v5910_v47 = vadd.f32 %v5878_v11, %v5635_v14  ;;  %v5879_v54 = vadd.f32 %v8588_v52, %v5840_v58  ;;  %v5643_v58 = vadd.f32 %v8582_v28, %v5604_v56 }
 0x47e   : > { %v5908_v18 = vadd.f32 %v5876_v16, %v5633_v61  ;;  %v5877_v26 = vadd.f32 %v8588_v52, %v5838_v4  ;;  %v5641_v16 = vadd.f32 %v8582_v28, %v5602_v50 }
 0x47f   : > { %v5942_v55 = vmax.f32 %v5910_v47, 0.0  ;;  %v5911_v5 = vadd.f32 %v5879_v54, %v5636_v57  ;;  %v5644_v57 = vadd.f32 %v8582_v28, %v5605_v3 }
 0x480   : > { %v5940_v2 = vmax.f32 %v5908_v18, 0.0  ;;  %v5909_v32 = vadd.f32 %v5877_v26, %v5634_v46  ;;  %v6883_v37 = vpop.f32.mrb[116].mxu0  ;;  %v5642_v46 = vadd.f32 %v8582_v28, %v5603_v21 }
 0x481   : > { %5975 = vst.msk [vmem:[%s8606_s29 + $0x90] sm:$0xff] %vm5956_vm7, %v5942_v55  ;;  %v5943_v9 = vmax.f32 %v5911_v5, 0.0  ;;  %v5843_v62 = vmul.f32 %v6883_v37, %v8576_v12  ;;  %v5767_v36 = vpop.f32.mrb[117].mxu0 }
 0x482   : > { %5973 = vst.msk [vmem:[%s8606_s29 + $0x80] sm:$0xff] %vm5956_vm7, %v5940_v2  ;;  %v5941_v25 = vmax.f32 %v5909_v32, 0.0  ;;  %v5841_v41 = vmul.f32 %v8576_v12, %v5767_v36  ;;  %v6884_v20 = vpop.f32.mrb[118].mxu0 }
 0x483   : > { %5976 = vst.msk [vmem:[%s8606_s29 + $0x98] sm:$0xff] %vm5956_vm7, %v5943_v9  ;;  %v5882_v49 = vadd.f32 %v8588_v52, %v5843_v62  ;;  %v5844_v27 = vmul.f32 %v6884_v20, %v8576_v12  ;;  %v5770_v44 = vpop.f32.mrb[119].mxu0 }
 0x484   : > { %5974 = vst.msk [vmem:[%s8606_s29 + $0x88] sm:$0xff] %vm5956_vm7, %v5941_v25  ;;  %v5880_v7 = vadd.f32 %v8588_v52, %v5841_v41  ;;  %v5842_v22 = vmul.f32 %v8576_v12, %v5770_v44  ;;  %v5647_v41 = vadd.f32 %v8582_v28, %v5608_v30 }
 0x485   : > { %v5914_v17 = vadd.f32 %v5882_v49, %v5639_v39  ;;  %v5883_v63 = vadd.f32 %v8588_v52, %v5844_v27  ;;  %v5645_v49 = vadd.f32 %v8582_v28, %v5606_v24  ;;  %v5648_v27 = vadd.f32 %v8582_v28, %v5609_v1 }
 0x486   : > { %v5912_v0 = vadd.f32 %v5880_v7, %v5637_v19  ;;  %v5881_v6 = vadd.f32 %v8588_v52, %v5842_v22  ;;  %v5646_v7 = vadd.f32 %v8582_v28, %v5607_v53 }
 0x487   : > { %v5946_v15 = vmax.f32 %v5914_v17, 0.0  ;;  %v5915_v34 = vadd.f32 %v5883_v63, %v5640_v35 }
 0x488   : > { %v5944_v59 = vmax.f32 %v5912_v0, 0.0  ;;  %v5913_v38 = vadd.f32 %v5881_v6, %v5638_v8  ;;  %v6887_v23 = vpop.f32.mrb[120].mxu0 }
 0x489   : > { %5979 = vst.msk [vmem:[%s8606_s29 + $0xb0] sm:$0xff] %vm5956_vm7, %v5946_v15  ;;  %v5947_v51 = vmax.f32 %v5915_v34, 0.0  ;;  %v5847_v40 = vmul.f32 %v6887_v23, %v8576_v12  ;;  %v5783_v31 = vpop.f32.mrb[121].mxu0 }
 0x48a   : > { %5977 = vst.msk [vmem:[%s8606_s29 + $0xa0] sm:$0xff] %vm5956_vm7, %v5944_v59  ;;  %v5945_v14 = vmax.f32 %v5913_v38, 0.0  ;;  %v5845_v43 = vmul.f32 %v8576_v12, %v5783_v31  ;;  %v6888_v11 = vpop.f32.mrb[122].mxu0 }
 0x48b   : > { %5980 = vst.msk [vmem:[%s8606_s29 + $0xb8] sm:$0xff] %vm5956_vm7, %v5947_v51  ;;  %v5886_v10 = vadd.f32 %v8588_v52, %v5847_v40  ;;  %v5848_v60 = vmul.f32 %v6888_v11, %v8576_v12  ;;  %v5786_v61 = vpop.f32.mrb[123].mxu0 }
 0x48c   : > { %5978 = vst.msk [vmem:[%s8606_s29 + $0xa8] sm:$0xff] %vm5956_vm7, %v5945_v14  ;;  %v5884_v48 = vadd.f32 %v8588_v52, %v5845_v43  ;;  %v5846_v4 = vmul.f32 %v8576_v12, %v5786_v61 }
 0x48d   : > { %v5918_v47 = vadd.f32 %v5886_v10, %v5643_v58  ;;  %v5887_v54 = vadd.f32 %v8588_v52, %v5848_v60 }
 0x48e   : > { %v5916_v18 = vadd.f32 %v5884_v48, %v5641_v16  ;;  %v5885_v26 = vadd.f32 %v8588_v52, %v5846_v4 }
 0x48f   : > { %v5950_v55 = vmax.f32 %v5918_v47, 0.0  ;;  %v5919_v5 = vadd.f32 %v5887_v54, %v5644_v57 }
 0x490   : > { %v5948_v2 = vmax.f32 %v5916_v18, 0.0  ;;  %v5917_v32 = vadd.f32 %v5885_v26, %v5642_v46  ;;  %v6891_v37 = vpop.f32.mrb[124].mxu0 }
 0x491   : > { %5983 = vst.msk [vmem:[%s8606_s29 + $0xd0] sm:$0xff] %vm5956_vm7, %v5950_v55  ;;  %v5951_v9 = vmax.f32 %v5919_v5, 0.0  ;;  %v5851_v62 = vmul.f32 %v6891_v37, %v8576_v12  ;;  %v5799_v36 = vpop.f32.mrb[125].mxu0 }
 0x492   : > { %5981 = vst.msk [vmem:[%s8606_s29 + $0xc0] sm:$0xff] %vm5956_vm7, %v5948_v2  ;;  %v5949_v29 = vmax.f32 %v5917_v32, 0.0  ;;  %v5849_v33 = vmul.f32 %v8576_v12, %v5799_v36  ;;  %v6892_v25 = vpop.f32.mrb[126].mxu0 }
 0x493   : > { %5984 = vst.msk [vmem:[%s8606_s29 + $0xd8] sm:$0xff] %vm5956_vm7, %v5951_v9  ;;  %v5890_v45 = vadd.f32 %v8588_v52, %v5851_v62  ;;  %v5852_v20 = vmul.f32 %v6892_v25, %v8576_v12  ;;  %v5802_v39 = vpop.f32.mrb[127].mxu0 }
 0x494   : > { %5982 = vst.msk [vmem:[%s8606_s29 + $0xc8] sm:$0xff] %vm5956_vm7, %v5949_v29  ;;  %v5888_v13 = vadd.f32 %v8588_v52, %v5849_v33  ;;  %v5850_v42 = vmul.f32 %v8576_v12, %v5802_v39 }
 0x495   : > { %v5922_v44 = vadd.f32 %v5890_v45, %v5647_v41  ;;  %v5891_v19 = vadd.f32 %v8588_v52, %v5852_v20 }
 0x496   : > { %v5920_v22 = vadd.f32 %v5888_v13, %v5645_v49  ;;  %v5889_v35 = vadd.f32 %v8588_v52, %v5850_v42 }
 0x497   : > { %v5954_v17 = vmax.f32 %v5922_v44, 0.0  ;;  %v5923_v63 = vadd.f32 %v5891_v19, %v5648_v27 }
 0x498   : > { %v5952_v8 = vmax.f32 %v5920_v22, 0.0  ;;  %v5921_v0 = vadd.f32 %v5889_v35, %v5646_v7 }
 0x499   : > { %5987 = vst.msk [vmem:[%s8606_s29 + $0xf0] sm:$0xff] %vm5956_vm7, %v5954_v17  ;;  %v5955_v6 = vmax.f32 %v5923_v63, 0.0 }
 0x49a   : > { %5985 = vst.msk [vmem:[%s8606_s29 + $0xe0] sm:$0xff] %vm5956_vm7, %v5952_v8  ;;  %v5953_v12 = vmax.f32 %v5921_v0, 0.0 }
 0x49b   : > { %5988 = vst.msk [vmem:[%s8606_s29 + $0xf8] sm:$0xff] %vm5956_vm7, %v5955_v6 }
 0x49c   : > { %5986 = vst.msk [vmem:[%s8606_s29 + $0xe8] sm:$0xff] %vm5956_vm7, %v5953_v12 }
 0x49d PF: > { %s23_s25 = sadd.s32 1, %s7224_s25  }
 0x49e   : > { %p20_p4 = scmp.ge.s32.totalorder %s23_s25, 4  }
 0x4a0   :  { %22 = sbr.rel (!%p20_p4) target bundleno = 1 (0x1), region = 113 }

</bundles_post_ra>
